<compile_context>
chip_gen: v6e
topology: v6e:2x2x1
jax: 0.10.0
libtpu: 0.0.40
codegen_flags: <defaults>
</compile_context>

<pallas_src>
import jax
import jax.numpy as jnp
from jax import lax
from jax.experimental import pallas as pl
from jax.experimental.pallas import tpu as pltpu

_EPS = 1e-5
_LANES = 128


def _round_up(x, m):
    return ((x + m - 1) // m) * m


def _vmem_limit_bytes():
    """Generation-aware VMEM budget (v5e/v6e: 128 MiB, v7x: 64 MiB per TC)."""
    cap = 64 * 1024 * 1024
    try:
        info = pltpu.get_tpu_info()
        cap = int(getattr(info, "vmem_capacity_bytes", cap) or cap)
    except Exception:
        pass
    return int(min(max(cap * 5 // 8, 32 * 1024 * 1024), 96 * 1024 * 1024))


def _images_per_block(n, rows_per_img, bytes_per_img, vmem_limit):
    """Fuse images per grid step for tiny feature maps (keeps matmul M large),
    while keeping >= 2 grid steps (pipelining / megacore) and bounded VMEM."""
    best = 1
    for nb in range(2, n + 1):
        if n % nb:
            continue
        if n // nb < 2:                      # keep at least 2 grid steps
            break
        if nb * rows_per_img > 512:          # matmul M already large enough
            break
        if 3 * nb * bytes_per_img > vmem_limit:
            break
        best = nb
    return best


def _row_tile(rows):
    if rows >= 1024:
        return 1024
    if rows >= 512:
        return 512
    return rows                               # full-array block (always legal)


def _img_block_spec(nb, *tail):
    lead = None if nb == 1 else nb            # squeeze batch dim when 1 image/step
    zeros = (0,) * len(tail)
    return pl.BlockSpec((lead,) + tuple(tail), lambda n: (n,) + zeros)


def _row_spec(block, depth=None):
    idx = lambda i: (i, 0)
    if depth is not None:
        try:
            return pl.BlockSpec(block, idx, pipeline_mode=pl.Buffered(depth))
        except Exception:
            pass
    return pl.BlockSpec(block, idx)


# --------------------- stage 1: conv1 (+ 1x1 projection) -------------------- #
def _make_conv1_kernel(tap_offsets, Cp, Ho, Wo, nb, has_proj):
    squeeze = nb == 1
    rows = nb * Ho * Wo

    def tap_load(x_ref, r0, c0, ch0):
        if squeeze:
            return x_ref[r0:r0 + Ho, c0:c0 + Wo, ch0:ch0 + Cp].reshape(rows, Cp)
        return x_ref[:, r0:r0 + Ho, c0:c0 + Wo, ch0:ch0 + Cp].reshape(rows, Cp)

    def kernel(*refs):
        if has_proj:
            (x_ref, w1_ref, xs_ref, ws_ref,
             c1_ref, st1_ref, cs_ref, sts_ref) = refs
        else:
            x_ref, w1_ref, c1_ref, st1_ref = refs

        # 9 tap matmuls accumulated directly in f32 (no materialized im2col slab).
        acc = None
        for t, (r0, c0, ch0) in enumerate(tap_offsets):
            tap = tap_load(x_ref, r0, c0, ch0)
            part = jnp.dot(tap, w1_ref[t * Cp:(t + 1) * Cp, :],
                           preferred_element_type=jnp.float32)
            acc = part if acc is None else acc + part

        c1_ref[...] = acc.reshape(c1_ref.shape).astype(c1_ref.dtype)   # bf16 store
        # single-store BN partials: row 0 = sum, row 1 = sum of squares
        st1_ref[...] = jnp.concatenate(
            [jnp.sum(acc, axis=0, keepdims=True),
             jnp.sum(acc * acc, axis=0, keepdims=True)], axis=0)

        if has_proj:
            xs = xs_ref[...].reshape(rows, Cp)
            cs = jnp.dot(xs, ws_ref[...], preferred_element_type=jnp.float32)
            cs_ref[...] = cs.reshape(cs_ref.shape).astype(cs_ref.dtype)
            sts_ref[...] = jnp.concatenate(
                [jnp.sum(cs, axis=0, keepdims=True),
                 jnp.sum(cs * cs, axis=0, keepdims=True)], axis=0)

    return kernel


# --------------------- stage 2: bn1 + relu + conv2 -------------------------- #
def _make_conv2_kernel(Ho, Wo, nb):
    squeeze = nb == 1
    rows = nb * Ho * Wo

    def kernel(c1_ref, sc1_ref, sh1_ref, w2_ref, c2_ref, st2_ref, a1p_ref):
        Pp = w2_ref.shape[-1]

        # bn1 (precomputed global scale/shift) + relu in f32, cast bf16 for MXU.
        a1 = jnp.maximum(
            c1_ref[...].astype(jnp.float32) * sc1_ref[...] + sh1_ref[...],
            0.0).astype(jnp.bfloat16)

        # Stage activation in bf16 VMEM scratch with a 1-wide zero halo.
        # NOTE: the halo is re-zeroed every step on purpose (megacore safety, see
        # module docstring); it is tiny relative to the interior store.
        if squeeze:
            a1p_ref[0:1, :, :] = jnp.zeros((1, Wo + 2, Pp), jnp.bfloat16)
            a1p_ref[Ho + 1:Ho + 2, :, :] = jnp.zeros((1, Wo + 2, Pp), jnp.bfloat16)
            a1p_ref[:, 0:1, :] = jnp.zeros((Ho + 2, 1, Pp), jnp.bfloat16)
            a1p_ref[:, Wo + 1:Wo + 2, :] = jnp.zeros((Ho + 2, 1, Pp), jnp.bfloat16)
            a1p_ref[1:Ho + 1, 1:Wo + 1, :] = a1
        else:
            a1p_ref[:, 0:1, :, :] = jnp.zeros((nb, 1, Wo + 2, Pp), jnp.bfloat16)
            a1p_ref[:, Ho + 1:Ho + 2, :, :] = jnp.zeros((nb, 1, Wo + 2, Pp),
                                                        jnp.bfloat16)
            a1p_ref[:, :, 0:1, :] = jnp.zeros((nb, Ho + 2, 1, Pp), jnp.bfloat16)
            a1p_ref[:, :, Wo + 1:Wo + 2, :] = jnp.zeros((nb, Ho + 2, 1, Pp),
                                                        jnp.bfloat16)
            a1p_ref[:, 1:Ho + 1, 1:Wo + 1, :] = a1

        # 9 tap matmuls accumulated directly in f32 (no im2col slab).
        acc = None
        for t in range(9):
            kh, kw = divmod(t, 3)
            if squeeze:
                tap = a1p_ref[kh:kh + Ho, kw:kw + Wo, :].reshape(rows, Pp)
            else:
                tap = a1p_ref[:, kh:kh + Ho, kw:kw + Wo, :].reshape(rows, Pp)
            part = jnp.dot(tap, w2_ref[t * Pp:(t + 1) * Pp, :],
                           preferred_element_type=jnp.float32)
            acc = part if acc is None else acc + part

        c2_ref[...] = acc.reshape(c2_ref.shape).astype(c2_ref.dtype)   # bf16 store
        st2_ref[...] = jnp.concatenate(
            [jnp.sum(acc, axis=0, keepdims=True),
             jnp.sum(acc * acc, axis=0, keepdims=True)], axis=0)

    return kernel


# --------------------- stage 3: bn2 + shortcut + add + relu ----------------- #
def _final_kernel(c2_ref, sc_ref, s2_ref, h2_ref, ss_ref, hs_ref, out_ref):
    y = c2_ref[...].astype(jnp.float32) * s2_ref[...] + h2_ref[...]   # bn2
    s = sc_ref[...].astype(jnp.float32) * ss_ref[...] + hs_ref[...]   # shortcut bn
    out_ref[...] = jnp.maximum(y + s, 0.0)


# --------------------- BN finalize (tiny per-channel reduction) ------------- #
def _bn_scale_shift(stats, gamma, beta, count):
    # Single-pass global stats (var = E[x^2] - mean^2, biased), f32 sums.
    # NOTE: for very large N*H*W with large |mean|/std this can cancel; a
    # two-pass finalize would need a second read of the activations.
    ssum = jnp.sum(stats[:, 0, :], axis=0)
    ssq = jnp.sum(stats[:, 1, :], axis=0)
    mean = ssum / count
    var = jnp.maximum(ssq / count - mean * mean, 0.0)
    scale = gamma.reshape(-1) * lax.rsqrt(var + _EPS)
    shift = beta.reshape(-1) - mean * scale
    return (scale.reshape(1, -1).astype(jnp.float32),
            shift.reshape(1, -1).astype(jnp.float32))


def basic_block_forward(x_nhwc, params, stride=1):
    """Pallas TPU forward of BasicBlock. x_nhwc: (N, H, W, Cin) float32."""
    assert stride in (1, 2), "ResNet BasicBlock uses stride 1 or 2"
    N, H, W, Cin = x_nhwc.shape
    P = params["w1"].shape[-1]
    has_proj = (stride != 1) or (Cin != P)
    Ho = (H + 2 - 3) // stride + 1
    Wo = (W + 2 - 3) // stride + 1
    Cp = _round_up(Cin, _LANES)
    Pp = _round_up(P, _LANES)
    rows = N * Ho * Wo
    rows_per_img = Ho * Wo
    count = rows

    vmem_limit = _vmem_limit_bytes()
    cparams = pltpu.CompilerParams(dimension_semantics=("parallel",),
                                   vmem_limit_bytes=vmem_limit)

    # ---- wrapper-side layout plumbing (channel pad to 128 lanes, bf16) -------
    x_cp = jnp.pad(x_nhwc, ((0, 0), (0, 0), (0, 0), (0, Cp - Cin))
                   ).astype(jnp.bfloat16)

    if stride == 1:
        x_in = jnp.pad(x_cp, ((0, 0), (1, 1), (1, 1), (0, 0)))
        Hin, Win, Cin_eff = H + 2, W + 2, Cp
        tap_offsets = [(kh, kw, 0) for kh in range(3) for kw in range(3)]
    else:
        # space-to-depth so the stride-2 conv becomes dense stride-1 tap slices
        xpad = jnp.pad(x_cp, ((0, 0), (1, 1), (1, 1), (0, 0)))
        Hp2, Wp2 = 2 * (Ho + 1), 2 * (Wo + 1)
        xpad = jnp.pad(xpad, ((0, 0), (0, Hp2 - (H + 2)), (0, Wp2 - (W + 2)),
                              (0, 0)))
        x_in = (xpad.reshape(N, Ho + 1, 2, Wo + 1, 2, Cp)
                    .transpose(0, 1, 3, 2, 4, 5)
                    .reshape(N, Ho + 1, Wo + 1, 4 * Cp))
        Hin, Win, Cin_eff = Ho + 1, Wo + 1, 4 * Cp
        tap_offsets = [(kh // 2, kw // 2, ((kh % 2) * 2 + (kw % 2)) * Cp)
                       for kh in range(3) for kw in range(3)]

    w1f = jnp.pad(params["w1"], ((0, 0), (0, 0), (0, Cp - Cin), (0, Pp - P))
                  ).reshape(9 * Cp, Pp).astype(jnp.bfloat16)
    w2f = jnp.pad(params["w2"], ((0, 0), (0, 0), (0, Pp - P), (0, Pp - P))
                  ).reshape(9 * Pp, Pp).astype(jnp.bfloat16)
    g1 = jnp.pad(params["g1"], ((0, 0), (0, Pp - P)))
    b1 = jnp.pad(params["b1"], ((0, 0), (0, Pp - P)))
    g2 = jnp.pad(params["g2"], ((0, 0), (0, Pp - P)))
    b2 = jnp.pad(params["b2"], ((0, 0), (0, Pp - P)))

    # ---- per-step image blocking (bounded by VMEM budget) --------------------
    per_img_bytes = (Hin * Win * Cin_eff * 2            # conv1 input block (bf16)
                     + 3 * rows_per_img * Pp * 2        # c1 / c2 / cs blocks
                     + (Ho + 2) * (Wo + 2) * Pp * 2     # conv2 scratch
                     + rows_per_img * Pp * 4)           # f32 accumulator
    nb = _images_per_block(N, rows_per_img, per_img_bytes, vmem_limit)
    nblk = N // nb

    # ---- stage 1: conv1 (3x3, stride) and, if needed, the 1x1 projection -----
    in_list = [x_in, w1f]
    in_specs = [_img_block_spec(nb, Hin, Win, Cin_eff),
                pl.BlockSpec((9 * Cp, Pp), lambda n: (0, 0))]
    out_shape = [jax.ShapeDtypeStruct((N, Ho, Wo, Pp), jnp.bfloat16),
                 jax.ShapeDtypeStruct((nblk, 2, Pp), jnp.float32)]
    out_specs = [_img_block_spec(nb, Ho, Wo, Pp),
                 _img_block_spec(1, 2, Pp)]
    if has_proj:
        xs_b = x_cp if stride == 1 else x_cp[:, ::stride, ::stride, :]
        wsf = jnp.pad(params["ws"], ((0, Cp - Cin), (0, Pp - P))
                      ).astype(jnp.bfloat16)
        in_list += [xs_b, wsf]
        in_specs += [_img_block_spec(nb, Ho, Wo, Cp),
                     pl.BlockSpec((Cp, Pp), lambda n: (0, 0))]
        out_shape += [jax.ShapeDtypeStruct((N, Ho, Wo, Pp), jnp.bfloat16),
                      jax.ShapeDtypeStruct((nblk, 2, Pp), jnp.float32)]
        out_specs += [_img_block_spec(nb, Ho, Wo, Pp),
                      _img_block_spec(1, 2, Pp)]

    res_a = pl.pallas_call(
        _make_conv1_kernel(tap_offsets, Cp, Ho, Wo, nb, has_proj),
        grid=(nblk,),
        in_specs=in_specs,
        out_specs=out_specs,
        out_shape=out_shape,
        compiler_params=cparams,
    )(*in_list)
    if has_proj:
        c1, st1, cs, sts = res_a
    else:
        c1, st1 = res_a

    # ---- finalize BN1 (global over N*Ho*Wo) -----------------------------------
    scale1, shift1 = _bn_scale_shift(st1, g1, b1, count)

    # ---- stage 2: bn1 + relu + conv2 (3x3, stride 1) --------------------------
    scratch_shape = ((Ho + 2, Wo + 2, Pp) if nb == 1
                     else (nb, Ho + 2, Wo + 2, Pp))
    c2, st2 = pl.pallas_call(
        _make_conv2_kernel(Ho, Wo, nb),
        grid=(nblk,),
        in_specs=[_img_block_spec(nb, Ho, Wo, Pp),
                  pl.BlockSpec((1, Pp), lambda n: (0, 0)),
                  pl.BlockSpec((1, Pp), lambda n: (0, 0)),
                  pl.BlockSpec((9 * Pp, Pp), lambda n: (0, 0))],
        out_specs=[_img_block_spec(nb, Ho, Wo, Pp),
                   _img_block_spec(1, 2, Pp)],
        out_shape=[jax.ShapeDtypeStruct((N, Ho, Wo, Pp), jnp.bfloat16),
                   jax.ShapeDtypeStruct((nblk, 2, Pp), jnp.float32)],
        scratch_shapes=[pltpu.VMEM(scratch_shape, jnp.bfloat16)],
        compiler_params=cparams,
    )(c1, scale1, shift1, w2f)

    scale2, shift2 = _bn_scale_shift(st2, g2, b2, count)

    # ---- shortcut operands (bf16, lane-dense flat rows) ------------------------
    c2_flat = c2.reshape(rows, Pp)
    if has_proj:
        gs = jnp.pad(params["gs"], ((0, 0), (0, Pp - P)))
        bs = jnp.pad(params["bs"], ((0, 0), (0, Pp - P)))
        scale_s, shift_s = _bn_scale_shift(sts, gs, bs, count)
        sc_flat = cs.reshape(rows, Pp)
    else:
        scale_s = jnp.ones((1, Pp), jnp.float32)
        shift_s = jnp.zeros((1, Pp), jnp.float32)
        sc_flat = x_cp.reshape(rows, Pp)       # reuse channel-padded bf16 input

    # ---- stage 3: bn2 + shortcut + add + relu, tiled over flat rows ------------
    tr = _row_tile(rows)
    grid3 = pl.cdiv(rows, tr)
    depth = 3 if grid3 >= 3 else None          # deeper buffering only when useful
    out_flat = pl.pallas_call(
        _final_kernel,
        grid=(grid3,),
        in_specs=[
            _row_spec((tr, Pp), depth),
            _row_spec((tr, Pp), depth),
            pl.BlockSpec((1, Pp), lambda i: (0, 0)),
            pl.BlockSpec((1, Pp), lambda i: (0, 0)),
            pl.BlockSpec((1, Pp), lambda i: (0, 0)),
            pl.BlockSpec((1, Pp), lambda i: (0, 0)),
        ],
        out_specs=pl.BlockSpec((tr, Pp), lambda i: (i, 0)),
        out_shape=jax.ShapeDtypeStruct((rows, Pp), jnp.float32),
        compiler_params=cparams,
    )(c2_flat, sc_flat, scale2, shift2, scale_s, shift_s)

    return out_flat.reshape(N, Ho, Wo, Pp)[..., :P]


# ------------------------------ pure-JAX reference ------------------------- #
def _bn_ref(y, g, b):
    mean = jnp.mean(y, axis=(0, 1, 2), keepdims=True)
    var = jnp.var(y, axis=(0, 1, 2), keepdims=True)
    return (y - mean) * lax.rsqrt(var + _EPS) * g + b


def basic_block_ref(x_nhwc, params, stride=1):
    dn = ("NHWC", "HWIO", "NHWC")
    y = lax.conv_general_dilated(x_nhwc, params["w1"], (stride, stride),
                                 ((1, 1), (1, 1)), dimension_numbers=dn)
    y = jax.nn.relu(_bn_ref(y, params["g1"], params["b1"]))
    y = lax.conv_general_dilated(y, params["w2"], (1, 1),
                                 ((1, 1), (1, 1)), dimension_numbers=dn)
    y = _bn_ref(y, params["g2"], params["b2"])
    Cin, P = x_nhwc.shape[-1], params["w1"].shape[-1]
    if stride != 1 or Cin != P:
        sc = lax.conv_general_dilated(x_nhwc, params["ws"][None, None],
                                      (stride, stride), ((0, 0), (0, 0)),
                                      dimension_numbers=dn)
        sc = _bn_ref(sc, params["gs"], params["bs"])
    else:
        sc = x_nhwc
    return jax.nn.relu(y + sc)


if __name__ == "__main__":
    key = jax.random.PRNGKey(0)
    N, H, W = 2, 16, 16
    configs = [
        dict(cin=4, planes=8, stride=1),   # projection shortcut (channel change)
        dict(cin=8, planes=8, stride=2),   # projection shortcut (stride 2)
        dict(cin=8, planes=8, stride=1),   # identity shortcut
    ]
    for idx, cfg in enumerate(configs):
        cin, planes, stride = cfg["cin"], cfg["planes"], cfg["stride"]
        ks = jax.random.split(jax.random.fold_in(key, idx), 10)

        # PyTorch layouts: x is NCHW, conv weights are OIHW; transpose for JAX.
        x_nchw = jax.random.normal(ks[0], (N, cin, H, W), jnp.float32)
        w1_oihw = 0.2 * jax.random.normal(ks[1], (planes, cin, 3, 3), jnp.float32)
        w2_oihw = 0.2 * jax.random.normal(ks[2], (planes, planes, 3, 3), jnp.float32)
        params = {
            "w1": jnp.transpose(w1_oihw, (2, 3, 1, 0)),                 # HWIO
            "g1": 1.0 + 0.1 * jax.random.normal(ks[3], (1, planes), jnp.float32),
            "b1": 0.1 * jax.random.normal(ks[4], (1, planes), jnp.float32),
            "w2": jnp.transpose(w2_oihw, (2, 3, 1, 0)),                 # HWIO
            "g2": 1.0 + 0.1 * jax.random.normal(ks[5], (1, planes), jnp.float32),
            "b2": 0.1 * jax.random.normal(ks[6], (1, planes), jnp.float32),
        }
        if stride != 1 or cin != planes:
            ws_oi = 0.2 * jax.random.normal(ks[7], (planes, cin), jnp.float32)
            params["ws"] = jnp.transpose(ws_oi, (1, 0))                 # (Cin, P)
            params["gs"] = 1.0 + 0.1 * jax.random.normal(ks[8], (1, planes),
                                                         jnp.float32)
            params["bs"] = 0.1 * jax.random.normal(ks[9], (1, planes), jnp.float32)

        x_nhwc = jnp.transpose(x_nchw, (0, 2, 3, 1))                    # NCHW->NHWC

        out = jax.block_until_ready(basic_block_forward(x_nhwc, params, stride))
        ref = jax.block_until_ready(basic_block_ref(x_nhwc, params, stride))

        Ho = (H + 2 - 3) // stride + 1
        assert out.shape == ref.shape == (N, Ho, Ho, planes)
        err = float(jnp.max(jnp.abs(out - ref)))
        # bf16 matmul operands + bf16 inter-stage activations (f32 accumulation /
        # f32 BN statistics) vs. pure-f32 reference.
        assert bool(jnp.allclose(out, ref, atol=5e-2, rtol=5e-2)), (idx, err)

    print("KERNEL_OK")
</pallas_src>

<mosaic_0001>
module attributes {stable_mosaic.version = 11 : i64} {
  func.func @kernel(%arg0: i32, %arg1: memref<1x18x18x128xbf16, #tpu.memory_space<vmem>>, %arg2: memref<1152x128xbf16, #tpu.memory_space<vmem>>, %arg3: memref<1x16x16x128xbf16, #tpu.memory_space<vmem>>, %arg4: memref<128x128xbf16, #tpu.memory_space<vmem>>, %arg5: memref<1x16x16x128xbf16, #tpu.memory_space<vmem>>, %arg6: memref<1x2x128xf32, #tpu.memory_space<vmem>>, %arg7: memref<1x16x16x128xbf16, #tpu.memory_space<vmem>>, %arg8: memref<1x2x128xf32, #tpu.memory_space<vmem>>) attributes {dimension_semantics = [#tpu.dimension_semantics<parallel>], iteration_bounds = array<i64: 2>, scalar_prefetch = 0 : i64, scratch_operands = 0 : i64, tpu.core_type = #tpu.core_type<tc>, window_params = [{transform_indices = @transform_0, window_bounds = array<i64: 1, 18, 18, 128>}, {pipeline_mode = #tpu.pipeline_mode<synchronous>, transform_indices = @transform_1, window_bounds = array<i64: 1152, 128>}, {transform_indices = @transform_2, window_bounds = array<i64: 1, 16, 16, 128>}, {pipeline_mode = #tpu.pipeline_mode<synchronous>, transform_indices = @transform_3, window_bounds = array<i64: 128, 128>}, {transform_indices = @transform_4, window_bounds = array<i64: 1, 16, 16, 128>}, {transform_indices = @transform_5, window_bounds = array<i64: 1, 2, 128>}, {transform_indices = @transform_6, window_bounds = array<i64: 1, 16, 16, 128>}, {transform_indices = @transform_7, window_bounds = array<i64: 1, 2, 128>}]} {
    %c0 = arith.constant 0 : index
    %c0_0 = arith.constant 0 : index
    %c0_1 = arith.constant 0 : index
    %c0_2 = arith.constant 0 : index
    %0 = vector.load %arg1[%c0, %c0_0, %c0_1, %c0_2] : memref<1x18x18x128xbf16, #tpu.memory_space<vmem>>, vector<1x16x16x128xbf16>
    %1 = vector.shape_cast %0 : vector<1x16x16x128xbf16> to vector<16x16x128xbf16>
    %2 = vector.shape_cast %1 : vector<16x16x128xbf16> to vector<256x128xbf16>
    %c0_3 = arith.constant 0 : index
    %c0_4 = arith.constant 0 : index
    %3 = vector.load %arg2[%c0_3, %c0_4] : memref<1152x128xbf16, #tpu.memory_space<vmem>>, vector<128x128xbf16>
    %cst = arith.constant dense<0.000000e+00> : vector<256x128xf32>
    %4 = tpu.matmul %2, %3, %cst {dimension_numbers = #tpu.dot_dimension_numbers<[1], [0], [0], [1], [0, 0, 1, 1], [], []>} : vector<256x128xbf16>, vector<128x128xbf16>, vector<256x128xf32> -> vector<256x128xf32>
    %c0_5 = arith.constant 0 : index
    %c0_6 = arith.constant 0 : index
    %c1 = arith.constant 1 : index
    %c0_7 = arith.constant 0 : index
    %5 = vector.load %arg1[%c0_5, %c0_6, %c1, %c0_7] : memref<1x18x18x128xbf16, #tpu.memory_space<vmem>>, vector<1x16x16x128xbf16>
    %6 = vector.shape_cast %5 : vector<1x16x16x128xbf16> to vector<16x16x128xbf16>
    %7 = vector.shape_cast %6 : vector<16x16x128xbf16> to vector<256x128xbf16>
    %c128 = arith.constant 128 : index
    %c0_8 = arith.constant 0 : index
    %8 = vector.load %arg2[%c128, %c0_8] : memref<1152x128xbf16, #tpu.memory_space<vmem>>, vector<128x128xbf16>
    %cst_9 = arith.constant dense<0.000000e+00> : vector<256x128xf32>
    %9 = tpu.matmul %7, %8, %cst_9 {dimension_numbers = #tpu.dot_dimension_numbers<[1], [0], [0], [1], [0, 0, 1, 1], [], []>} : vector<256x128xbf16>, vector<128x128xbf16>, vector<256x128xf32> -> vector<256x128xf32>
    %10 = arith.addf %4, %9 : vector<256x128xf32>
    %c0_10 = arith.constant 0 : index
    %c0_11 = arith.constant 0 : index
    %c2 = arith.constant 2 : index
    %c0_12 = arith.constant 0 : index
    %11 = vector.load %arg1[%c0_10, %c0_11, %c2, %c0_12] : memref<1x18x18x128xbf16, #tpu.memory_space<vmem>>, vector<1x16x16x128xbf16>
    %12 = vector.shape_cast %11 : vector<1x16x16x128xbf16> to vector<16x16x128xbf16>
    %13 = vector.shape_cast %12 : vector<16x16x128xbf16> to vector<256x128xbf16>
    %c256 = arith.constant 256 : index
    %c0_13 = arith.constant 0 : index
    %14 = vector.load %arg2[%c256, %c0_13] : memref<1152x128xbf16, #tpu.memory_space<vmem>>, vector<128x128xbf16>
    %cst_14 = arith.constant dense<0.000000e+00> : vector<256x128xf32>
    %15 = tpu.matmul %13, %14, %cst_14 {dimension_numbers = #tpu.dot_dimension_numbers<[1], [0], [0], [1], [0, 0, 1, 1], [], []>} : vector<256x128xbf16>, vector<128x128xbf16>, vector<256x128xf32> -> vector<256x128xf32>
    %16 = arith.addf %10, %15 : vector<256x128xf32>
    %c0_15 = arith.constant 0 : index
    %c1_16 = arith.constant 1 : index
    %c0_17 = arith.constant 0 : index
    %c0_18 = arith.constant 0 : index
    %17 = vector.load %arg1[%c0_15, %c1_16, %c0_17, %c0_18] : memref<1x18x18x128xbf16, #tpu.memory_space<vmem>>, vector<1x16x16x128xbf16>
    %18 = vector.shape_cast %17 : vector<1x16x16x128xbf16> to vector<16x16x128xbf16>
    %19 = vector.shape_cast %18 : vector<16x16x128xbf16> to vector<256x128xbf16>
    %c384 = arith.constant 384 : index
    %c0_19 = arith.constant 0 : index
    %20 = vector.load %arg2[%c384, %c0_19] : memref<1152x128xbf16, #tpu.memory_space<vmem>>, vector<128x128xbf16>
    %cst_20 = arith.constant dense<0.000000e+00> : vector<256x128xf32>
    %21 = tpu.matmul %19, %20, %cst_20 {dimension_numbers = #tpu.dot_dimension_numbers<[1], [0], [0], [1], [0, 0, 1, 1], [], []>} : vector<256x128xbf16>, vector<128x128xbf16>, vector<256x128xf32> -> vector<256x128xf32>
    %22 = arith.addf %16, %21 : vector<256x128xf32>
    %c0_21 = arith.constant 0 : index
    %c1_22 = arith.constant 1 : index
    %c1_23 = arith.constant 1 : index
    %c0_24 = arith.constant 0 : index
    %23 = vector.load %arg1[%c0_21, %c1_22, %c1_23, %c0_24] : memref<1x18x18x128xbf16, #tpu.memory_space<vmem>>, vector<1x16x16x128xbf16>
    %24 = vector.shape_cast %23 : vector<1x16x16x128xbf16> to vector<16x16x128xbf16>
    %25 = vector.shape_cast %24 : vector<16x16x128xbf16> to vector<256x128xbf16>
    %c512 = arith.constant 512 : index
    %c0_25 = arith.constant 0 : index
    %26 = vector.load %arg2[%c512, %c0_25] : memref<1152x128xbf16, #tpu.memory_space<vmem>>, vector<128x128xbf16>
    %cst_26 = arith.constant dense<0.000000e+00> : vector<256x128xf32>
    %27 = tpu.matmul %25, %26, %cst_26 {dimension_numbers = #tpu.dot_dimension_numbers<[1], [0], [0], [1], [0, 0, 1, 1], [], []>} : vector<256x128xbf16>, vector<128x128xbf16>, vector<256x128xf32> -> vector<256x128xf32>
    %28 = arith.addf %22, %27 : vector<256x128xf32>
    %c0_27 = arith.constant 0 : index
    %c1_28 = arith.constant 1 : index
    %c2_29 = arith.constant 2 : index
    %c0_30 = arith.constant 0 : index
    %29 = vector.load %arg1[%c0_27, %c1_28, %c2_29, %c0_30] : memref<1x18x18x128xbf16, #tpu.memory_space<vmem>>, vector<1x16x16x128xbf16>
    %30 = vector.shape_cast %29 : vector<1x16x16x128xbf16> to vector<16x16x128xbf16>
    %31 = vector.shape_cast %30 : vector<16x16x128xbf16> to vector<256x128xbf16>
    %c640 = arith.constant 640 : index
    %c0_31 = arith.constant 0 : index
    %32 = vector.load %arg2[%c640, %c0_31] : memref<1152x128xbf16, #tpu.memory_space<vmem>>, vector<128x128xbf16>
    %cst_32 = arith.constant dense<0.000000e+00> : vector<256x128xf32>
    %33 = tpu.matmul %31, %32, %cst_32 {dimension_numbers = #tpu.dot_dimension_numbers<[1], [0], [0], [1], [0, 0, 1, 1], [], []>} : vector<256x128xbf16>, vector<128x128xbf16>, vector<256x128xf32> -> vector<256x128xf32>
    %34 = arith.addf %28, %33 : vector<256x128xf32>
    %c0_33 = arith.constant 0 : index
    %c2_34 = arith.constant 2 : index
    %c0_35 = arith.constant 0 : index
    %c0_36 = arith.constant 0 : index
    %35 = vector.load %arg1[%c0_33, %c2_34, %c0_35, %c0_36] : memref<1x18x18x128xbf16, #tpu.memory_space<vmem>>, vector<1x16x16x128xbf16>
    %36 = vector.shape_cast %35 : vector<1x16x16x128xbf16> to vector<16x16x128xbf16>
    %37 = vector.shape_cast %36 : vector<16x16x128xbf16> to vector<256x128xbf16>
    %c768 = arith.constant 768 : index
    %c0_37 = arith.constant 0 : index
    %38 = vector.load %arg2[%c768, %c0_37] : memref<1152x128xbf16, #tpu.memory_space<vmem>>, vector<128x128xbf16>
    %cst_38 = arith.constant dense<0.000000e+00> : vector<256x128xf32>
    %39 = tpu.matmul %37, %38, %cst_38 {dimension_numbers = #tpu.dot_dimension_numbers<[1], [0], [0], [1], [0, 0, 1, 1], [], []>} : vector<256x128xbf16>, vector<128x128xbf16>, vector<256x128xf32> -> vector<256x128xf32>
    %40 = arith.addf %34, %39 : vector<256x128xf32>
    %c0_39 = arith.constant 0 : index
    %c2_40 = arith.constant 2 : index
    %c1_41 = arith.constant 1 : index
    %c0_42 = arith.constant 0 : index
    %41 = vector.load %arg1[%c0_39, %c2_40, %c1_41, %c0_42] : memref<1x18x18x128xbf16, #tpu.memory_space<vmem>>, vector<1x16x16x128xbf16>
    %42 = vector.shape_cast %41 : vector<1x16x16x128xbf16> to vector<16x16x128xbf16>
    %43 = vector.shape_cast %42 : vector<16x16x128xbf16> to vector<256x128xbf16>
    %c896 = arith.constant 896 : index
    %c0_43 = arith.constant 0 : index
    %44 = vector.load %arg2[%c896, %c0_43] : memref<1152x128xbf16, #tpu.memory_space<vmem>>, vector<128x128xbf16>
    %cst_44 = arith.constant dense<0.000000e+00> : vector<256x128xf32>
    %45 = tpu.matmul %43, %44, %cst_44 {dimension_numbers = #tpu.dot_dimension_numbers<[1], [0], [0], [1], [0, 0, 1, 1], [], []>} : vector<256x128xbf16>, vector<128x128xbf16>, vector<256x128xf32> -> vector<256x128xf32>
    %46 = arith.addf %40, %45 : vector<256x128xf32>
    %c0_45 = arith.constant 0 : index
    %c2_46 = arith.constant 2 : index
    %c2_47 = arith.constant 2 : index
    %c0_48 = arith.constant 0 : index
    %47 = vector.load %arg1[%c0_45, %c2_46, %c2_47, %c0_48] : memref<1x18x18x128xbf16, #tpu.memory_space<vmem>>, vector<1x16x16x128xbf16>
    %48 = vector.shape_cast %47 : vector<1x16x16x128xbf16> to vector<16x16x128xbf16>
    %49 = vector.shape_cast %48 : vector<16x16x128xbf16> to vector<256x128xbf16>
    %c1024 = arith.constant 1024 : index
    %c0_49 = arith.constant 0 : index
    %50 = vector.load %arg2[%c1024, %c0_49] : memref<1152x128xbf16, #tpu.memory_space<vmem>>, vector<128x128xbf16>
    %cst_50 = arith.constant dense<0.000000e+00> : vector<256x128xf32>
    %51 = tpu.matmul %49, %50, %cst_50 {dimension_numbers = #tpu.dot_dimension_numbers<[1], [0], [0], [1], [0, 0, 1, 1], [], []>} : vector<256x128xbf16>, vector<128x128xbf16>, vector<256x128xf32> -> vector<256x128xf32>
    %52 = arith.addf %46, %51 : vector<256x128xf32>
    %53 = vector.shape_cast %52 : vector<256x128xf32> to vector<16x16x128xf32>
    %54 = arith.truncf %53 : vector<16x16x128xf32> to vector<16x16x128xbf16>
    %c0_51 = arith.constant 0 : index
    %c0_52 = arith.constant 0 : index
    %c0_53 = arith.constant 0 : index
    %c0_54 = arith.constant 0 : index
    %55 = vector.load %arg5[%c0_51, %c0_52, %c0_53, %c0_54] : memref<1x16x16x128xbf16, #tpu.memory_space<vmem>>, vector<1x16x16x128xbf16>
    %56 = vector.shape_cast %55 : vector<1x16x16x128xbf16> to vector<16x16x128xbf16>
    %57 = vector.shape_cast %54 : vector<16x16x128xbf16> to vector<1x16x16x128xbf16>
    tpu.vector_store %arg5[%c0_51, %c0_52, %c0_53, %c0_54], %57 {strides = array<i32>} : memref<1x16x16x128xbf16, #tpu.memory_space<vmem>>, vector<1x16x16x128xbf16>,
    %cst_55 = arith.constant dense<0.000000e+00> : vector<128xf32>
    %58 = vector.multi_reduction <add>, %52, %cst_55 [0] : vector<256x128xf32> to vector<128xf32>
    %59 = vector.shape_cast %58 : vector<128xf32> to vector<1x128xf32>
    %60 = arith.mulf %52, %52 : vector<256x128xf32>
    %cst_56 = arith.constant dense<0.000000e+00> : vector<128xf32>
    %61 = vector.multi_reduction <add>, %60, %cst_56 [0] : vector<256x128xf32> to vector<128xf32>
    %62 = vector.shape_cast %61 : vector<128xf32> to vector<1x128xf32>
    %63 = tpu.concatenate %59, %62 in 0 : vector<1x128xf32>, vector<1x128xf32> -> vector<2x128xf32>
    %c0_57 = arith.constant 0 : index
    %c0_58 = arith.constant 0 : index
    %c0_59 = arith.constant 0 : index
    %64 = vector.load %arg6[%c0_57, %c0_58, %c0_59] : memref<1x2x128xf32, #tpu.memory_space<vmem>>, vector<1x2x128xf32>
    %65 = vector.shape_cast %64 : vector<1x2x128xf32> to vector<2x128xf32>
    %66 = vector.shape_cast %63 : vector<2x128xf32> to vector<1x2x128xf32>
    tpu.vector_store %arg6[%c0_57, %c0_58, %c0_59], %66 {strides = array<i32>} : memref<1x2x128xf32, #tpu.memory_space<vmem>>, vector<1x2x128xf32>,
    %c0_60 = arith.constant 0 : index
    %c0_61 = arith.constant 0 : index
    %c0_62 = arith.constant 0 : index
    %c0_63 = arith.constant 0 : index
    %67 = vector.load %arg3[%c0_60, %c0_61, %c0_62, %c0_63] : memref<1x16x16x128xbf16, #tpu.memory_space<vmem>>, vector<1x16x16x128xbf16>
    %68 = vector.shape_cast %67 : vector<1x16x16x128xbf16> to vector<16x16x128xbf16>
    %69 = vector.shape_cast %68 : vector<16x16x128xbf16> to vector<256x128xbf16>
    %c0_64 = arith.constant 0 : index
    %c0_65 = arith.constant 0 : index
    %70 = vector.load %arg4[%c0_64, %c0_65] : memref<128x128xbf16, #tpu.memory_space<vmem>>, vector<128x128xbf16>
    %cst_66 = arith.constant dense<0.000000e+00> : vector<256x128xf32>
    %71 = tpu.matmul %69, %70, %cst_66 {dimension_numbers = #tpu.dot_dimension_numbers<[1], [0], [0], [1], [0, 0, 1, 1], [], []>} : vector<256x128xbf16>, vector<128x128xbf16>, vector<256x128xf32> -> vector<256x128xf32>
    %72 = vector.shape_cast %71 : vector<256x128xf32> to vector<16x16x128xf32>
    %73 = arith.truncf %72 : vector<16x16x128xf32> to vector<16x16x128xbf16>
    %c0_67 = arith.constant 0 : index
    %c0_68 = arith.constant 0 : index
    %c0_69 = arith.constant 0 : index
    %c0_70 = arith.constant 0 : index
    %74 = vector.load %arg7[%c0_67, %c0_68, %c0_69, %c0_70] : memref<1x16x16x128xbf16, #tpu.memory_space<vmem>>, vector<1x16x16x128xbf16>
    %75 = vector.shape_cast %74 : vector<1x16x16x128xbf16> to vector<16x16x128xbf16>
    %76 = vector.shape_cast %73 : vector<16x16x128xbf16> to vector<1x16x16x128xbf16>
    tpu.vector_store %arg7[%c0_67, %c0_68, %c0_69, %c0_70], %76 {strides = array<i32>} : memref<1x16x16x128xbf16, #tpu.memory_space<vmem>>, vector<1x16x16x128xbf16>,
    %cst_71 = arith.constant dense<0.000000e+00> : vector<128xf32>
    %77 = vector.multi_reduction <add>, %71, %cst_71 [0] : vector<256x128xf32> to vector<128xf32>
    %78 = vector.shape_cast %77 : vector<128xf32> to vector<1x128xf32>
    %79 = arith.mulf %71, %71 : vector<256x128xf32>
    %cst_72 = arith.constant dense<0.000000e+00> : vector<128xf32>
    %80 = vector.multi_reduction <add>, %79, %cst_72 [0] : vector<256x128xf32> to vector<128xf32>
    %81 = vector.shape_cast %80 : vector<128xf32> to vector<1x128xf32>
    %82 = tpu.concatenate %78, %81 in 0 : vector<1x128xf32>, vector<1x128xf32> -> vector<2x128xf32>
    %c0_73 = arith.constant 0 : index
    %c0_74 = arith.constant 0 : index
    %c0_75 = arith.constant 0 : index
    %83 = vector.load %arg8[%c0_73, %c0_74, %c0_75] : memref<1x2x128xf32, #tpu.memory_space<vmem>>, vector<1x2x128xf32>
    %84 = vector.shape_cast %83 : vector<1x2x128xf32> to vector<2x128xf32>
    %85 = vector.shape_cast %82 : vector<2x128xf32> to vector<1x2x128xf32>
    tpu.vector_store %arg8[%c0_73, %c0_74, %c0_75], %85 {strides = array<i32>} : memref<1x2x128xf32, #tpu.memory_space<vmem>>, vector<1x2x128xf32>,
    return
  }
  func.func @transform_0(%arg0: i32) -> (i32, i32, i32, i32) {
    %c0_i32 = arith.constant 0 : i32
    %c0_i32_0 = arith.constant 0 : i32
    %c0_i32_1 = arith.constant 0 : i32
    %c0_i32_2 = arith.constant 0 : i32
    return %arg0, %c0_i32, %c0_i32_0, %c0_i32_1 : i32, i32, i32, i32
  }
  func.func @transform_1(%arg0: i32) -> (i32, i32) {
    %c0_i32 = arith.constant 0 : i32
    %c0_i32_0 = arith.constant 0 : i32
    %c0_i32_1 = arith.constant 0 : i32
    return %c0_i32, %c0_i32_0 : i32, i32
  }
  func.func @transform_2(%arg0: i32) -> (i32, i32, i32, i32) {
    %c0_i32 = arith.constant 0 : i32
    %c0_i32_0 = arith.constant 0 : i32
    %c0_i32_1 = arith.constant 0 : i32
    %c0_i32_2 = arith.constant 0 : i32
    return %arg0, %c0_i32, %c0_i32_0, %c0_i32_1 : i32, i32, i32, i32
  }
  func.func @transform_3(%arg0: i32) -> (i32, i32) {
    %c0_i32 = arith.constant 0 : i32
    %c0_i32_0 = arith.constant 0 : i32
    %c0_i32_1 = arith.constant 0 : i32
    return %c0_i32, %c0_i32_0 : i32, i32
  }
  func.func @transform_4(%arg0: i32) -> (i32, i32, i32, i32) {
    %c0_i32 = arith.constant 0 : i32
    %c0_i32_0 = arith.constant 0 : i32
    %c0_i32_1 = arith.constant 0 : i32
    %c0_i32_2 = arith.constant 0 : i32
    return %arg0, %c0_i32, %c0_i32_0, %c0_i32_1 : i32, i32, i32, i32
  }
  func.func @transform_5(%arg0: i32) -> (i32, i32, i32) {
    %c0_i32 = arith.constant 0 : i32
    %c0_i32_0 = arith.constant 0 : i32
    %c0_i32_1 = arith.constant 0 : i32
    return %arg0, %c0_i32, %c0_i32_0 : i32, i32, i32
  }
  func.func @transform_6(%arg0: i32) -> (i32, i32, i32, i32) {
    %c0_i32 = arith.constant 0 : i32
    %c0_i32_0 = arith.constant 0 : i32
    %c0_i32_1 = arith.constant 0 : i32
    %c0_i32_2 = arith.constant 0 : i32
    return %arg0, %c0_i32, %c0_i32_0, %c0_i32_1 : i32, i32, i32, i32
  }
  func.func @transform_7(%arg0: i32) -> (i32, i32, i32) {
    %c0_i32 = arith.constant 0 : i32
    %c0_i32_0 = arith.constant 0 : i32
    %c0_i32_1 = arith.constant 0 : i32
    return %arg0, %c0_i32, %c0_i32_0 : i32, i32, i32
  }
}

</mosaic_0001>

<bundles_post_ra>
// kernel: tpu_custom_call.1
= control target key start
LH: loop header
LB: loop body
LE: loop exit
PB: predicated region body
PF: predicated region fallthrough
CT: control target
= control target key end

     0   :  { %s10712_s0 = inlined_call_operand.vmem [shape: bf16[2,18,18,128], index: 0, kind: input, shape index: {}]   ;;  %s10713_s1 = inlined_call_operand.vmem [shape: bf16[1152,128], index: 1, kind: input, shape index: {}]   ;;  %s10714_s2 = inlined_call_operand.hbm [shape: bf16[2,16,16,128], index: 2, kind: input, shape index: {}]   ;;  %s10715_s3 = inlined_call_operand.vmem [shape: bf16[128,128], index: 3, kind: input, shape index: {}]   ;;  %s10716_s4 = inlined_call_operand.hbm [shape: bf16[2,16,16,128], index: 4, kind: output, shape index: {0}]   ;;  %s10717_s5 = inlined_call_operand.hbm [shape: f32[2,2,128], index: 5, kind: output, shape index: {1}]   ;;  %s10718_s6 = inlined_call_operand.hbm [shape: bf16[2,16,16,128], index: 6, kind: output, shape index: {2}]   ;;  %s10719_s7 = inlined_call_operand.hbm [shape: f32[2,2,128], index: 7, kind: output, shape index: {3}]  }
   0x1   :  { %10733 = sst [smem:[#allocation35_spill]] %s10712_s0 }
   0x2   :  { %10734 = sst [smem:[#allocation36_spill]] %s10713_s1 }
   0x3   :  { %10735 = sst [smem:[#allocation37_spill]] %s10714_s2 }
   0x4   :  { %13 = vsyncpa [#allocation3], 0 }
   0x5   :  { %15 = vsyncpa [#allocation3 + $0x1], 0 }
   0x6   :  { %16 = vsyncpa [#allocation4], 0 }
   0x7   :  { %18 = vsyncpa [#allocation4 + $0x1], 0 }
   0x8   :  { %19 = vsyncpa [#allocation7], 0 }
   0x9   :  { %21 = vsyncpa [#allocation7 + $0x1], 0 }
   0xa   :  { %22 = vsyncpa [#allocation10], 0 }
   0xb   :  { %24 = vsyncpa [#allocation10 + $0x1], 0  ;;  %s8279_s24 = smov 0   ;;  %s8281_s25 = smov 0  }
   0xc   :  { %s8283_s26 = smov 0   ;;  %s8285_s27 = smov 0  }
   0xd LB: > { %s8300_s28 = sadd.s32 4294967295, %s8228_s27   ;;  %s10720_s29 = sadd.s32 4294967294, %s8228_s27   ;;  %s8228_s27 = sphi %s8285_s27, %s10841_s27   ;;  %s8224_s26 = sphi %s8283_s26, %s10840_s26   ;;  %s8220_s25 = sphi %s8281_s25, %s10839_s25   ;;  %s8216_s24 = sphi %s8279_s24, %s10838_s24  }
   0xe   : > { %s8304_s30 = sadd.s32 1, %s8228_s27   ;;  %s84_s8 = sadd.s32 1, %s8224_s26 }
   0xf   : > { %s81_s9 = ssub.s32 %s8228_s27, %s8304_s30  ;;  %p91_p0 = scmp.ne.s32.totalorder %s8224_s26, %s8220_s25 }
  0x10   : > { %p82_p1 = scmp.eq.s32.totalorder %s81_s9, 0  ;;  %p92_p2 = scmp.eq.s32.totalorder %s8228_s27, 0 }
  0x11   : > { %p97_p3 = scmp.ne.s32.totalorder %s8220_s25, %s8216_s24  ;;  %p98_p4 = scmp.eq.s32.totalorder %s8300_s28, 0 }
  0x12   : > { %s8316_s10 = scalar_select %p82_p1, %s8224_s26, %s84_s8  }
  0x13   : > { %p8318_p5 = por %p92_p2, %p91_p0  ;;  %p8322_p6 = por %p98_p4, %p97_p3 }
  0x14   : > { %p142_p7 = scmp.eq.s32.totalorder %s8300_s28, 1  ;;  %p148_p8 = scmp.eq.s32.totalorder %s10720_s29, 1 }
  0x15   : > { %s10737_s12 = scalar_select %p8322_p6, 1, 0 }
  0x16   : > { %p7860_p10 = scmp.lt.s32.totalorder %s8228_s27, 2  ;;  %p8331_p11 = por %p142_p7, %p91_p0 }
  0x17   : > { %p8335_p12 = por %p148_p8, %p97_p3  ;;  %s260_s15 = sand.u32 1, %s8224_s26  }
  0x18   : > { %s10738_s13 = scalar_select %p8331_p11, 1, 0 }
  0x19   : > { %s10739_s14 = scalar_select %p8335_p12, 1, 0 }
  0x1a   : > { %s6855_s16 = sshll.u32 %s8228_s27, 11  ;;  %s6289_s17 = sshll.u32 %s260_s15, 7 }
  0x1b   : > { %s10740_s2 = sld [smem:[#allocation37_spill]]  ;;  %s264_s21 = scalar_lea.vmem [#allocation2], %s6289_s17 }
  0x1c   : > { %s271_s22 = sshll.u32 %s264_s21, 4  ;;  %p8348_p13 = pnand %p7860_p10, %p8318_p5  ;;  %s8352_s22 = int_to_ptr.vmem [resolvable:$true] %s271_s22 }
  0x1d   : > { %s8354_s8 = scalar_lea.sflag [#allocation3], %s260_s15 }
  0x1e   : > { %p8052_p1 = pneg %p8348_p13 }
  0x21   : > { %s8344_s20 = scalar_lea.hbm %s10740_s2, %s6855_s16  ;;  %s8055_s17 = scalar_lea.hbm %s10740_s2, 4096 }
  0x22   : > { %s8050_s9 = scalar_lea.hbm %s8344_s20, 2048  ;;  %p8056_p4 = scmp.lt.s32.totalorder %s8344_s20, %s10740_s2 }
  0x23   : > { %p8051_p0 = scmp.ne.s32.totalorder %s8344_s20, %s8050_s9  ;;  %p8057_p5 = scmp.lt.s32.totalorder %s8055_s17, %s8050_s9 }
  0x25   : > { %p8053_p2 = pnand %p8052_p1, %p8051_p0  ;;  %p8058_p7 = por %p8057_p5, %p8056_p4 }
  0x27   : > { %p8054_p3 = pneg %p8053_p2 }
  0x29   : > { %p8059_p8 = pnand %p8058_p7, %p8054_p3 }
  0x2b   : > { %8062 = shalt.err (!%p8059_p8)
}
  0x2c   : > { %s8063_s15 = scalar_lea.vmem %s8352_s22, 2048  ;;  %s8230_s21 = smov [#allocation2]  }
  0x2d   : > { %p8064_p10 = scmp.ne.s32.totalorder %s8352_s22, %s8063_s15  ;;  %s8068_s29 = sshll.u32 %s8230_s21, 4  ;;  %s8069_s29 = int_to_ptr.vmem [resolvable:$false] %s8068_s29 }
  0x2e   : > { %s8070_s16 = scalar_lea.vmem %s8069_s29, 4096  ;;  %p8071_p2 = scmp.lt.s32.totalorder %s8352_s22, %s8069_s29 }
  0x2f   : > { %p8066_p9 = pnand %p8064_p10, %p8052_p1  ;;  %p8072_p12 = scmp.lt.s32.totalorder %s8070_s16, %s8063_s15 }
  0x31   : > { %p8067_p0 = pneg %p8066_p9  ;;  %p8073_p11 = por %p8072_p12, %p8071_p2 }
  0x33   : > { %p8074_p6 = pnand %p8073_p11, %p8067_p0 }
  0x35   : > { %8077 = shalt.err (!%p8074_p6)
}
  0x36   : > { %s8231_s9 = smov 64   ;;  %s8232_s18 = smov 4  }
  0x37   : > { %7846 = dma.hbm_to_vmem [thread:$0]  (!%p8348_p13), %s8344_s20, 2048, %s8352_s22, %s8354_s8, %s8231_s9, %s8231_s9, %s8232_s18  }
  0x38   : > { %p6292_p9 = scmp.ge.s32.totalorder %s8228_s27, 1  ;;  %p279_p1 = scmp.lt.s32.totalorder %s8228_s27, 3 }
  0x3a   : > { %p280_p3 = pnand %p6292_p9, %p279_p1 }
  0x3c   : > { %283 = sbr.rel (%p280_p3) target bundleno = 719 (0x2cf), region = 36 }
  0x41   : > { %s8378_s29 = sand.u32 1, %s8220_s25   ;;  %p10742_p6 = scmp.ne.s32.totalorder %s10737_s12, 0 }
  0x42   : > { %s8381_s17 = sshll.u32 %s8378_s29, 7  ;;  %s286_s11 = scalar_lea.sflag [#allocation3], %s8378_s29 }
  0x43   : > { %s8385_s19 = scalar_lea.vmem [#allocation2], %s8381_s17 }
  0x44   : > { %8199 = dma.done.wait (%p10742_p6), %s286_s11, 2048  }
  0x45   : > { %8201 = vsyncadd (%p10742_p6), %s286_s11, 4294965248  ;;  %s10743_s1 = sld [smem:[#allocation36_spill]]  ;;  %p340_p11 = scmp.lt.s32.totalorder %s8300_s28, 1  ;;  %vm410_vm0 = vsmask.f32 3328  ;;  %vm1439_vm3 = vcmask 1042432  }
  0x46   : > { %vm411_vm1 = vsmask.f32 7440  ;;  %s10744_s0 = sld [smem:[#allocation35_spill]]  ;;  %vm1440_vm4 = vcmask 1046532   ;;  %p10831_p13 = scmp.ne.s32.totalorder %s10738_s13, 0 }
  0x47   : > { %s341_s22 = scalar_select %p340_p11, %s8300_s28, 1  ;;  %vm8471_vm2 = vmor %vm410_vm0, %vm411_vm1 }
  0x48   : > { %vm8829_vm5 = vmor %vm1439_vm3, %vm1440_vm4  ;;  %s8233_s18 = smov [#allocation5]  }
  0x49   : > { %s7832_s12 = smul.u32 216, %s341_s22  ;;  %s8082_s11 = sshll.u32 %s8233_s18, 4  ;;  %s8083_s11 = int_to_ptr.vmem [resolvable:$false] %s8082_s11 }
  0x4a   : > { %s8084_s20 = scalar_lea.vmem %s8083_s11, 4096 }
  0x4b   : > { %v7898_v0 = vld [vmem:[%s10743_s1 + $0x78] sm:$0xff]   ;;  %v7900_v2 = vld [vmem:[%s10743_s1 + $0x70] sm:$0xff]   ;;  %v7902_v4 = vld [vmem:[%s10743_s1 + $0x68] sm:$0xff]  }
  0x4c   : > { %v7899_v1 = vld [vmem:[%s10743_s1 + $0x38] sm:$0xff]   ;;  %7352 = vmatprep.subr.bf16.mxu0 %v7898_v0  ;;  %v7901_v3 = vld [vmem:[%s10743_s1 + $0x30] sm:$0xff]   ;;  %v7903_v5 = vld [vmem:[%s10743_s1 + $0x28] sm:$0xff]   ;;  %s8426_s8 = scalar_lea.vmem %s10744_s0, %s7832_s12  ;;  %s6038_s12 = scalar_lea.sflag [#allocation4], %s8378_s29 }
  0x4d   : > { %7400 = vmatprep.subr.bf16.mxu1 %v7899_v1  ;;  %7353 = vmatpush3.bf16.msra.mxu0 %v7898_v0  ;;  %v7904_v6 = vld [vmem:[%s10743_s1 + $0x60] sm:$0xff]   ;;  %v7906_v8 = vld [vmem:[%s10743_s1 + $0x58] sm:$0xff]   ;;  %v7908_v10 = vld [vmem:[%s10743_s1 + $0x50] sm:$0xff]  }
  0x4e   : > { %7401 = vmatpush3.bf16.msra.mxu1 %v7899_v1  ;;  %7354 = vmatprep.subr.bf16.mxu0 %v7900_v2  ;;  %v7905_v7 = vld [vmem:[%s10743_s1 + $0x20] sm:$0xff]   ;;  %v7907_v9 = vld [vmem:[%s10743_s1 + $0x18] sm:$0xff]   ;;  %v7909_v11 = vld [vmem:[%s10743_s1 + $0x10] sm:$0xff]  }
  0x4f   : > { %7402 = vmatprep.subr.bf16.mxu1 %v7901_v3  ;;  %v346_v12 = vld [vmem:[%s8426_s8] sm:$0xf]  ;;  %v8436_v13 = vld [vmem:[%s8426_s8 + $0x4] sm:$0xf]  ;;  %v8439_v14 = vld [vmem:[%s8426_s8 + $0x8] sm:$0x1] }
  0x50   : > { %v414_v15 = vshrl.u32 %v346_v12, 16  ;;  %v417_v16 = vshll.u32 %v346_v12, 16  ;;  %v423_v17 = vshll.u32 %v8436_v13, 16  ;;  %v427_v18 = vshrl.u32 %v8436_v13, 16  ;;  %v8444_v19 = vld [vmem:[%s8426_s8 + $0xc] sm:$0xf] }
  0x51   : > { %7355 = vmatpush3.bf16.msra.mxu0 %v7900_v2  ;;  %v7910_v20 = vld [vmem:[%s10743_s1 + $0x48] sm:$0xff]   ;;  %v433_v21 = vshll.u32 %v8439_v14, 16  ;;  %v1447_v22 = vrot.slane %v8439_v14, 5  ;;  %v6323_v23 = vcombine.low %v346_v12, %v8436_v13  ;;  %v8453_v24 = vld [vmem:[%s8426_s8 + $0x10] sm:$0xf]  ;;  %v438_v31 = vshrl.u32 %v8444_v19, 16 }
  0x52   : > { %7403 = vmatpush3.bf16.msra.mxu1 %v7901_v3  ;;  %7356 = vmatprep.subr.bf16.mxu0 %v7902_v4  ;;  %v8456_v25 = vld [vmem:[%s8426_s8 + $0x14] sm:$0x1]  ;;  %v416_v26 = vrot.slane %v414_v15, 4  ;;  %v419_v27 = vrot.slane %v417_v16, 5  ;;  %v425_v28 = vrot.slane %v423_v17, 5  ;;  %v429_v29 = vrot.slane %v427_v18, 4 }
  0x53   : > { %7404 = vmatprep.subr.bf16.mxu1 %v7903_v5  ;;  %v435_v30 = vrot.slane %v433_v21, 5  ;;  %v441_v32 = vshll.u32 %v8444_v19, 16  ;;  %v447_v33 = vshll.u32 %v8453_v24, 16  ;;  %v7911_v34 = vld [vmem:[%s10743_s1 + $0x8] sm:$0xff]   ;;  %7416 = vmatprep.mubr.bf16.mxu1 %v6323_v23  ;;  %v451_v37 = vshrl.u32 %v8453_v24, 16  ;;  %v7912_v39 = vld [vmem:[%s10743_s1 + $0x40] sm:$0xff]  }
  0x54   : > { %v420_v35 = vor.u32 %v419_v27, %v416_v26  ;;  %v430_v36 = vor.u32 %v429_v29, %v425_v28  ;;  %v457_v38 = vshll.u32 %v8456_v25, 16  ;;  %v440_v41 = vrot.slane %v438_v31, 4  ;;  %v8477_v49 = vld [vmem:[%s8426_s8 + $0x18] sm:$0xf]  ;;  %v8482_v52 = vld [vmem:[%s8426_s8 + $0x1c] sm:$0xf] }
  0x55   : > { %7357 = vmatpush3.bf16.msra.mxu0 %v7902_v4  ;;  %v443_v42 = vrot.slane %v441_v32, 5  ;;  %v449_v43 = vrot.slane %v447_v33, 5  ;;  %v1454_v44 = vrot.slane %v8456_v25, 5  ;;  %v453_v47 = vrot.slane %v451_v37, 4  ;;  %v8485_v53 = vld [vmem:[%s8426_s8 + $0x20] sm:$0x1] }
  0x56   : > { %7405 = vmatpush3.bf16.msra.mxu1 %v7903_v5  ;;  %7358 = vmatprep.subr.bf16.mxu0 %v7904_v6  ;;  %v421_v45 = vrot.slane %v420_v35, 4  ;;  %v431_v46 = vrot.slane %v430_v36, 4  ;;  %v459_v48 = vrot.slane %v457_v38, 5  ;;  %v6324_v51 = vcombine.low %v8444_v19, %v8453_v24  ;;  %v7913_v56 = vld [vmem:[%s10743_s1] sm:$0xff]   ;;  %v8501_v62 = vld [vmem:[%s8426_s8 + $0x28] sm:$0xf] }
  0x57   : > { %7406 = vmatprep.subr.bf16.mxu1 %v7905_v7  ;;  %v444_v50 = vor.u32 %v443_v42, %v440_v41  ;;  %v462_v54 = vshrl.u32 %v8477_v49, 16  ;;  %v465_v55 = vshll.u32 %v8477_v49, 16  ;;  %v454_v59 = vor.u32 %v453_v47, %v449_v43  ;;  %v8498_v61 = vld [vmem:[%s8426_s8 + $0x24] sm:$0xf]  ;;  %v8504_v3 = vld [vmem:[%s8426_s8 + $0x2c] sm:$0x1] }
  0x58   : > { %v426_v57 = vsel %vm8471_vm2, %v421_v45, %v425_v28  ;;  %v436_v58 = vsel %vm8471_vm2, %v431_v46, %v435_v30  ;;  %v471_v60 = vshll.u32 %v8482_v52, 16  ;;  %v486_v12 = vshrl.u32 %v8498_v61, 16  ;;  %v7917_v16 = vld [vmem:[%s10743_s1 + $0xf8] sm:$0xff]   ;;  %v8524_v28 = vld [vmem:[%s8426_s8 + $0x30] sm:$0xf]  ;;  %v7924_v19 = vld [vmem:[%s10743_s1 + $0xa8] sm:$0xff]  }
  0x59   : > { %7359 = vmatpush3.bf16.msra.mxu0 %v7904_v6  ;;  %v6299_v63 = vcombine.low %v426_v57, %v436_v58  ;;  %v445_v0 = vrot.slane %v444_v50, 4  ;;  %v464_v1 = vrot.slane %v462_v54, 4  ;;  %v467_v2 = vrot.slane %v465_v55, 5  ;;  %v8529_v33 = vld [vmem:[%s8426_s8 + $0x34] sm:$0xf] }
  0x5a   : > { %7407 = vmatpush3.bf16.msra.mxu1 %v7905_v7  ;;  %7360 = vmatprep.subr.bf16.mxu0 %v7906_v8  ;;  %v455_v4 = vrot.slane %v454_v59, 4  ;;  %v473_v5 = vrot.slane %v471_v60, 5  ;;  %v475_v6 = vshrl.u32 %v8482_v52, 16  ;;  %v481_v7 = vshll.u32 %v8485_v53, 16  ;;  %v7920_v37 = vld [vmem:[%s10743_s1 + $0xb0] sm:$0xff]  }
  0x5b   : > { %7408 = vmatprep.subr.bf16.mxu1 %v7907_v9  ;;  %7368 = vmatprep.mubr.bf16.mxu0 %v6299_v63  ;;  %v488_v26 = vrot.slane %v486_v12, 4  ;;  %v495_v27 = vshll.u32 %v8501_v62, 16  ;;  %v499_v31 = vshrl.u32 %v8501_v62, 16  ;;  %v505_v32 = vshll.u32 %v8504_v3, 16  ;;  %v8539_v38 = vld [vmem:[%s8426_s8 + $0x38] sm:$0x1] }
  0x5c   : > { %v460_v15 = vsel %vm8471_vm2, %v455_v4, %v459_v48  ;;  %v477_v17 = vrot.slane %v475_v6, 4  ;;  %v483_v18 = vrot.slane %v481_v7, 5  ;;  %v6326_v36 = vcombine.low %v8498_v61, %v8501_v62  ;;  %v7921_v46 = vld [vmem:[%s10743_s1 + $0xf0] sm:$0xff]   ;;  %v8546_v47 = vld [vmem:[%s8426_s8 + $0x3c] sm:$0xf]  ;;  %v7925_v7 = vld [vmem:[%s10743_s1 + $0xe8] sm:$0xff]  }
  0x5d   : > { %7361 = vmatpush3.bf16.msra.mxu0 %v7906_v8  ;;  %v450_v8 = vsel %vm8471_vm2, %v445_v0, %v449_v43  ;;  %v497_v35 = vrot.slane %v495_v27, 5  ;;  %v501_v43 = vrot.slane %v499_v31, 4  ;;  %v507_v45 = vrot.slane %v505_v32, 5  ;;  %v8552_v55 = vld [vmem:[%s8426_s8 + $0x40] sm:$0xf] }
  0x5e   : > { %7409 = vmatpush3.bf16.msra.mxu1 %v7907_v9  ;;  %7362 = vmatprep.subr.bf16.mxu0 %v7908_v10  ;;  %v7916_v9 = vld [vmem:[%s10743_s1 + $0xb8] sm:$0xff]   ;;  %v6300_v21 = vcombine.low %v450_v8, %v460_v15  ;;  %v478_v29 = vor.u32 %v477_v17, %v473_v5  ;;  %v519_v50 = vshll.u32 %v8529_v33, 16  ;;  %v523_v54 = vshrl.u32 %v8529_v33, 16  ;;  %v8576_v12 = vld [vmem:[%s8426_s8 + $0x48] sm:$0xf] }
  0x5f   : > { %7410 = vmatprep.subr.bf16.mxu1 %v7909_v11  ;;  %v502_v59 = vor.u32 %v501_v43, %v497_v35  ;;  %v529_v60 = vshll.u32 %v8539_v38, 16  ;;  %v6327_v6 = vcombine.low %v8524_v28, %v8529_v33  ;;  %v547_v17 = vshrl.u32 %v8552_v55, 16  ;;  %v7929_v43 = vld [vmem:[%s10743_s1 + $0xe0] sm:$0xff]   ;;  %v1397_v25 = vld [vmem:[%s8426_s8 + $0x48] sm:$0xe] }
  0x60   : > { %v479_v41 = vrot.slane %v478_v29, 4  ;;  %v7928_v29 = vld [vmem:[%s10743_s1 + $0xa0] sm:$0xff]  }
  0x61   : > { %7363 = vmatpush3.bf16.msra.mxu0 %v7908_v10  ;;  %v468_v10 = vor.u32 %v467_v2, %v464_v1  ;;  %v521_v1 = vrot.slane %v519_v50, 5  ;;  %v525_v2 = vrot.slane %v523_v54, 4  ;;  %v503_v4 = vrot.slane %v502_v59, 4 }
  0x62   : > { %7411 = vmatpush3.bf16.msra.mxu1 %v7909_v11  ;;  %7364 = vmatprep.subr.bf16.mxu0 %v7910_v20  ;;  %v6325_v11 = vcombine.low %v8477_v49, %v8482_v52  ;;  %v513_v49 = vshll.u32 %v8524_v28, 16  ;;  %v484_v57 = vsel %vm8471_vm2, %v479_v41, %v483_v18  ;;  %v549_v32 = vrot.slane %v547_v17, 4 }
  0x63   : > { %7412 = vmatprep.subr.bf16.mxu1 %v7911_v34  ;;  %v469_v23 = vrot.slane %v468_v10, 4  ;;  %v534_v10 = vshrl.u32 %v8546_v47, 16  ;;  %v508_v15 = vsel %vm8471_vm2, %v503_v4, %v507_v45  ;;  %v6328_v41 = vcombine.low %v8546_v47, %v8552_v55 }
  0x64   : > { %v515_v0 = vrot.slane %v513_v49, 5  ;;  %v561_v49 = vshll.u32 %v8576_v12, 16 }
  0x65   : > { %7365 = vmatpush3.bf16.msra.mxu0 %v7910_v20  ;;  %v489_v20 = vshll.u32 %v8498_v61, 16  ;;  %v536_v27 = vrot.slane %v534_v10, 4  ;;  %v7932_v61 = vld [vmem:[%s10743_s1 + $0x98] sm:$0xff]   ;;  %v7936_v10 = vld [vmem:[%s10743_s1 + $0x90] sm:$0xff]  }
  0x66   : > { %7413 = vmatpush3.bf16.msra.mxu1 %v7911_v34  ;;  %7366 = vmatprep.subr.bf16.mxu0 %v7912_v39  ;;  %v474_v34 = vsel %vm8471_vm2, %v469_v23, %v473_v5  ;;  %v531_v5 = vrot.slane %v529_v60, 5  ;;  %v563_v59 = vrot.slane %v561_v49, 5  ;;  %v7940_v49 = vld [vmem:[%s10743_s1 + $0x88] sm:$0xff]  }
  0x67   : > { %7414 = vmatprep.subr.bf16.mxu1 %v7913_v56  ;;  %v491_v30 = vrot.slane %v489_v20, 5  ;;  %v6301_v63 = vcombine.low %v474_v34, %v484_v57  ;;  %v8584_v20 = vld [vmem:[%s8426_s8 + $0x4c] sm:$0xf] }
  0x68   : > { %v567_v50 = vshll.u32 %v8584_v20, 16  ;;  %v571_v54 = vshrl.u32 %v8584_v20, 16  ;;  %v6329_v60 = vcombine.low %v8576_v12, %v8584_v20 }
  0x69   : > { %7367 = vmatpush3.bf16.msra.mxu0 %v7912_v39  ;;  %v510_v39 = vshrl.u32 %v8524_v28, 16  ;;  %v492_v42 = vor.u32 %v491_v30, %v488_v26  ;;  %v8587_v28 = vld [vmem:[%s8426_s8 + $0x50] sm:$0x1] }
  0x6a   : > { %7415 = vmatpush3.bf16.msra.mxu1 %v7913_v56  ;;  %7448 = vmatprep.subr.bf16.mxu0 %v7916_v9  ;;  %v8555_v56 = vld [vmem:[%s8426_s8 + $0x44] sm:$0x1]  ;;  %v577_v57 = vshll.u32 %v8587_v28, 16 }
  0x6b   : > { %7496 = vmatprep.subr.bf16.mxu1 %v7917_v16  ;;  %v512_v48 = vrot.slane %v510_v39, 4  ;;  %v493_v58 = vrot.slane %v492_v42, 4  ;;  %v553_v18 = vshll.u32 %v8555_v56, 16  ;;  %v558_v42 = vshrl.u32 %v8576_v12, 16 }
  0x6c   : > { %7369 = vmatmul.mubr.bf16.vlgmr.msra.gmra.mxu0 %v6300_v21 }
  0x6d   : > { %7417 = vmatmul.mubr.bf16.vlgmr.msra.gmra.mxu1 %v6324_v51  ;;  %7449 = vmatpush3.bf16.msra.mxu0 %v7916_v9  ;;  %v498_v51 = vsel %vm8471_vm2, %v493_v58, %v497_v35  ;;  %v516_v8 = vor.u32 %v515_v0, %v512_v48  ;;  %v526_v9 = vor.u32 %v525_v2, %v521_v1  ;;  %v555_v34 = vrot.slane %v553_v18, 5  ;;  %v8593_v35 = vld [vmem:[%s8426_s8 + $0x54] sm:$0xf]  ;;  %v7933_v0 = vld [vmem:[%s10743_s1 + $0xd8] sm:$0xff]   ;;  %v8643_v18 = vld [vmem:[%s8426_s8 + $0x64] sm:$0xf] }
  0x6e   : > { %7497 = vmatpush3.bf16.msra.mxu1 %v7917_v16  ;;  %7420 = vmatprep.mubr.bf16.mxu1 %v6325_v11  ;;  %v537_v11 = vshll.u32 %v8546_v47, 16  ;;  %v543_v16 = vshll.u32 %v8552_v55, 16  ;;  %v6302_v21 = vcombine.low %v498_v51, %v508_v15  ;;  %v560_v47 = vrot.slane %v558_v42, 4  ;;  %v8624_v51 = vld [vmem:[%s8426_s8 + $0x5c] sm:$0x1] }
  0x6f   : > { %7450 = vmatprep.subr.bf16.mxu0 %v7920_v37  ;;  %7498 = vmatprep.subr.bf16.mxu1 %v7921_v46  ;;  %v517_v23 = vrot.slane %v516_v8, 4  ;;  %v527_v26 = vrot.slane %v526_v9, 4  ;;  %v573_v2 = vrot.slane %v571_v54, 4  ;;  %v582_v4 = vshrl.u32 %v8593_v35, 16  ;;  %v8633_v9 = vld [vmem:[%s8426_s8 + $0x60] sm:$0xf] }
  0x70   : > { %7372 = vmatprep.mubr.bf16.mxu0 %v6301_v63  ;;  %v539_v30 = vrot.slane %v537_v11, 5  ;;  %v545_v31 = vrot.slane %v543_v16, 5  ;;  %v8618_v63 = vld [vmem:[%s8426_s8 + $0x58] sm:$0xf]  ;;  %v585_v8 = vshll.u32 %v8593_v35, 16  ;;  %v7937_v11 = vld [vmem:[%s10743_s1 + $0xd0] sm:$0xff]  }
  0x71   : > { %7451 = vmatpush3.bf16.msra.mxu0 %v7920_v37  ;;  %v522_v37 = vsel %vm8471_vm2, %v517_v23, %v521_v1  ;;  %v532_v39 = vsel %vm8471_vm2, %v527_v26, %v531_v5  ;;  %v569_v1 = vrot.slane %v567_v50, 5  ;;  %v584_v16 = vrot.slane %v582_v4, 4 }
  0x72   : > { %7499 = vmatpush3.bf16.msra.mxu1 %v7921_v46  ;;  %7452 = vmatprep.subr.bf16.mxu0 %v7924_v19  ;;  %v6303_v45 = vcombine.low %v522_v37, %v532_v39  ;;  %v540_v46 = vor.u32 %v539_v30, %v536_v27  ;;  %v550_v48 = vor.u32 %v549_v32, %v545_v31  ;;  %v591_v17 = vshll.u32 %v8618_v63, 16 }
  0x73   : > { %7500 = vmatprep.subr.bf16.mxu1 %v7925_v7  ;;  %v574_v15 = vor.u32 %v573_v2, %v569_v1  ;;  %v587_v23 = vrot.slane %v585_v8, 5  ;;  %v595_v26 = vshrl.u32 %v8618_v63, 16  ;;  %v601_v27 = vshll.u32 %v8624_v51, 16 }
  0x74   : > { %7373 = vmatmul.mubr.bf16.gmra.mxu0 %v6302_v21  ;;  %v551_v58 = vrot.slane %v550_v48, 4  ;;  %v593_v30 = vrot.slane %v591_v17, 5  ;;  %v606_v32 = vshrl.u32 %v8633_v9, 16  ;;  %v615_v48 = vshll.u32 %v8643_v18, 16 }
  0x75   : > { %7421 = vmatmul.mubr.bf16.gmra.mxu1 %v6326_v36  ;;  %7453 = vmatpush3.bf16.msra.mxu0 %v7924_v19  ;;  %v541_v36 = vrot.slane %v540_v46, 4  ;;  %v579_v19 = vrot.slane %v577_v57, 5  ;;  %v588_v37 = vor.u32 %v587_v23, %v584_v16  ;;  %v597_v39 = vrot.slane %v595_v26, 4  ;;  %v7944_v16 = vld [vmem:[%s10743_s1 + $0x80] sm:$0xff]  }
  0x76   : > { %7424 = vmatprep.mubr.bf16.mxu1 %v6327_v6  ;;  %7501 = vmatpush3.bf16.msra.mxu1 %v7925_v7  ;;  %v556_v6 = vsel %vm8471_vm2, %v551_v58, %v555_v34  ;;  %v564_v7 = vor.u32 %v563_v59, %v560_v47  ;;  %v603_v42 = vrot.slane %v601_v27, 5  ;;  %v608_v46 = vrot.slane %v606_v32, 4 }
  0x77   : > { %7376 = vmatprep.mubr.bf16.mxu0 %v6303_v45  ;;  %7454 = vmatprep.subr.bf16.mxu0 %v7928_v29  ;;  %v546_v5 = vsel %vm8471_vm2, %v541_v36, %v545_v31  ;;  %v6330_v31 = vcombine.low %v8593_v35, %v8618_v63  ;;  %v609_v35 = vshll.u32 %v8633_v9, 16  ;;  %v589_v50 = vrot.slane %v588_v37, 4  ;;  %v7941_v36 = vld [vmem:[%s10743_s1 + $0xc8] sm:$0xff]  }
  0x78   : > { %7502 = vmatprep.subr.bf16.mxu1 %v7929_v43  ;;  %v6304_v12 = vcombine.low %v546_v5, %v556_v6  ;;  %v565_v21 = vrot.slane %v564_v7, 4  ;;  %v598_v54 = vor.u32 %v597_v39, %v593_v30  ;;  %v619_v57 = vshrl.u32 %v8643_v18, 16  ;;  %v8682_v6 = vld [vmem:[%s8426_s8 + $0x78] sm:$0xf] }
  0x79   : > { %7455 = vmatpush3.bf16.msra.mxu0 %v7928_v29  ;;  %v575_v29 = vrot.slane %v574_v15, 4  ;;  %v611_v58 = vrot.slane %v609_v35, 5  ;;  %v617_v59 = vrot.slane %v615_v48, 5  ;;  %v594_v2 = vsel %vm8471_vm2, %v589_v50, %v593_v30  ;;  %v8711_v48 = vld [vmem:[%s10743_s1 + $0x138] sm:$0xff]  }
  0x7a   : > { %7503 = vmatpush3.bf16.msra.mxu1 %v7929_v43  ;;  %7456 = vmatprep.subr.bf16.mxu0 %v7932_v61  ;;  %v570_v34 = vsel %vm8471_vm2, %v565_v21, %v569_v1  ;;  %v8653_v43 = vld [vmem:[%s8426_s8 + $0x68] sm:$0x1]  ;;  %v8676_v1 = vld [vmem:[%s8426_s8 + $0x74] sm:$0x1]  ;;  %v621_v4 = vrot.slane %v619_v57, 4  ;;  %v657_v35 = vshll.u32 %v8682_v6, 16 }
  0x7b   : > { %7504 = vmatprep.subr.bf16.mxu1 %v7933_v0  ;;  %v580_v45 = vsel %vm8471_vm2, %v575_v29, %v579_v19  ;;  %v599_v19 = vrot.slane %v598_v54, 4  ;;  %v612_v7 = vor.u32 %v611_v58, %v608_v46  ;;  %v649_v37 = vshll.u32 %v8676_v1, 16  ;;  %v8704_v46 = vld [vmem:[%s8426_s8 + $0x80] sm:$0x1]  ;;  %v8717_v54 = vld [vmem:[%s8426_s8 + $0x84] sm:$0xf] }
  0x7c   : > { %7377 = vmatmul.mubr.bf16.gmra.mxu0 %v6304_v12  ;;  %v6305_v47 = vcombine.low %v570_v34, %v580_v45  ;;  %v622_v21 = vor.u32 %v621_v4, %v617_v59  ;;  %v8720_v57 = vld [vmem:[%s8426_s8 + $0x88] sm:$0xf] }
  0x7d   : > { %7425 = vmatmul.mubr.bf16.gmra.mxu1 %v6328_v41  ;;  %7457 = vmatpush3.bf16.msra.mxu0 %v7932_v61  ;;  %v8660_v41 = vld [vmem:[%s8426_s8 + $0x6c] sm:$0xf]  ;;  %v8667_v61 = vld [vmem:[%s8426_s8 + $0x70] sm:$0xf]  ;;  %v604_v17 = vsel %vm8471_vm2, %v599_v19, %v603_v42  ;;  %v613_v27 = vrot.slane %v612_v7, 4  ;;  %v8728_v19 = vld [vmem:[%s10743_s1 + $0x178] sm:$0xff]  }
  0x7e   : > { %7428 = vmatprep.mubr.bf16.mxu1 %v6329_v60  ;;  %7505 = vmatpush3.bf16.msra.mxu1 %v7933_v0  ;;  %v625_v60 = vshll.u32 %v8653_v43, 16  ;;  %v6331_v0 = vcombine.low %v8633_v9, %v8643_v18  ;;  %v630_v5 = vshrl.u32 %v8660_v41, 16  ;;  %v633_v12 = vshll.u32 %v8660_v41, 16  ;;  %v8687_v9 = vld [vmem:[%s8426_s8 + $0x7c] sm:$0xf] }
  0x7f   : > { %7458 = vmatprep.subr.bf16.mxu0 %v7936_v10  ;;  %7506 = vmatprep.subr.bf16.mxu1 %v7937_v11  ;;  %v639_v15 = vshll.u32 %v8667_v61, 16  ;;  %v6306_v26 = vcombine.low %v594_v2, %v604_v17  ;;  %v623_v32 = vrot.slane %v622_v21, 4  ;;  %v6332_v39 = vcombine.low %v8660_v41, %v8667_v61  ;;  %v8723_v2 = vld [vmem:[%s8426_s8 + $0x8c] sm:$0x1] }
  0x80   : > { %7380 = vmatprep.mubr.bf16.mxu0 %v6305_v47  ;;  %v627_v8 = vrot.slane %v625_v60, 5  ;;  %v632_v23 = vrot.slane %v630_v5, 4  ;;  %v635_v29 = vrot.slane %v633_v12, 5  ;;  %v618_v42 = vsel %vm8471_vm2, %v613_v27, %v617_v59 }
  0x81   : > { %7459 = vmatpush3.bf16.msra.mxu0 %v7936_v10  ;;  %v643_v10 = vshrl.u32 %v8667_v61, 16  ;;  %v641_v30 = vrot.slane %v639_v15, 5  ;;  %v651_v47 = vrot.slane %v649_v37, 5  ;;  %v663_v50 = vshll.u32 %v8687_v9, 16 }
  0x82   : > { %7507 = vmatpush3.bf16.msra.mxu1 %v7937_v11  ;;  %7460 = vmatprep.subr.bf16.mxu0 %v7940_v49  ;;  %v7945_v11 = vld [vmem:[%s10743_s1 + $0xc0] sm:$0xff]   ;;  %v636_v45 = vor.u32 %v635_v29, %v632_v23  ;;  %v628_v41 = vsel %vm8471_vm2, %v623_v32, %v627_v8  ;;  %v667_v7 = vshrl.u32 %v8687_v9, 16  ;;  %v673_v8 = vshll.u32 %v8704_v46, 16 }
  0x83   : > { %7508 = vmatprep.subr.bf16.mxu1 %v7941_v36  ;;  %v645_v34 = vrot.slane %v643_v10, 4  ;;  %v6307_v58 = vcombine.low %v618_v42, %v628_v41  ;;  %v665_v5 = vrot.slane %v663_v50, 5  ;;  %v6333_v17 = vcombine.low %v8682_v6, %v8687_v9 }
  0x84   : > { %7381 = vmatmul.mubr.bf16.gmra.mxu0 %v6306_v26  ;;  %v637_v59 = vrot.slane %v636_v45, 4  ;;  %v678_v21 = vshrl.u32 %v8717_v54, 16  ;;  %v669_v10 = vrot.slane %v667_v7, 4  ;;  %v675_v26 = vrot.slane %v673_v8, 5  ;;  %v8749_v45 = vld [vmem:[%s8426_s8 + $0x94] sm:$0xf] }
  0x85   : > { %7429 = vmatmul.mubr.bf16.gmra.mxu1 %v6330_v31  ;;  %7461 = vmatpush3.bf16.msra.mxu0 %v7940_v49  ;;  %v654_v31 = vshrl.u32 %v8682_v6, 16  ;;  %v646_v49 = vor.u32 %v645_v34, %v641_v30  ;;  %v687_v32 = vshll.u32 %v8720_v57, 16  ;;  %v691_v37 = vshrl.u32 %v8720_v57, 16  ;;  %v8766_v7 = vld [vmem:[%s8426_s8 + $0xa0] sm:$0xf] }
  0x86   : > { %7432 = vmatprep.mubr.bf16.mxu1 %v6331_v0  ;;  %7509 = vmatpush3.bf16.msra.mxu1 %v7941_v36  ;;  %v659_v0 = vrot.slane %v657_v35, 5  ;;  %v8733_v36 = vld [vmem:[%s8426_s8 + $0x90] sm:$0xf]  ;;  %v642_v12 = vsel %vm8471_vm2, %v637_v59, %v641_v30  ;;  %v680_v30 = vrot.slane %v678_v21, 4  ;;  %v670_v6 = vor.u32 %v669_v10, %v665_v5  ;;  %v8756_v35 = vld [vmem:[%s8426_s8 + $0x98] sm:$0x1] }
  0x87   : > { %7462 = vmatprep.subr.bf16.mxu0 %v7944_v16  ;;  %v656_v60 = vrot.slane %v654_v31, 4  ;;  %7510 = vmatprep.subr.bf16.mxu1 %v7945_v11  ;;  %v647_v4 = vrot.slane %v646_v49, 4  ;;  %v697_v42 = vshll.u32 %v8723_v2, 16  ;;  %v689_v31 = vrot.slane %v687_v32, 5  ;;  %v8760_v59 = vld [vmem:[%s8426_s8 + $0x9c] sm:$0xf] }
  0x88   : > { %7384 = vmatprep.mubr.bf16.mxu0 %v6307_v58  ;;  %v702_v41 = vshrl.u32 %v8733_v36, 16  ;;  %v671_v49 = vrot.slane %v670_v6, 4  ;;  %v693_v50 = vrot.slane %v691_v37, 4  ;;  %v6335_v32 = vcombine.low %v8733_v36, %v8749_v45  ;;  %v374_v6 = vld [vmem:[%s8426_s8 + $0xa8] sm:$0xf] }
  0x89   : > { %7463 = vmatpush3.bf16.msra.mxu0 %v7944_v16  ;;  %v660_v15 = vor.u32 %v659_v0, %v656_v60  ;;  %v652_v23 = vsel %vm8471_vm2, %v647_v4, %v651_v47  ;;  %v681_v16 = vshll.u32 %v8717_v54, 16  ;;  %v699_v58 = vrot.slane %v697_v42, 5 }
  0x8a   : > { %7544 = vmatprep.subr.bf16.mxu0 %v8711_v48  ;;  %7511 = vmatpush3.bf16.msra.mxu1 %v7945_v11  ;;  %v6308_v27 = vcombine.low %v642_v12, %v652_v23  ;;  %v704_v60 = vrot.slane %v702_v41, 4  ;;  %v705_v0 = vshll.u32 %v8733_v36, 16  ;;  %v711_v4 = vshll.u32 %v8749_v45, 16  ;;  %v8787_v36 = vld [vmem:[%s8426_s8 + $0xac] sm:$0xf] }
  0x8b   : > { %v661_v29 = vrot.slane %v660_v15, 4  ;;  %7592 = vmatprep.subr.bf16.mxu1 %v8728_v19  ;;  %v683_v34 = vrot.slane %v681_v16, 5  ;;  %v676_v8 = vsel %vm8471_vm2, %v671_v49, %v675_v26  ;;  %v694_v15 = vor.u32 %v693_v50, %v689_v31 }
  0x8c   : > { %7385 = vmatmul.mubr.bf16.gmra.mxu0 %v6308_v27  ;;  %v707_v23 = vrot.slane %v705_v0, 5  ;;  %v713_v10 = vrot.slane %v711_v4, 5  ;;  %v726_v37 = vshrl.u32 %v8760_v59, 16  ;;  %v729_v42 = vshll.u32 %v8760_v59, 16 }
  0x8d   : > { %7433 = vmatmul.mubr.bf16.gmra.mxu1 %v6332_v39  ;;  %v666_v11 = vsel %vm8471_vm2, %v661_v29, %v665_v5  ;;  %v6334_v39 = vcombine.low %v8717_v54, %v8720_v57  ;;  %v684_v47 = vor.u32 %v683_v34, %v680_v30  ;;  %v715_v5 = vshrl.u32 %v8749_v45, 16  ;;  %v8769_v54 = vld [vmem:[%s8426_s8 + $0xa4] sm:$0x1] }
  0x8e   : > { %7436 = vmatprep.mubr.bf16.mxu1 %v6333_v17  ;;  %v721_v17 = vshll.u32 %v8756_v35, 16  ;;  %v6309_v21 = vcombine.low %v666_v11, %v676_v8  ;;  %v695_v29 = vrot.slane %v694_v15, 4  ;;  %v708_v26 = vor.u32 %v707_v23, %v704_v60 }
  0x8f   : > { %v685_v12 = vrot.slane %v684_v47, 4  ;;  %v717_v16 = vrot.slane %v715_v5, 4  ;;  %v739_v41 = vshrl.u32 %v8766_v7, 16  ;;  %v745_v49 = vshll.u32 %v8769_v54, 16  ;;  %v8790_v47 = vld [vmem:[%s8426_s8 + $0xb0] sm:$0x1] }
  0x90   : > { %v723_v30 = vrot.slane %v721_v17, 5  ;;  %7388 = vmatprep.mubr.bf16.mxu0 %v6309_v21  ;;  %v700_v11 = vsel %vm8471_vm2, %v695_v29, %v699_v58  ;;  %v709_v60 = vrot.slane %v708_v26, 4  ;;  %v728_v4 = vrot.slane %v726_v37, 4  ;;  %v8802_v26 = vld [vmem:[%s8426_s8 + $0xb8] sm:$0xf] }
  0x91   : > { %v690_v27 = vsel %vm8471_vm2, %v685_v12, %v689_v31  ;;  %v718_v34 = vor.u32 %v717_v16, %v713_v10  ;;  %v735_v31 = vshll.u32 %v8766_v7, 16  ;;  %v741_v5 = vrot.slane %v739_v41, 4  ;;  %v8793_v12 = vld [vmem:[%s8426_s8 + $0xb4] sm:$0xf] }
  0x92   : > { %v6310_v50 = vcombine.low %v690_v27, %v700_v11  ;;  %v747_v8 = vrot.slane %v745_v49, 5  ;;  %v714_v15 = vsel %vm8471_vm2, %v709_v60, %v713_v10  ;;  %v6336_v21 = vcombine.low %v8760_v59, %v8766_v7  ;;  %v8808_v11 = vld [vmem:[%s8426_s8 + $0xbc] sm:$0x1]  ;;  %v1391_v49 = vld [vmem:[%s8426_s8] sm:$0xe] }
  0x93   : > { %v719_v0 = vrot.slane %v718_v34, 4  ;;  %v737_v58 = vrot.slane %v735_v31, 5  ;;  %v750_v23 = vshrl.u32 %v374_v6, 16  ;;  %v759_v37 = vshll.u32 %v8787_v36, 16 }
  0x94   : > { %7389 = vmatmul.mubr.bf16.gmra.mxu0 %v6310_v50  ;;  %v769_v10 = vshll.u32 %v8790_v47, 16  ;;  %v6337_v41 = vcombine.low %v374_v6, %v8787_v36 }
  0x95   : > { %7437 = vmatmul.mubr.bf16.gmra.mxu1 %v6334_v39  ;;  %v731_v39 = vrot.slane %v729_v42, 5  ;;  %v724_v17 = vsel %vm8471_vm2, %v719_v0, %v723_v30  ;;  %v742_v29 = vor.u32 %v741_v5, %v737_v58  ;;  %v752_v34 = vrot.slane %v750_v23, 4  ;;  %v1392_v23 = vld [vmem:[%s8426_s8 + $0xc] sm:$0xe] }
  0x96   : > { %7440 = vmatprep.mubr.bf16.mxu1 %v6335_v32  ;;  %v6311_v16 = vcombine.low %v714_v15, %v724_v17  ;;  %v753_v32 = vshll.u32 %v374_v6, 16  ;;  %v763_v42 = vshrl.u32 %v8787_v36, 16  ;;  %v761_v50 = vrot.slane %v759_v37, 5 }
  0x97   : > { %v732_v27 = vor.u32 %v731_v39, %v728_v4  ;;  %v743_v30 = vrot.slane %v742_v29, 4  ;;  %v771_v0 = vrot.slane %v769_v10, 5  ;;  %v774_v4 = vshrl.u32 %v8793_v12, 16 }
  0x98   : > { %7392 = vmatprep.mubr.bf16.mxu0 %v6311_v16  ;;  %v755_v31 = vrot.slane %v753_v32, 5  ;;  %v765_v60 = vrot.slane %v763_v42, 4  ;;  %v777_v17 = vshll.u32 %v8793_v12, 16  ;;  %v783_v29 = vshll.u32 %v8802_v26, 16  ;;  %v1393_v32 = vld [vmem:[%s8426_s8 + $0x18] sm:$0xe] }
  0x99   : > { %v733_v59 = vrot.slane %v732_v27, 4  ;;  %v748_v5 = vsel %vm8471_vm2, %v743_v30, %v747_v8  ;;  %v776_v27 = vrot.slane %v774_v4, 4  ;;  %v793_v10 = vshll.u32 %v8808_v11, 16 }
  0x9a   : > { %v756_v15 = vor.u32 %v755_v31, %v752_v34  ;;  %v766_v6 = vor.u32 %v765_v60, %v761_v50  ;;  %v779_v42 = vrot.slane %v777_v17, 5  ;;  %v6338_v34 = vcombine.low %v8793_v12, %v8802_v26 }
  0x9b   : > { %v738_v39 = vsel %vm8471_vm2, %v733_v59, %v737_v58  ;;  %v787_v58 = vshrl.u32 %v8802_v26, 16  ;;  %v6347_v59 = vrot.slane %v1391_v49, 9  ;;  %v795_v60 = vrot.slane %v793_v10, 5  ;;  %v1396_v10 = vld [vmem:[%s8426_s8 + $0x3c] sm:$0xe] }
  0x9c   : > { %v6312_v16 = vcombine.low %v738_v39, %v748_v5  ;;  %v757_v37 = vrot.slane %v756_v15, 4  ;;  %v767_v8 = vrot.slane %v766_v6, 4  ;;  %v780_v31 = vor.u32 %v779_v42, %v776_v27  ;;  %v7946_v5 = vld [vmem:[%s8426_s8 + $0xc] sm:$0xff]   ;;  %v1394_v27 = vld [vmem:[%s8426_s8 + $0x24] sm:$0xe] }
  0x9d   : > { %7441 = vmatmul.mubr.bf16.gmra.mxu1 %v6336_v21  ;;  %v785_v21 = vrot.slane %v783_v29, 5  ;;  %v1444_v12 = vrot.slane %v8436_v13, 5  ;;  %v6348_v49 = vrot.slane %v1392_v23, 9  ;;  %v1451_v15 = vrot.slane %v8453_v24, 5  ;;  %v1395_v13 = vld [vmem:[%s8426_s8 + $0x30] sm:$0xe] }
  0x9e   : > { %7444 = vmatprep.mubr.bf16.mxu1 %v6337_v41  ;;  %7393 = vmatmul.mubr.bf16.gmra.mxu0 %v6312_v16  ;;  %v762_v30 = vsel %vm8471_vm2, %v757_v37, %v761_v50  ;;  %v789_v41 = vrot.slane %v787_v58, 4  ;;  %v772_v39 = vsel %vm8471_vm2, %v767_v8, %v771_v0  ;;  %v781_v17 = vrot.slane %v780_v31, 4 }
  0x9f   : > { %v6313_v50 = vcombine.low %v762_v30, %v772_v39  ;;  %v6349_v6 = vrot.slane %v1393_v32, 9  ;;  %v1445_v29 = vsel %vm8829_vm5, %v6347_v59, %v1444_v12  ;;  %v1446_v37 = vrot.slane %v1444_v12, 4  ;;  %v7947_v30 = vld [vmem:[%s8426_s8 + $0x18] sm:$0xff]   ;;  %v1398_v39 = vld [vmem:[%s8426_s8 + $0x54] sm:$0xe] }
  0xa0   : > { %v790_v16 = vor.u32 %v789_v41, %v785_v21  ;;  %v8843_v42 = vsel %vm8829_vm5, %v6348_v49, %v1451_v15  ;;  %v1453_v0 = vrot.slane %v1451_v15, 4  ;;  %v786_v24 = vsel %vm8471_vm2, %v781_v17, %v785_v21 }
  0xa1   : > { %7396 = vmatprep.mubr.bf16.mxu0 %v6313_v50  ;;  %v1458_v32 = vrot.slane %v8482_v52, 5  ;;  %v1461_v58 = vrot.slane %v8485_v53, 5  ;;  %v1448_v8 = vsel %vm8829_vm5, %v1446_v37, %v1447_v22  ;;  %v6350_v59 = vrot.slane %v1394_v27, 9  ;;  %v7950_v50 = vld [vmem:[%s8426_s8 + $0x24] sm:$0xff]  }
  0xa2   : > { %v791_v23 = vrot.slane %v790_v16, 4  ;;  %v8859_v21 = vsel %vm8829_vm5, %v1453_v0, %v1454_v44  ;;  %v6363_v53 = vcombine.low %v1445_v29, %v1448_v8  ;;  %v6351_v12 = vrot.slane %v1395_v13, 9 }
  0xa3   : > { %v6364_v14 = vcombine.low %v8843_v42, %v8859_v21  ;;  %v8869_v22 = vsel %vm8829_vm5, %v6349_v6, %v1458_v32  ;;  %v1460_v44 = vrot.slane %v1458_v32, 4  ;;  %v1475_v49 = vrot.slane %v8539_v38, 5  ;;  %v1399_v32 = vld [vmem:[%s8426_s8 + $0x60] sm:$0xe]  ;;  %v7951_v21 = vld [vmem:[%s8426_s8 + $0x30] sm:$0xff]  }
  0xa4   : > { %v796_v52 = vsel %vm8471_vm2, %v791_v23, %v795_v60  ;;  %v1468_v60 = vrot.slane %v8504_v3, 5  ;;  %v6352_v17 = vrot.slane %v1396_v10, 9  ;;  %v1479_v16 = vrot.slane %v8552_v55, 5 }
  0xa5   : > { %7445 = vmatmul.mubr.bf16.gmra.mxu1 %v6338_v34  ;;  %v1465_v34 = vrot.slane %v8501_v62, 5  ;;  %v6314_v31 = vcombine.low %v786_v24, %v796_v52  ;;  %v1462_v15 = vsel %vm8829_vm5, %v1460_v44, %v1461_v58  ;;  %v1482_v6 = vrot.slane %v8555_v56, 5  ;;  %v7952_v58 = vld [vmem:[%s10743_s1 + $0x130] sm:$0xff]  }
  0xa6   : > { %7512 = vmatprep.mubr.bf16.mxu1 %v7946_v5  ;;  %v1472_v5 = vrot.slane %v8529_v33, 5  ;;  %v6365_v27 = vcombine.low %v8869_v22, %v1462_v15  ;;  %v7953_v33 = vld [vmem:[%s10743_s1 + $0x170] sm:$0xff]   ;;  %v8901_v56 = vsel %vm8829_vm5, %v6352_v17, %v1479_v16  ;;  %v1481_v37 = vrot.slane %v1479_v16, 4 }
  0xa7   : > { %v8874_v41 = vsel %vm8829_vm5, %v6350_v59, %v1465_v34  ;;  %v1467_v62 = vrot.slane %v1465_v34, 4  ;;  %7397 = vmatmul.mubr.bf16.gmra.mxu0 %v6314_v31  ;;  %v6353_v42 = vrot.slane %v1397_v25, 9  ;;  %v1486_v13 = vrot.slane %v8584_v20, 5  ;;  %v7954_v31 = vld [vmem:[%s8426_s8 + $0x3c] sm:$0xff]  }
  0xa8   : > { %7464 = vmatprep.mubr.bf16.mxu0 %v6363_v53  ;;  %v8895_v38 = vsel %vm8829_vm5, %v6351_v12, %v1472_v5  ;;  %v1474_v29 = vrot.slane %v1472_v5, 4  ;;  %v1489_v24 = vrot.slane %v8587_v28, 5  ;;  %v6354_v23 = vrot.slane %v1398_v39, 9  ;;  %v1400_v53 = vld [vmem:[%s8426_s8 + $0x6c] sm:$0xe]  ;;  %v7961_v5 = vld [vmem:[%s10743_s1 + $0x160] sm:$0xff]  }
  0xa9   : > { %v8888_v3 = vsel %vm8829_vm5, %v1467_v62, %v1468_v60  ;;  %v8918_v8 = vsel %vm8829_vm5, %v1481_v37, %v1482_v6  ;;  %v1493_v20 = vrot.slane %v8618_v63, 5  ;;  %v1496_v28 = vrot.slane %v8624_v51, 5  ;;  %v7956_v12 = vld [vmem:[%s10743_s1 + $0x128] sm:$0xff]  }
  0xaa   : > { %v6366_v55 = vcombine.low %v8874_v41, %v8888_v3  ;;  %v8905_v0 = vsel %vm8829_vm5, %v1474_v29, %v1475_v49  ;;  %v8927_v59 = vsel %vm8829_vm5, %v6353_v42, %v1486_v13  ;;  %v1488_v34 = vrot.slane %v1486_v13, 4  ;;  %v7965_v13 = vld [vmem:[%s10743_s1 + $0x158] sm:$0xff]  }
  0xab   : > { %v6367_v10 = vcombine.low %v8895_v38, %v8905_v0  ;;  %v6355_v52 = vrot.slane %v1399_v32, 9  ;;  %v8935_v63 = vsel %vm8829_vm5, %v6354_v23, %v1493_v20  ;;  %v1495_v51 = vrot.slane %v1493_v20, 4  ;;  %v7955_v32 = vld [vmem:[%s8426_s8 + $0x48] sm:$0xff]  }
  0xac   : > { %v1500_v22 = vrot.slane %v8643_v18, 5  ;;  %v1503_v25 = vrot.slane %v8653_v43, 5  ;;  %v8942_v44 = vsel %vm8829_vm5, %v1488_v34, %v1489_v24  ;;  %v6356_v62 = vrot.slane %v1400_v53, 9  ;;  %v7958_v34 = vld [vmem:[%s8426_s8 + $0x54] sm:$0xff]  }
  0xad   : > { %7513 = vmatmul.mubr.bf16.vlgmr.msra.gmra.mxu1 %v7947_v30  ;;  %v7957_v30 = vld [vmem:[%s10743_s1 + $0x168] sm:$0xff]   ;;  %v1507_v39 = vrot.slane %v8667_v61, 5  ;;  %v1510_v60 = vrot.slane %v8676_v1, 5  ;;  %v6369_v18 = vcombine.low %v8927_v59, %v8942_v44  ;;  %v8953_v43 = vsel %vm8829_vm5, %v1495_v51, %v1496_v28 }
  0xae   : > { %7593 = vmatpush3.bf16.msra.mxu1 %v8728_v19  ;;  %7516 = vmatprep.mubr.bf16.mxu1 %v7950_v50  ;;  %v6368_v19 = vcombine.low %v8901_v56, %v8918_v8  ;;  %v8960_v61 = vsel %vm8829_vm5, %v6355_v52, %v1500_v22  ;;  %v1502_v1 = vrot.slane %v1500_v22, 4  ;;  %v1401_v50 = vld [vmem:[%s8426_s8 + $0x78] sm:$0xe]  ;;  %v1514_v17 = vrot.slane %v8687_v9, 5  ;;  %v1402_v9 = vld [vmem:[%s8426_s8 + $0x84] sm:$0xe] }
  0xaf   : > { %7594 = vmatprep.subr.bf16.mxu1 %v7953_v33  ;;  %7465 = vmatmul.mubr.bf16.vlgmr.msra.gmra.mxu0 %v6364_v14  ;;  %v6370_v14 = vcombine.low %v8935_v63, %v8953_v43  ;;  %v8967_v49 = vsel %vm8829_vm5, %v6356_v62, %v1507_v39  ;;  %v1509_v15 = vrot.slane %v1507_v39, 4  ;;  %v1517_v6 = vrot.slane %v8704_v46, 5  ;;  %v7960_v46 = vld [vmem:[%s10743_s1 + $0x120] sm:$0xff]   ;;  %v6515_v59 = vld [vmem:[%s8426_s8 + $0xc] sm:$0xe] }
  0xb0   : > { %7545 = vmatpush3.bf16.msra.mxu0 %v8711_v48  ;;  %7468 = vmatprep.mubr.bf16.mxu0 %v6365_v27  ;;  %v8973_v16 = vsel %vm8829_vm5, %v1502_v1, %v1503_v25  ;;  %v6357_v48 = vrot.slane %v1401_v50, 9  ;;  %v1516_v29 = vrot.slane %v1514_v17, 4  ;;  %v1521_v37 = vrot.slane %v8720_v57, 5  ;;  %v1406_v50 = vld [vmem:[%s8426_s8 + $0xb4] sm:$0xe]  ;;  %v7977_v8 = vld [vmem:[%s10743_s1 + $0x140] sm:$0xff]  }
  0xb1   : > { %7546 = vmatprep.subr.bf16.mxu0 %v7952_v58  ;;  %v6371_v27 = vcombine.low %v8960_v61, %v8973_v16  ;;  %v6358_v57 = vrot.slane %v1402_v9, 9  ;;  %v1524_v23 = vrot.slane %v8723_v2, 5  ;;  %v1403_v2 = vld [vmem:[%s8426_s8 + $0x90] sm:$0xe]  ;;  %v1538_v39 = vrot.slane %v8769_v54, 5  ;;  %v7973_v9 = vld [vmem:[%s10743_s1 + $0x148] sm:$0xff]  }
  0xb2   : > { %7595 = vmatpush3.bf16.msra.mxu1 %v7953_v33  ;;  %v8980_v33 = vsel %vm8829_vm5, %v1509_v15, %v1510_v60  ;;  %v8994_v24 = vsel %vm8829_vm5, %v6357_v48, %v1514_v17  ;;  %v9000_v20 = vsel %vm8829_vm5, %v1516_v29, %v1517_v6  ;;  %v1523_v28 = vrot.slane %v1521_v37, 4  ;;  %v7959_v48 = vld [vmem:[%s8426_s8 + $0x60] sm:$0xff]   ;;  %v6450_v63 = vld [vmem:[%s8426_s8 + $0x28] sm:$0xf]  ;;  %v9142_v61 = vld [vmem:[%s10743_s1 + $0x1b8] sm:$0xff]  }
  0xb3   : > { %7596 = vmatprep.subr.bf16.mxu1 %v7957_v30  ;;  %v6372_v42 = vcombine.low %v8967_v49, %v8980_v33  ;;  %v6373_v52 = vcombine.low %v8994_v24, %v9000_v20  ;;  %v9008_v53 = vsel %vm8829_vm5, %v6358_v57, %v1521_v37  ;;  %v6359_v22 = vrot.slane %v1403_v2, 9  ;;  %v6451_v16 = vld [vmem:[%s8426_s8 + $0x2c] sm:$0x1] }
  0xb4   : > { %7547 = vmatpush3.bf16.msra.mxu0 %v7952_v58  ;;  %v1531_v58 = vrot.slane %v8756_v35, 5  ;;  %v9015_v51 = vsel %vm8829_vm5, %v1523_v28, %v1524_v23  ;;  %v7964_v35 = vld [vmem:[%s10743_s1 + $0x118] sm:$0xff]   ;;  %v1542_v60 = vrot.slane %v8787_v36, 5  ;;  %v7968_v36 = vld [vmem:[%s10743_s1 + $0x110] sm:$0xff]   ;;  %v1549_v17 = vrot.slane %v8802_v26, 5 }
  0xb5   : > { %7517 = vmatmul.mubr.bf16.gmra.mxu1 %v7951_v21  ;;  %v1528_v21 = vrot.slane %v8749_v45, 5  ;;  %7548 = vmatprep.subr.bf16.mxu0 %v7956_v12  ;;  %v7969_v45 = vld [vmem:[%s10743_s1 + $0x150] sm:$0xff]   ;;  %v6362_v6 = vrot.slane %v1406_v50, 9  ;;  %v1552_v29 = vrot.slane %v8808_v11, 5  ;;  %v7972_v11 = vld [vmem:[%s10743_s1 + $0x108] sm:$0xff]  }
  0xb6   : > { %7520 = vmatprep.mubr.bf16.mxu1 %v7954_v31  ;;  %7597 = vmatpush3.bf16.msra.mxu1 %v7957_v30  ;;  %v1535_v30 = vrot.slane %v8766_v7, 5  ;;  %v6374_v7 = vcombine.low %v9008_v53, %v9015_v51  ;;  %v1404_v31 = vld [vmem:[%s8426_s8 + $0x9c] sm:$0xe]  ;;  %v1551_v37 = vrot.slane %v1549_v17, 4  ;;  %v6444_v28 = vld [vmem:[%s8426_s8 + $0x10] sm:$0xf] }
  0xb7   : > { %7598 = vmatprep.subr.bf16.mxu1 %v7961_v5  ;;  %v1530_v25 = vrot.slane %v1528_v21, 4  ;;  %7469 = vmatmul.mubr.bf16.gmra.mxu0 %v6366_v55  ;;  %v9035_v41 = vsel %vm8829_vm5, %v6359_v22, %v1528_v21  ;;  %v6360_v55 = vrot.slane %v1404_v31, 9  ;;  %v9079_v57 = vsel %vm8829_vm5, %v6362_v6, %v1549_v17  ;;  %v6446_v31 = vld [vmem:[%s8426_s8 + $0x18] sm:$0xf]  ;;  %v6448_v17 = vld [vmem:[%s8426_s8 + $0x20] sm:$0x1] }
  0xb8   : > { %v1537_v62 = vrot.slane %v1535_v30, 4  ;;  %7472 = vmatprep.mubr.bf16.mxu0 %v6367_v10  ;;  %7549 = vmatpush3.bf16.msra.mxu0 %v7956_v12  ;;  %v1405_v10 = vld [vmem:[%s8426_s8 + $0xa8] sm:$0xe]  ;;  %v1544_v12 = vrot.slane %v1542_v60, 4  ;;  %v9089_v23 = vsel %vm8829_vm5, %v1551_v37, %v1552_v29  ;;  %v2319_v2 = vshll.u32 %v6444_v28, 16 }
  0xb9   : > { %v9039_v3 = vsel %vm8829_vm5, %v1530_v25, %v1531_v58  ;;  %7550 = vmatprep.subr.bf16.mxu0 %v7960_v46  ;;  %v9050_v0 = vsel %vm8829_vm5, %v6360_v55, %v1535_v30  ;;  %v6361_v15 = vrot.slane %v1405_v10, 9  ;;  %v6378_v56 = vcombine.low %v9079_v57, %v9089_v23  ;;  %v6447_v10 = vld [vmem:[%s8426_s8 + $0x1c] sm:$0xf]  ;;  %v6516_v29 = vld [vmem:[%s8426_s8 + $0x18] sm:$0xe] }
  0xba   : > { %7599 = vmatpush3.bf16.msra.mxu1 %v7961_v5  ;;  %v6375_v54 = vcombine.low %v9035_v41, %v9039_v3  ;;  %v9046_v38 = vsel %vm8829_vm5, %v1537_v62, %v1538_v39  ;;  %v1545_v5 = vrot.slane %v8790_v47, 5  ;;  %v2323_v58 = vshrl.u32 %v6444_v28, 16  ;;  %v7976_v62 = vld [vmem:[%s10743_s1 + $0x100] sm:$0xff]   ;;  %v6459_v3 = vld [vmem:[%s8426_s8 + $0x4c] sm:$0xf] }
  0xbb   : > { %7600 = vmatprep.subr.bf16.mxu1 %v7965_v13  ;;  %v6376_v1 = vcombine.low %v9050_v0, %v9046_v38  ;;  %v9072_v26 = vsel %vm8829_vm5, %v6361_v15, %v1542_v60  ;;  %v3080_v44 = vrot.slane %v6444_v28, 5  ;;  %v2321_v25 = vrot.slane %v2319_v2, 5  ;;  %v9125_v2 = vld [vmem:[%s10743_s1 + $0x1f8] sm:$0xff]  }
  0xbc   : > { %7551 = vmatpush3.bf16.msra.mxu0 %v7960_v46  ;;  %v9064_v47 = vsel %vm8829_vm5, %v1544_v12, %v1545_v5  ;;  %v7962_v46 = vld [vmem:[%s8426_s8 + $0x6c] sm:$0xff]   ;;  %v2325_v39 = vrot.slane %v2323_v58, 4  ;;  %v2334_v12 = vshrl.u32 %v6446_v31, 16  ;;  %v7963_v5 = vld [vmem:[%s8426_s8 + $0x78] sm:$0xff]   ;;  %v2343_v6 = vshll.u32 %v6447_v10, 16 }
  0xbd   : > { %7521 = vmatmul.mubr.bf16.gmra.mxu1 %v7955_v32  ;;  %7552 = vmatprep.subr.bf16.mxu0 %v7964_v35  ;;  %v6443_v32 = vld [vmem:[%s8426_s8 + $0xc] sm:$0xf]  ;;  %v3082_v60 = vrot.slane %v3080_v44, 4  ;;  %v2347_v28 = vshrl.u32 %v6447_v10, 16 }
  0xbe   : > { %7524 = vmatprep.mubr.bf16.mxu1 %v7958_v34  ;;  %7601 = vmatpush3.bf16.msra.mxu1 %v7965_v13  ;;  %v6377_v13 = vcombine.low %v9072_v26, %v9064_v47  ;;  %v2310_v21 = vshrl.u32 %v6443_v32, 16  ;;  %v2313_v34 = vshll.u32 %v6443_v32, 16  ;;  %v2326_v37 = vor.u32 %v2325_v39, %v2321_v25  ;;  %v6521_v26 = vld [vmem:[%s8426_s8 + $0x54] sm:$0xe] }
  0xbf   : > { %7602 = vmatprep.subr.bf16.mxu1 %v7969_v45  ;;  %7473 = vmatmul.mubr.bf16.gmra.mxu0 %v6368_v19  ;;  %v6445_v19 = vld [vmem:[%s8426_s8 + $0x14] sm:$0x1]  ;;  %v2336_v32 = vrot.slane %v2334_v12, 4 }
  0xc0   : > { %7476 = vmatprep.mubr.bf16.mxu0 %v6369_v18  ;;  %7553 = vmatpush3.bf16.msra.mxu0 %v7964_v35  ;;  %v2329_v30 = vshll.u32 %v6445_v19, 16  ;;  %v3083_v18 = vrot.slane %v6445_v19, 5  ;;  %v2315_v22 = vrot.slane %v2313_v34, 5  ;;  %v6531_v35 = vrot.slane %v6515_v59, 9 }
  0xc1   : > { %7554 = vmatprep.subr.bf16.mxu0 %v7968_v36  ;;  %v2345_v34 = vrot.slane %v2343_v6, 5  ;;  %v2327_v58 = vrot.slane %v2326_v37, 4  ;;  %v2353_v59 = vshll.u32 %v6448_v17, 16  ;;  %v2371_v6 = vshrl.u32 %v6450_v63, 16 }
  0xc2   : > { %7603 = vmatpush3.bf16.msra.mxu1 %v7969_v45  ;;  %v2312_v45 = vrot.slane %v2310_v21, 4  ;;  %v2331_v55 = vrot.slane %v2329_v30, 5  ;;  %v9111_v50 = vsel %vm8829_vm5, %v6531_v35, %v3080_v44  ;;  %v2349_v30 = vrot.slane %v2347_v28, 4 }
  0xc3   : > { %7604 = vmatprep.subr.bf16.mxu1 %v7973_v9  ;;  %v6532_v44 = vrot.slane %v6516_v29, 9  ;;  %v3090_v35 = vrot.slane %v6448_v17, 5  ;;  %v6517_v17 = vld [vmem:[%s8426_s8 + $0x24] sm:$0xe]  ;;  %v2377_v29 = vshll.u32 %v6451_v16, 16 }
  0xc4   : > { %7555 = vmatpush3.bf16.msra.mxu0 %v7968_v36  ;;  %v2316_v15 = vor.u32 %v2315_v22, %v2312_v45  ;;  %v3087_v22 = vrot.slane %v6447_v10, 5  ;;  %v2332_v43 = vsel %vm8471_vm2, %v2327_v58, %v2331_v55  ;;  %v2373_v58 = vrot.slane %v2371_v6, 4 }
  0xc5   : > { %7525 = vmatmul.mubr.bf16.gmra.mxu1 %v7959_v48  ;;  %v2337_v48 = vshll.u32 %v6446_v31, 16  ;;  %7556 = vmatprep.subr.bf16.mxu0 %v7972_v11  ;;  %v6449_v31 = vld [vmem:[%s8426_s8 + $0x24] sm:$0xf] }
  0xc6   : > { %7528 = vmatprep.mubr.bf16.mxu1 %v7962_v46  ;;  %7605 = vmatpush3.bf16.msra.mxu1 %v7973_v9  ;;  %v7966_v9 = vld [vmem:[%s8426_s8 + $0x84] sm:$0xff]   ;;  %v9118_v46 = vsel %vm8829_vm5, %v3082_v60, %v3083_v18  ;;  %v2317_v36 = vrot.slane %v2316_v15, 4  ;;  %v9150_v39 = vsel %vm8829_vm5, %v6532_v44, %v3087_v22  ;;  %v3089_v55 = vrot.slane %v3087_v22, 4  ;;  %v6454_v44 = vld [vmem:[%s8426_s8 + $0x38] sm:$0x1] }
  0xc7   : > { %7606 = vmatprep.subr.bf16.mxu1 %v7977_v8  ;;  %v6547_v19 = vcombine.low %v9111_v50, %v9118_v46  ;;  %v2339_v21 = vrot.slane %v2337_v48, 5  ;;  %7477 = vmatmul.mubr.bf16.gmra.mxu0 %v6370_v14  ;;  %v2350_v14 = vor.u32 %v2349_v30, %v2345_v34  ;;  %v2361_v12 = vshll.u32 %v6449_v31, 16 }
  0xc8   : > { %7480 = vmatprep.mubr.bf16.mxu0 %v6371_v27  ;;  %7557 = vmatpush3.bf16.msra.mxu0 %v7972_v11  ;;  %v2322_v18 = vsel %vm8471_vm2, %v2317_v36, %v2321_v25  ;;  %v2358_v27 = vshrl.u32 %v6449_v31, 16  ;;  %v2367_v15 = vshll.u32 %v6450_v63, 16  ;;  %v9157_v48 = vsel %vm8829_vm5, %v3089_v55, %v3090_v35  ;;  %v6453_v36 = vld [vmem:[%s8426_s8 + $0x34] sm:$0xf] }
  0xc9   : > { %v2340_v45 = vor.u32 %v2339_v21, %v2336_v32  ;;  %7558 = vmatprep.subr.bf16.mxu0 %v7976_v62  ;;  %v9146_v11 = vcombine.low %v2322_v18, %v2332_v43  ;;  %v2351_v60 = vrot.slane %v2350_v14, 4  ;;  %v6548_v32 = vcombine.low %v9150_v39, %v9157_v48  ;;  %v7967_v21 = vld [vmem:[%s8426_s8 + $0x90] sm:$0xff]   ;;  %v7970_v18 = vld [vmem:[%s8426_s8 + $0x9c] sm:$0xff]  }
  0xca   : > { %7607 = vmatpush3.bf16.msra.mxu1 %v7977_v8  ;;  %v2355_v8 = vrot.slane %v2353_v59, 5  ;;  %v2360_v10 = vrot.slane %v2358_v27, 4  ;;  %v2369_v28 = vrot.slane %v2367_v15, 5  ;;  %v2379_v30 = vrot.slane %v2377_v29, 5  ;;  %v6455_v15 = vld [vmem:[%s8426_s8 + $0x3c] sm:$0xf] }
  0xcb   : > { %7688 = vmatprep.subr.bf16.mxu1 %v9125_v2  ;;  %v2341_v25 = vrot.slane %v2340_v45, 4  ;;  %v6533_v59 = vrot.slane %v6517_v17, 9  ;;  %v3094_v22 = vrot.slane %v6450_v63, 5  ;;  %v3097_v35 = vrot.slane %v6451_v16, 5 }
  0xcc   : > { %7559 = vmatpush3.bf16.msra.mxu0 %v7976_v62  ;;  %v2356_v37 = vsel %vm8471_vm2, %v2351_v60, %v2355_v8  ;;  %v2363_v62 = vrot.slane %v2361_v12, 5  ;;  %v2374_v43 = vor.u32 %v2373_v58, %v2369_v28  ;;  %v2391_v8 = vshll.u32 %v6453_v36, 16 }
  0xcd   : > { %7529 = vmatmul.mubr.bf16.gmra.mxu1 %v7963_v5  ;;  %v2346_v5 = vsel %vm8471_vm2, %v2341_v25, %v2345_v34  ;;  %7640 = vmatprep.subr.bf16.mxu0 %v9142_v61  ;;  %v2395_v27 = vshrl.u32 %v6453_v36, 16  ;;  %v6518_v25 = vld [vmem:[%s8426_s8 + $0x30] sm:$0xe]  ;;  %v9180_v49 = vsel %vm8829_vm5, %v6533_v59, %v3094_v22  ;;  %v3096_v33 = vrot.slane %v3094_v22, 4  ;;  %v6457_v59 = vld [vmem:[%s8426_s8 + $0x44] sm:$0x1] }
  0xce   : > { %7532 = vmatprep.mubr.bf16.mxu1 %v7966_v9  ;;  %v6452_v9 = vld [vmem:[%s8426_s8 + $0x30] sm:$0xf]  ;;  %v9167_v34 = vcombine.low %v2346_v5, %v2356_v37  ;;  %v2364_v45 = vor.u32 %v2363_v62, %v2360_v10  ;;  %v2375_v63 = vrot.slane %v2374_v43, 4  ;;  %v2393_v24 = vrot.slane %v2391_v8, 5  ;;  %v7971_v37 = vld [vmem:[%s8426_s8 + $0xa8] sm:$0xff]  }
  0xcf   : > { %7481 = vmatmul.mubr.bf16.gmra.mxu0 %v6372_v42  ;;  %v2382_v31 = vshrl.u32 %v6452_v9, 16  ;;  %v2385_v14 = vshll.u32 %v6452_v9, 16  ;;  %v2397_v20 = vrot.slane %v2395_v27, 4  ;;  %v9186_v60 = vsel %vm8829_vm5, %v3096_v33, %v3097_v35  ;;  %v6456_v9 = vld [vmem:[%s8426_s8 + $0x40] sm:$0xf] }
  0xd0   : > { %7484 = vmatprep.mubr.bf16.mxu0 %v6373_v52  ;;  %v2365_v55 = vrot.slane %v2364_v45, 4  ;;  %v2401_v10 = vshll.u32 %v6454_v44, 16  ;;  %v6534_v12 = vrot.slane %v6518_v25, 9  ;;  %v2380_v17 = vsel %vm8471_vm2, %v2375_v63, %v2379_v30  ;;  %v6458_v27 = vld [vmem:[%s8426_s8 + $0x48] sm:$0xf] }
  0xd1   : > { %v2384_v42 = vrot.slane %v2382_v31, 4  ;;  %v2387_v16 = vrot.slane %v2385_v14, 5  ;;  %v6549_v5 = vcombine.low %v9180_v49, %v9186_v60  ;;  %v2398_v29 = vor.u32 %v2397_v20, %v2393_v24  ;;  %v7974_v31 = vld [vmem:[%s8426_s8 + $0xb4] sm:$0xff]  }
  0xd2   : > { %v2370_v52 = vsel %vm8471_vm2, %v2365_v55, %v2369_v28  ;;  %v2403_v28 = vrot.slane %v2401_v10, 5  ;;  %v3104_v58 = vrot.slane %v6454_v44, 5  ;;  %v2406_v35 = vshrl.u32 %v6455_v15, 16 }
  0xd3   : > { %v2388_v6 = vor.u32 %v2387_v16, %v2384_v42  ;;  %v9195_v62 = vcombine.low %v2370_v52, %v2380_v17  ;;  %v2399_v22 = vrot.slane %v2398_v29, 4  ;;  %v2409_v30 = vshll.u32 %v6455_v15, 16  ;;  %v6520_v15 = vld [vmem:[%s8426_s8 + $0x48] sm:$0xe] }
  0xd4   : > { %v2419_v44 = vshrl.u32 %v6456_v9, 16  ;;  %v2408_v51 = vrot.slane %v2406_v35, 4  ;;  %v2425_v63 = vshll.u32 %v6457_v59, 16  ;;  %v3108_v52 = vrot.slane %v6456_v9, 5  ;;  %v7975_v35 = vld [vmem:[%s8426_s8 + $0xc0] sm:$0xff]  }
  0xd5   : > { %7533 = vmatmul.mubr.bf16.gmra.mxu1 %v7967_v21  ;;  %v3101_v21 = vrot.slane %v6453_v36, 5  ;;  %v2389_v45 = vrot.slane %v2388_v6, 4  ;;  %v2415_v36 = vshll.u32 %v6456_v9, 16  ;;  %v2404_v53 = vsel %vm8471_vm2, %v2399_v22, %v2403_v28  ;;  %v6461_v28 = vld [vmem:[%s8426_s8 + $0x54] sm:$0xf] }
  0xd6   : > { %7536 = vmatprep.mubr.bf16.mxu1 %v7970_v18  ;;  %v6519_v18 = vld [vmem:[%s8426_s8 + $0x3c] sm:$0xe]  ;;  %v2421_v41 = vrot.slane %v2419_v44, 4  ;;  %v3111_v10 = vrot.slane %v6457_v59, 5  ;;  %v2427_v6 = vrot.slane %v2425_v63, 5  ;;  %v2433_v29 = vshll.u32 %v6458_v27, 16 }
  0xd7   : > { %7485 = vmatmul.mubr.bf16.gmra.mxu0 %v6374_v7  ;;  %v9205_v43 = vsel %vm8829_vm5, %v6534_v12, %v3101_v21  ;;  %v3103_v14 = vrot.slane %v3101_v21, 4  ;;  %v2394_v8 = vsel %vm8471_vm2, %v2389_v45, %v2393_v24  ;;  %v2411_v7 = vrot.slane %v2409_v30, 5  ;;  %v6460_v24 = vld [vmem:[%s8426_s8 + $0x50] sm:$0x1]  ;;  %v6462_v22 = vld [vmem:[%s8426_s8 + $0x58] sm:$0xf] }
  0xd8   : > { %7488 = vmatprep.mubr.bf16.mxu0 %v6375_v54  ;;  %v9215_v25 = vcombine.low %v2394_v8, %v2404_v53  ;;  %v2417_v33 = vrot.slane %v2415_v36, 5  ;;  %v6535_v16 = vrot.slane %v6519_v18, 9  ;;  %v2430_v12 = vshrl.u32 %v6458_v27, 16 }
  0xd9   : > { %v9219_v55 = vsel %vm8829_vm5, %v3103_v14, %v3104_v58  ;;  %v2412_v42 = vor.u32 %v2411_v7, %v2408_v51  ;;  %v3110_v18 = vrot.slane %v3108_v52, 4  ;;  %v2435_v59 = vrot.slane %v2433_v29, 5 }
  0xda   : > { %v6550_v54 = vcombine.low %v9205_v43, %v9219_v55  ;;  %v2422_v20 = vor.u32 %v2421_v41, %v2417_v33  ;;  %v9229_v58 = vsel %vm8829_vm5, %v6535_v16, %v3108_v52  ;;  %v2432_v45 = vrot.slane %v2430_v12, 4  ;;  %v7984_v43 = vld [vmem:[%s10743_s1 + $0x1a0] sm:$0xff]  }
  0xdb   : > { %v2413_v17 = vrot.slane %v2412_v42, 4  ;;  %v9242_v36 = vsel %vm8829_vm5, %v3110_v18, %v3111_v10  ;;  %v2449_v44 = vshll.u32 %v6460_v24, 16  ;;  %v6536_v8 = vrot.slane %v6520_v15, 9  ;;  %v6465_v18 = vld [vmem:[%s8426_s8 + $0x64] sm:$0xf] }
  0xdc   : > { %v2423_v21 = vrot.slane %v2422_v20, 4  ;;  %v6551_v38 = vcombine.low %v9229_v58, %v9242_v36  ;;  %v2436_v0 = vor.u32 %v2435_v59, %v2432_v45  ;;  %v3115_v7 = vrot.slane %v6459_v3, 5  ;;  %v9273_v45 = vld [vmem:[%s8426_s8 + $0x68] sm:$0x1] }
  0xdd   : > { %7537 = vmatmul.mubr.bf16.gmra.mxu1 %v7971_v37  ;;  %v2439_v37 = vshll.u32 %v6459_v3, 16  ;;  %v2418_v9 = vsel %vm8471_vm2, %v2413_v17, %v2417_v33  ;;  %v2451_v51 = vrot.slane %v2449_v44, 5  ;;  %v3118_v27 = vrot.slane %v6460_v24, 5  ;;  %v6463_v33 = vld [vmem:[%s8426_s8 + $0x5c] sm:$0x1] }
  0xde   : > { %7540 = vmatprep.mubr.bf16.mxu1 %v7974_v31  ;;  %v2443_v31 = vshrl.u32 %v6459_v3, 16  ;;  %v2428_v14 = vsel %vm8471_vm2, %v2423_v21, %v2427_v6  ;;  %v2454_v41 = vshrl.u32 %v6461_v28, 16  ;;  %v2437_v42 = vrot.slane %v2436_v0, 4  ;;  %v6464_v6 = vld [vmem:[%s8426_s8 + $0x60] sm:$0xf] }
  0xdf   : > { %v2441_v30 = vrot.slane %v2439_v37, 5  ;;  %7489 = vmatmul.mubr.bf16.gmra.mxu0 %v6376_v1  ;;  %v9247_v53 = vcombine.low %v2418_v9, %v2428_v14  ;;  %v2457_v16 = vshll.u32 %v6461_v28, 16  ;;  %v2463_v47 = vshll.u32 %v6462_v22, 16 }
  0xe0   : > { %7492 = vmatprep.mubr.bf16.mxu0 %v6377_v13  ;;  %v2445_v1 = vrot.slane %v2443_v31, 4  ;;  %v9258_v13 = vsel %vm8829_vm5, %v6536_v8, %v3115_v7  ;;  %v3117_v20 = vrot.slane %v3115_v7, 4  ;;  %v2456_v3 = vrot.slane %v2454_v41, 4  ;;  %v6522_v31 = vld [vmem:[%s8426_s8 + $0x60] sm:$0xe] }
  0xe1   : > { %v2467_v24 = vshrl.u32 %v6462_v22, 16  ;;  %v2442_v52 = vsel %vm8471_vm2, %v2437_v42, %v2441_v30  ;;  %v2459_v12 = vrot.slane %v2457_v16, 5  ;;  %v2465_v15 = vrot.slane %v2463_v47, 5  ;;  %v6468_v42 = vld [vmem:[%s8426_s8 + $0x70] sm:$0xf]  ;;  %v7983_v16 = vld [vmem:[%s10743_s1 + $0x1e8] sm:$0xff]  }
  0xe2   : > { %v2446_v63 = vor.u32 %v2445_v1, %v2441_v30  ;;  %v9264_v17 = vsel %vm8829_vm5, %v3117_v20, %v3118_v27  ;;  %v2473_v46 = vshll.u32 %v6463_v33, 16  ;;  %v3122_v21 = vrot.slane %v6462_v22, 5  ;;  %v7981_v22 = vld [vmem:[%s10743_s1 + $0x1f0] sm:$0xff]  }
  0xe3   : > { %v2469_v50 = vrot.slane %v2467_v24, 4  ;;  %v6552_v37 = vcombine.low %v9258_v13, %v9264_v17  ;;  %v2460_v28 = vor.u32 %v2459_v12, %v2456_v3  ;;  %v3125_v30 = vrot.slane %v6463_v33, 5  ;;  %v6467_v33 = vld [vmem:[%s8426_s8 + $0x6c] sm:$0xf]  ;;  %v9319_v3 = vld [vmem:[%s8426_s8 + $0x74] sm:$0x1] }
  0xe4   : > { %v2447_v10 = vrot.slane %v2446_v63, 4  ;;  %v2475_v59 = vrot.slane %v2473_v46, 5  ;;  %v3124_v57 = vrot.slane %v3122_v21, 4  ;;  %v2478_v23 = vshrl.u32 %v6464_v6, 16  ;;  %v7980_v63 = vld [vmem:[%s10743_s1 + $0x1b0] sm:$0xff]   ;;  %v7982_v46 = vld [vmem:[%s10743_s1 + $0x1a8] sm:$0xff]  }
  0xe5   : > { %7541 = vmatmul.mubr.bf16.gmra.mxu1 %v7975_v35  ;;  %v2470_v9 = vor.u32 %v2469_v50, %v2465_v15  ;;  %v2461_v14 = vrot.slane %v2460_v28, 4  ;;  %v2481_v8 = vshll.u32 %v6464_v6, 16  ;;  %v2487_v0 = vshll.u32 %v6465_v18, 16  ;;  %v6523_v50 = vld [vmem:[%s8426_s8 + $0x6c] sm:$0xe]  ;;  %v7985_v28 = vld [vmem:[%s10743_s1 + $0x1e0] sm:$0xff]  }
  0xe6   : > { %7608 = vmatprep.mubr.bf16.mxu1 %v6547_v19  ;;  %v6537_v19 = vrot.slane %v6521_v26, 9  ;;  %v2452_v29 = vsel %vm8471_vm2, %v2447_v10, %v2451_v51  ;;  %v2491_v1 = vshrl.u32 %v6465_v18, 16  ;;  %v9296_v51 = vsel %vm8829_vm5, %v3124_v57, %v3125_v30 }
  0xe7   : > { %7493 = vmatmul.mubr.bf16.gmra.mxu0 %v6378_v56  ;;  %v9278_v35 = vcombine.low %v2442_v52, %v2452_v29  ;;  %v2471_v56 = vrot.slane %v2470_v9, 4  ;;  %v2480_v7 = vrot.slane %v2478_v23, 4  ;;  %v2497_v27 = vshll.u32 %v9273_v45, 16 }
  0xe8   : > { %7560 = vmatprep.mubr.bf16.mxu0 %v9146_v11  ;;  %v9287_v44 = vsel %vm8829_vm5, %v6537_v19, %v3122_v21  ;;  %v2466_v11 = vsel %vm8471_vm2, %v2461_v14, %v2465_v15  ;;  %v2489_v41 = vrot.slane %v2487_v0, 5  ;;  %v2493_v49 = vrot.slane %v2491_v1, 4 }
  0xe9   : > { %v2476_v39 = vsel %vm8471_vm2, %v2471_v56, %v2475_v59  ;;  %v6553_v48 = vcombine.low %v9287_v44, %v9296_v51  ;;  %v2499_v60 = vrot.slane %v2497_v27, 5  ;;  %v3129_v26 = vrot.slane %v6465_v18, 5  ;;  %v6470_v18 = vld [vmem:[%s8426_s8 + $0x78] sm:$0xf]  ;;  %v6471_v56 = vld [vmem:[%s8426_s8 + $0x7c] sm:$0xf] }
  0xea   : > { %v3132_v20 = vrot.slane %v9273_v45, 5  ;;  %v2502_v24 = vshrl.u32 %v6467_v33, 16  ;;  %v2494_v52 = vor.u32 %v2493_v49, %v2489_v41  ;;  %v2505_v10 = vshll.u32 %v6467_v33, 16  ;;  %v6476_v44 = vld [vmem:[%s8426_s8 + $0x90] sm:$0xf] }
  0xeb   : > { %v2511_v12 = vshll.u32 %v6468_v42, 16  ;;  %v2515_v15 = vshrl.u32 %v6468_v42, 16  ;;  %v3131_v29 = vrot.slane %v3129_v26, 4  ;;  %v6539_v14 = vrot.slane %v6523_v50, 9 }
  0xec   : > { %v2504_v21 = vrot.slane %v2502_v24, 4  ;;  %v2507_v45 = vrot.slane %v2505_v10, 5  ;;  %v3139_v0 = vrot.slane %v9319_v3, 5  ;;  %v2526_v58 = vshrl.u32 %v6470_v18, 16  ;;  %v9385_v24 = vld [vmem:[%s8426_s8 + $0x88] sm:$0xf] }
  0xed   : > { %7609 = vmatmul.mubr.bf16.vlgmr.msra.gmra.mxu1 %v6548_v32  ;;  %v2483_v32 = vrot.slane %v2481_v8, 5  ;;  %v2513_v9 = vrot.slane %v2511_v12, 5  ;;  %v2517_v59 = vrot.slane %v2515_v15, 4  ;;  %v2529_v36 = vshll.u32 %v6470_v18, 16  ;;  %v9391_v15 = vld [vmem:[%s8426_s8 + $0x8c] sm:$0x1] }
  0xee   : > { %7689 = vmatpush3.bf16.msra.mxu1 %v9125_v2  ;;  %7612 = vmatprep.mubr.bf16.mxu1 %v6549_v5  ;;  %v9312_v2 = vcombine.low %v2466_v11, %v2476_v39  ;;  %v6538_v5 = vrot.slane %v6522_v31, 9  ;;  %v9340_v31 = vsel %vm8829_vm5, %v3131_v29, %v3132_v20  ;;  %v2508_v57 = vor.u32 %v2507_v45, %v2504_v21  ;;  %v6525_v45 = vld [vmem:[%s8426_s8 + $0x84] sm:$0xe] }
  0xef   : > { %7690 = vmatprep.subr.bf16.mxu1 %v7981_v22  ;;  %v2484_v47 = vor.u32 %v2483_v32, %v2480_v7  ;;  %7561 = vmatmul.mubr.bf16.vlgmr.msra.gmra.mxu0 %v9167_v34  ;;  %v2495_v34 = vrot.slane %v2494_v52, 4  ;;  %v2518_v23 = vor.u32 %v2517_v59, %v2513_v9  ;;  %v6472_v7 = vld [vmem:[%s8426_s8 + $0x80] sm:$0x1]  ;;  %v2535_v33 = vshll.u32 %v6471_v56, 16  ;;  %v6524_v32 = vld [vmem:[%s8426_s8 + $0x78] sm:$0xe] }
  0xf0   : > { %v9328_v6 = vsel %vm8829_vm5, %v6538_v5, %v3129_v26  ;;  %7641 = vmatpush3.bf16.msra.mxu0 %v9142_v61  ;;  %7564 = vmatprep.mubr.bf16.mxu0 %v9195_v62  ;;  %v2509_v1 = vrot.slane %v2508_v57, 4  ;;  %v2539_v39 = vshrl.u32 %v6471_v56, 16  ;;  %v2528_v49 = vrot.slane %v2526_v58, 4  ;;  %v6473_v5 = vld [vmem:[%s8426_s8 + $0x84] sm:$0xf] }
  0xf1   : > { %v2485_v19 = vrot.slane %v2484_v47, 4  ;;  %7642 = vmatprep.subr.bf16.mxu0 %v7980_v63  ;;  %v2500_v61 = vsel %vm8471_vm2, %v2495_v34, %v2499_v60  ;;  %v6554_v62 = vcombine.low %v9328_v6, %v9340_v31  ;;  %v2519_v11 = vrot.slane %v2518_v23, 4  ;;  %v6477_v23 = vld [vmem:[%s8426_s8 + $0x94] sm:$0xf] }
  0xf2   : > { %7691 = vmatpush3.bf16.msra.mxu1 %v7981_v22  ;;  %v2521_v22 = vshll.u32 %v9319_v3, 16  ;;  %v2531_v60 = vrot.slane %v2529_v36, 5  ;;  %v2537_v20 = vrot.slane %v2535_v33, 5  ;;  %v2541_v3 = vrot.slane %v2539_v39, 4  ;;  %v6526_v33 = vld [vmem:[%s8426_s8 + $0x90] sm:$0xe] }
  0xf3   : > { %7692 = vmatprep.subr.bf16.mxu1 %v7983_v16  ;;  %v2490_v30 = vsel %vm8471_vm2, %v2485_v19, %v2489_v41  ;;  %v7987_v41 = vld [vmem:[%s10743_s1 + $0x1d8] sm:$0xff]   ;;  %v6540_v12 = vrot.slane %v6524_v32, 9  ;;  %v3143_v19 = vrot.slane %v6471_v56, 5  ;;  %v3146_v29 = vrot.slane %v6472_v7, 5  ;;  %v7988_v56 = vld [vmem:[%s10743_s1 + $0x190] sm:$0xff]  }
  0xf4   : > { %v9354_v8 = vcombine.low %v2490_v30, %v2500_v61  ;;  %v2523_v55 = vrot.slane %v2521_v22, 5  ;;  %7643 = vmatpush3.bf16.msra.mxu0 %v7980_v63  ;;  %v2532_v10 = vor.u32 %v2531_v60, %v2528_v49  ;;  %v2542_v50 = vor.u32 %v2541_v3, %v2537_v20 }
  0xf5   : > { %7613 = vmatmul.mubr.bf16.gmra.mxu1 %v6550_v54  ;;  %v3136_v54 = vrot.slane %v6468_v42, 5  ;;  %7644 = vmatprep.subr.bf16.mxu0 %v7982_v46  ;;  %v2514_v42 = vsel %vm8471_vm2, %v2509_v1, %v2513_v9  ;;  %v2553_v18 = vshll.u32 %v6473_v5, 16  ;;  %v2559_v34 = vshll.u32 %v9385_v24, 16 }
  0xf6   : > { %7616 = vmatprep.mubr.bf16.mxu1 %v6551_v38  ;;  %7693 = vmatpush3.bf16.msra.mxu1 %v7983_v16  ;;  %v2524_v63 = vsel %vm8471_vm2, %v2519_v11, %v2523_v55  ;;  %v7989_v16 = vld [vmem:[%s10743_s1 + $0x1d0] sm:$0xff]   ;;  %v2543_v9 = vrot.slane %v2542_v50, 4  ;;  %v9406_v59 = vsel %vm8829_vm5, %v6540_v12, %v3143_v19  ;;  %v3145_v30 = vrot.slane %v3143_v19, 4  ;;  %v9431_v11 = vld [vmem:[%s8426_s8 + $0x98] sm:$0x1] }
  0xf7   : > { %7694 = vmatprep.subr.bf16.mxu1 %v7985_v28  ;;  %v9363_v38 = vsel %vm8829_vm5, %v6539_v14, %v3136_v54  ;;  %v3138_v27 = vrot.slane %v3136_v54, 4  ;;  %7565 = vmatmul.mubr.bf16.gmra.mxu0 %v9215_v25  ;;  %v9378_v47 = vcombine.low %v2514_v42, %v2524_v63  ;;  %v2545_v25 = vshll.u32 %v6472_v7, 16 }
  0xf8   : > { %7568 = vmatprep.mubr.bf16.mxu0 %v9247_v53  ;;  %7645 = vmatpush3.bf16.msra.mxu0 %v7982_v46  ;;  %v2550_v53 = vshrl.u32 %v6473_v5, 16  ;;  %v2533_v46 = vrot.slane %v2532_v10, 4  ;;  %v2561_v22 = vrot.slane %v2559_v34, 5  ;;  %v2563_v14 = vshrl.u32 %v9385_v24, 16 }
  0xf9   : > { %v9382_v26 = vsel %vm8829_vm5, %v3138_v27, %v3139_v0  ;;  %7646 = vmatprep.subr.bf16.mxu0 %v7984_v43  ;;  %v2547_v21 = vrot.slane %v2545_v25, 5  ;;  %v2569_v61 = vshll.u32 %v9391_v15, 16  ;;  %v6541_v57 = vrot.slane %v6525_v45, 9  ;;  %v9455_v25 = vld [vmem:[%s8426_s8 + $0xa0] sm:$0xf] }
  0xfa   : > { %7695 = vmatpush3.bf16.msra.mxu1 %v7985_v28  ;;  %v6555_v52 = vcombine.low %v9363_v38, %v9382_v26  ;;  %v7986_v28 = vld [vmem:[%s10743_s1 + $0x198] sm:$0xff]   ;;  %v2552_v13 = vrot.slane %v2550_v53, 4  ;;  %v2538_v17 = vsel %vm8471_vm2, %v2533_v46, %v2537_v20  ;;  %v2565_v1 = vrot.slane %v2563_v14, 4  ;;  %v6481_v53 = vld [vmem:[%s8426_s8 + $0xa4] sm:$0x1] }
  0xfb   : > { %7696 = vmatprep.subr.bf16.mxu1 %v7987_v41  ;;  %v2548_v51 = vsel %vm8471_vm2, %v2543_v9, %v2547_v21  ;;  %v2571_v7 = vrot.slane %v2569_v61, 5  ;;  %v3150_v58 = vrot.slane %v9385_v24, 5  ;;  %v3153_v36 = vrot.slane %v9391_v15, 5  ;;  %v7992_v46 = vld [vmem:[%s10743_s1 + $0x180] sm:$0xff]   ;;  %v9476_v21 = vld [vmem:[%s10715_s3 + $0x38] sm:$0xff]  }
  0xfc   : > { %7647 = vmatpush3.bf16.msra.mxu0 %v7984_v43  ;;  %v7991_v43 = vld [vmem:[%s10743_s1 + $0x1c8] sm:$0xff]   ;;  %v9426_v55 = vcombine.low %v2538_v17, %v2548_v51  ;;  %v2574_v27 = vshrl.u32 %v6476_v44, 16  ;;  %v2566_v32 = vor.u32 %v2565_v1, %v2561_v22  ;;  %v2583_v42 = vshll.u32 %v6477_v23, 16 }
  0xfd   : > { %7617 = vmatmul.mubr.bf16.gmra.mxu1 %v6552_v37  ;;  %v2555_v37 = vrot.slane %v2553_v18, 5  ;;  %7648 = vmatprep.subr.bf16.mxu0 %v7986_v28  ;;  %v9443_v63 = vsel %vm8829_vm5, %v6541_v57, %v3150_v58  ;;  %v3152_v49 = vrot.slane %v3150_v58, 4  ;;  %v2587_v5 = vshrl.u32 %v6477_v23, 16 }
  0xfe   : > { %7620 = vmatprep.mubr.bf16.mxu1 %v6553_v48  ;;  %7697 = vmatpush3.bf16.msra.mxu1 %v7987_v41  ;;  %v9416_v48 = vsel %vm8829_vm5, %v3145_v30, %v3146_v29  ;;  %v2577_v41 = vshll.u32 %v6476_v44, 16  ;;  %v2576_v60 = vrot.slane %v2574_v27, 4  ;;  %v2567_v3 = vrot.slane %v2566_v32, 4  ;;  %v6527_v30 = vld [vmem:[%s8426_s8 + $0x9c] sm:$0xe] }
  0xff   : > { %7698 = vmatprep.subr.bf16.mxu1 %v7989_v16  ;;  %v6556_v54 = vcombine.low %v9406_v59, %v9416_v48  ;;  %v2556_v0 = vor.u32 %v2555_v37, %v2552_v13  ;;  %7569 = vmatmul.mubr.bf16.gmra.mxu0 %v9278_v35  ;;  %v7993_v35 = vld [vmem:[%s10743_s1 + $0x1c0] sm:$0xff]   ;;  %v2585_v10 = vrot.slane %v2583_v42, 5  ;;  %v3154_v12 = vsel %vm8829_vm5, %v3152_v49, %v3153_v36  ;;  %v6484_v36 = vld [vmem:[%s8426_s8 + $0xb0] sm:$0x1]  ;;  %v6528_v27 = vld [vmem:[%s8426_s8 + $0xa8] sm:$0xe] }
 0x100   : > { %7572 = vmatprep.mubr.bf16.mxu0 %v9312_v2  ;;  %7649 = vmatpush3.bf16.msra.mxu0 %v7986_v28  ;;  %v7990_v2 = vld [vmem:[%s10743_s1 + $0x188] sm:$0xff]   ;;  %v2579_v24 = vrot.slane %v2577_v41, 5  ;;  %v2589_v15 = vrot.slane %v2587_v5, 4  ;;  %v2593_v6 = vshll.u32 %v9431_v11, 16  ;;  %v6542_v31 = vrot.slane %v6526_v33, 9 }
 0x101   : > { %v2557_v39 = vrot.slane %v2556_v0, 4  ;;  %7650 = vmatprep.subr.bf16.mxu0 %v7988_v56  ;;  %v6557_v50 = vcombine.low %v9443_v63, %v3154_v12  ;;  %v3157_v29 = vrot.slane %v6477_v23, 5  ;;  %v3160_v28 = vrot.slane %v9431_v11, 5  ;;  %v9499_v0 = vld [vmem:[%s10743_s1 + $0x238] sm:$0xff]   ;;  %v6485_v12 = vld [vmem:[%s8426_s8 + $0xb4] sm:$0xf] }
 0x102   : > { %7699 = vmatpush3.bf16.msra.mxu1 %v7989_v16  ;;  %v6479_v16 = vld [vmem:[%s8426_s8 + $0x9c] sm:$0xf]  ;;  %v2580_v19 = vor.u32 %v2579_v24, %v2576_v60  ;;  %v2590_v26 = vor.u32 %v2589_v15, %v2585_v10  ;;  %v2607_v37 = vshll.u32 %v9455_v25, 16  ;;  %v2617_v61 = vshll.u32 %v6481_v53, 16 }
 0x103   : > { %7700 = vmatprep.subr.bf16.mxu1 %v7991_v43  ;;  %v2562_v20 = vsel %vm8471_vm2, %v2557_v39, %v2561_v22  ;;  %v9480_v34 = vsel %vm8829_vm5, %v6542_v31, %v3157_v29  ;;  %v3159_v45 = vrot.slane %v3157_v29, 4  ;;  %v2598_v9 = vshrl.u32 %v6479_v16, 16 }
 0x104   : > { %7651 = vmatpush3.bf16.msra.mxu0 %v7988_v56  ;;  %v2581_v18 = vrot.slane %v2580_v19, 4  ;;  %v2591_v13 = vrot.slane %v2590_v26, 4  ;;  %v2601_v17 = vshll.u32 %v6479_v16, 16  ;;  %v2611_v22 = vshrl.u32 %v9455_v25, 16 }
 0x105   : > { %7621 = vmatmul.mubr.bf16.gmra.mxu1 %v6554_v62  ;;  %v2572_v62 = vsel %vm8471_vm2, %v2567_v3, %v2571_v7  ;;  %7652 = vmatprep.subr.bf16.mxu0 %v7990_v2  ;;  %v3161_v44 = vsel %vm8829_vm5, %v3159_v45, %v3160_v28  ;;  %v2600_v51 = vrot.slane %v2598_v9, 4  ;;  %v2619_v7 = vrot.slane %v2617_v61, 5 }
 0x106   : > { %7624 = vmatprep.mubr.bf16.mxu1 %v6555_v52  ;;  %7701 = vmatpush3.bf16.msra.mxu1 %v7991_v43  ;;  %v9466_v38 = vcombine.low %v2562_v20, %v2572_v62  ;;  %v2595_v52 = vrot.slane %v2593_v6, 5  ;;  %v2586_v14 = vsel %vm8471_vm2, %v2581_v18, %v2585_v10  ;;  %v6558_v23 = vcombine.low %v9480_v34, %v3161_v44  ;;  %v6529_v18 = vld [vmem:[%s8426_s8 + $0xb4] sm:$0xe]  ;;  %v6489_v44 = vld [vmem:[%s8426_s8 + $0xc4] sm:$0xf] }
 0x107   : > { %7702 = vmatprep.subr.bf16.mxu1 %v7993_v35  ;;  %7573 = vmatmul.mubr.bf16.gmra.mxu0 %v9354_v8  ;;  %v6482_v8 = vld [vmem:[%s8426_s8 + $0xa8] sm:$0xf]  ;;  %v2603_v56 = vrot.slane %v2601_v17, 5  ;;  %v2609_v43 = vrot.slane %v2607_v37, 5  ;;  %v2613_v11 = vrot.slane %v2611_v22, 4  ;;  %v6543_v58 = vrot.slane %v6527_v30, 9 }
 0x108   : > { %7576 = vmatprep.mubr.bf16.mxu0 %v9378_v47  ;;  %7653 = vmatpush3.bf16.msra.mxu0 %v7990_v2  ;;  %v2596_v57 = vsel %vm8471_vm2, %v2591_v13, %v2595_v52  ;;  %v6483_v47 = vld [vmem:[%s8426_s8 + $0xac] sm:$0xf]  ;;  %v3164_v39 = vrot.slane %v9455_v25, 5  ;;  %v3167_v32 = vrot.slane %v6481_v53, 5  ;;  %v2622_v41 = vshrl.u32 %v6482_v8, 16 }
 0x109   : > { %7654 = vmatprep.subr.bf16.mxu0 %v7992_v46  ;;  %v9505_v1 = vcombine.low %v2586_v14, %v2596_v57  ;;  %v2604_v33 = vor.u32 %v2603_v56, %v2600_v51  ;;  %v2614_v42 = vor.u32 %v2613_v11, %v2609_v43  ;;  %v2631_v63 = vshll.u32 %v6483_v47, 16  ;;  %v6487_v52 = vld [vmem:[%s8426_s8 + $0xbc] sm:$0x1]  ;;  %v6488_v13 = vld [vmem:[%s8426_s8 + $0xc0] sm:$0xf] }
 0x10a   : > { %7703 = vmatpush3.bf16.msra.mxu1 %v7993_v35  ;;  %v2625_v35 = vshll.u32 %v6482_v8, 16  ;;  %v2635_v49 = vshrl.u32 %v6483_v47, 16  ;;  %v3165_v48 = vsel %vm8829_vm5, %v6543_v58, %v3164_v39  ;;  %v2624_v60 = vrot.slane %v2622_v41, 4  ;;  %v6490_v11 = vld [vmem:[%s8426_s8 + $0xc8] sm:$0x1] }
 0x10b   : > { %7784 = vmatprep.subr.bf16.mxu1 %v9476_v21  ;;  %v2605_v59 = vrot.slane %v2604_v33, 4  ;;  %v2615_v5 = vrot.slane %v2614_v42, 4  ;;  %v2633_v2 = vrot.slane %v2631_v63, 5  ;;  %v2641_v10 = vshll.u32 %v6484_v36, 16  ;;  %v6530_v42 = vld [vmem:[%s8426_s8 + $0xc0] sm:$0xe] }
 0x10c   : > { %7655 = vmatpush3.bf16.msra.mxu0 %v7992_v46  ;;  %v2627_v16 = vrot.slane %v2625_v35, 5  ;;  %v2637_v20 = vrot.slane %v2635_v49, 4  ;;  %v6544_v25 = vrot.slane %v6528_v27, 9  ;;  %v3171_v29 = vrot.slane %v6483_v47, 5 }
 0x10d   : > { %7625 = vmatmul.mubr.bf16.gmra.mxu1 %v6556_v54  ;;  %v3166_v54 = vrot.slane %v3164_v39, 4  ;;  %7736 = vmatprep.subr.bf16.mxu0 %v9499_v0  ;;  %v2610_v3 = vsel %vm8471_vm2, %v2605_v59, %v2609_v43  ;;  %v2620_v15 = vsel %vm8471_vm2, %v2615_v5, %v2619_v7  ;;  %v2643_v19 = vrot.slane %v2641_v10, 5 }
 0x10e   : > { %7628 = vmatprep.mubr.bf16.mxu1 %v6557_v50  ;;  %v2628_v31 = vor.u32 %v2627_v16, %v2624_v60  ;;  %v2638_v62 = vor.u32 %v2637_v20, %v2633_v2  ;;  %v6503_v50 = vcombine.low %v2610_v3, %v2620_v15  ;;  %v3174_v26 = vrot.slane %v6484_v36, 5  ;;  %v6628_v16 = vld [vmem:[%s8426_s8 + $0x1c] sm:$0xf] }
 0x10f   : > { %7577 = vmatmul.mubr.bf16.gmra.mxu0 %v9426_v55  ;;  %v3168_v24 = vsel %vm8829_vm5, %v3166_v54, %v3167_v32  ;;  %v6486_v55 = vld [vmem:[%s8426_s8 + $0xb8] sm:$0xf]  ;;  %v2646_v46 = vshrl.u32 %v6485_v12, 16  ;;  %v3172_v34 = vsel %vm8829_vm5, %v6544_v25, %v3171_v29  ;;  %v3173_v45 = vrot.slane %v3171_v29, 4 }
 0x110   : > { %7580 = vmatprep.mubr.bf16.mxu0 %v9466_v38  ;;  %v6559_v6 = vcombine.low %v3165_v48, %v3168_v24  ;;  %v2629_v28 = vrot.slane %v2628_v31, 4  ;;  %v2639_v53 = vrot.slane %v2638_v62, 4  ;;  %v2649_v38 = vshll.u32 %v6485_v12, 16  ;;  %v6627_v48 = vld [vmem:[%s8426_s8 + $0x18] sm:$0xf] }
 0x111   : > { %v2655_v9 = vshll.u32 %v6486_v55, 16  ;;  %v2659_v30 = vshrl.u32 %v6486_v55, 16  ;;  %v2648_v22 = vrot.slane %v2646_v46, 4  ;;  %v3175_v61 = vsel %vm8829_vm5, %v3173_v45, %v3174_v26 }
 0x112   : > { %v2634_v17 = vsel %vm8471_vm2, %v2629_v28, %v2633_v2  ;;  %v2644_v37 = vsel %vm8471_vm2, %v2639_v53, %v2643_v19  ;;  %v2651_v14 = vrot.slane %v2649_v38, 5  ;;  %v2665_v43 = vshll.u32 %v6487_v52, 16  ;;  %v6630_v19 = vld [vmem:[%s8426_s8 + $0x24] sm:$0xf] }
 0x113   : > { %v6504_v51 = vcombine.low %v2634_v17, %v2644_v37  ;;  %v2657_v8 = vrot.slane %v2655_v9, 5  ;;  %v2661_v57 = vrot.slane %v2659_v30, 4  ;;  %v6545_v47 = vrot.slane %v6529_v18, 9  ;;  %v9558_v17 = vld [vmem:[%s8426_s8 + $0x2c] sm:$0x1] }
 0x114   : > { %v2652_v56 = vor.u32 %v2651_v14, %v2648_v22  ;;  %v3178_v58 = vrot.slane %v6486_v55, 5  ;;  %v3181_v36 = vrot.slane %v6487_v52, 5  ;;  %v2670_v27 = vshrl.u32 %v6488_v13, 16 }
 0x115   : > { %7629 = vmatmul.mubr.bf16.gmra.mxu1 %v6558_v23  ;;  %v6560_v23 = vcombine.low %v3172_v34, %v3175_v61  ;;  %v2662_v7 = vor.u32 %v2661_v57, %v2657_v8  ;;  %v2667_v39 = vrot.slane %v2665_v43, 5  ;;  %v2673_v32 = vshll.u32 %v6488_v13, 16  ;;  %v9553_v34 = vld [vmem:[%s8426_s8 + $0x28] sm:$0xf] }
 0x116   : > { %7632 = vmatprep.mubr.bf16.mxu1 %v6559_v6  ;;  %v2653_v33 = vrot.slane %v2652_v56, 4  ;;  %v2679_v41 = vshll.u32 %v6489_v44, 16  ;;  %v3179_v63 = vsel %vm8829_vm5, %v6545_v47, %v3178_v58  ;;  %v3180_v49 = vrot.slane %v3178_v58, 4  ;;  %v6629_v6 = vld [vmem:[%s8426_s8 + $0x20] sm:$0x1]  ;;  %v7994_v56 = vld [vmem:[%s8426_s8 + $0x18] sm:$0xff]  }
 0x117   : > { %7581 = vmatmul.mubr.bf16.gmra.mxu0 %v9505_v1  ;;  %v2663_v35 = vrot.slane %v2662_v7, 4  ;;  %v2672_v59 = vrot.slane %v2670_v27, 4  ;;  %v2675_v54 = vrot.slane %v2673_v32, 5  ;;  %v2683_v5 = vshrl.u32 %v6489_v44, 16 }
 0x118   : > { %7584 = vmatprep.mubr.bf16.mxu0 %v6503_v50  ;;  %v2658_v1 = vsel %vm8471_vm2, %v2653_v33, %v2657_v8  ;;  %v2681_v60 = vrot.slane %v2679_v41, 5  ;;  %v3182_v20 = vsel %vm8829_vm5, %v3180_v49, %v3181_v36  ;;  %v2689_v3 = vshll.u32 %v6490_v11, 16  ;;  %v6633_v33 = vld [vmem:[%s8426_s8 + $0x30] sm:$0xf]  ;;  %v6634_v41 = vld [vmem:[%s8426_s8 + $0x34] sm:$0xf] }
 0x119   : > { %v2668_v2 = vsel %vm8471_vm2, %v2663_v35, %v2667_v39  ;;  %v6546_v24 = vrot.slane %v6530_v42, 9  ;;  %v6561_v25 = vcombine.low %v3179_v63, %v3182_v20  ;;  %v2676_v12 = vor.u32 %v2675_v54, %v2672_v59  ;;  %v6635_v59 = vld [vmem:[%s8426_s8 + $0x38] sm:$0x1] }
 0x11a   : > { %v6505_v10 = vcombine.low %v2658_v1, %v2668_v2  ;;  %v2685_v15 = vrot.slane %v2683_v5, 4  ;;  %v2691_v31 = vrot.slane %v2689_v3, 5  ;;  %v3185_v62 = vrot.slane %v6489_v44, 5  ;;  %v6636_v5 = vld [vmem:[%s8426_s8 + $0x3c] sm:$0xf] }
 0x11b   : > { %v3188_v55 = vrot.slane %v6490_v11, 5  ;;  %v3946_v50 = vshrl.u32 %v6627_v48, 16  ;;  %v2677_v29 = vrot.slane %v2676_v12, 4  ;;  %v3949_v52 = vshll.u32 %v6627_v48, 16 }
 0x11c   : > { %v2686_v26 = vor.u32 %v2685_v15, %v2681_v60  ;;  %v3955_v28 = vshll.u32 %v6628_v16, 16  ;;  %v3186_v53 = vsel %vm8829_vm5, %v6546_v24, %v3185_v62  ;;  %v3187_v46 = vrot.slane %v3185_v62, 4  ;;  %v6637_v24 = vld [vmem:[%s8426_s8 + $0x40] sm:$0xf] }
 0x11d   : > { %7633 = vmatmul.mubr.bf16.gmra.mxu1 %v6560_v23  ;;  %v3948_v38 = vrot.slane %v3946_v50, 4  ;;  %v3959_v18 = vshrl.u32 %v6628_v16, 16  ;;  %v2682_v45 = vsel %vm8471_vm2, %v2677_v29, %v2681_v60  ;;  %v3951_v30 = vrot.slane %v3949_v52, 5 }
 0x11e   : > { %7636 = vmatprep.mubr.bf16.mxu1 %v6561_v25  ;;  %v2687_v9 = vrot.slane %v2686_v26, 4  ;;  %v3957_v13 = vrot.slane %v3955_v28, 5  ;;  %v3189_v37 = vsel %vm8829_vm5, %v3187_v46, %v3188_v55  ;;  %v3965_v14 = vshll.u32 %v6629_v6, 16  ;;  %v7995_v55 = vld [vmem:[%s8426_s8 + $0x24] sm:$0xff]  }
 0x11f   : > { %7585 = vmatmul.mubr.bf16.gmra.mxu0 %v6504_v51  ;;  %v3961_v22 = vrot.slane %v3959_v18, 4  ;;  %v3970_v44 = vshrl.u32 %v6630_v19, 16  ;;  %v6562_v61 = vcombine.low %v3186_v53, %v3189_v37  ;;  %v3952_v8 = vor.u32 %v3951_v30, %v3948_v38 }
 0x120   : > { %7588 = vmatprep.mubr.bf16.mxu0 %v6505_v10  ;;  %v2692_v51 = vsel %vm8471_vm2, %v2687_v9, %v2691_v31  ;;  %v3973_v57 = vshll.u32 %v6630_v19, 16  ;;  %v3967_v47 = vrot.slane %v3965_v14, 5  ;;  %v3979_v36 = vshll.u32 %v9553_v34, 16  ;;  %v9578_v31 = vld [vmem:[%s8426_s8 + $0x44] sm:$0x1]  ;;  %v7998_v9 = vld [vmem:[%s8426_s8 + $0x30] sm:$0xff]  }
 0x121   : > { %v6506_v23 = vcombine.low %v2682_v45, %v2692_v51  ;;  %v3962_v43 = vor.u32 %v3961_v22, %v3957_v13  ;;  %v3972_v11 = vrot.slane %v3970_v44, 4  ;;  %v3953_v7 = vrot.slane %v3952_v8, 4  ;;  %v8000_v8 = vld [vmem:[%s10743_s1 + $0x230] sm:$0xff]  }
 0x122   : > { %v3975_v58 = vrot.slane %v3973_v57, 5  ;;  %v3983_v27 = vshrl.u32 %v9553_v34, 16  ;;  %v3989_v32 = vshll.u32 %v9558_v17, 16  ;;  %v3981_v63 = vrot.slane %v3979_v36, 5  ;;  %v8001_v57 = vld [vmem:[%s10715_s3 + $0x30] sm:$0xff]  }
 0x123   : > { %v3963_v39 = vrot.slane %v3962_v43, 4  ;;  %v3958_v42 = vsel %vm8471_vm2, %v3953_v7, %v3957_v13  ;;  %v3994_v54 = vshrl.u32 %v6633_v33, 16  ;;  %v3997_v60 = vshll.u32 %v6633_v33, 16 }
 0x124   : > { %v3976_v35 = vor.u32 %v3975_v58, %v3972_v11  ;;  %v3985_v49 = vrot.slane %v3983_v27, 4  ;;  %v3991_v1 = vrot.slane %v3989_v32, 5  ;;  %v4003_v3 = vshll.u32 %v6634_v41, 16  ;;  %v6640_v58 = vld [vmem:[%s8426_s8 + $0x4c] sm:$0xf] }
 0x125   : > { %7637 = vmatmul.mubr.bf16.gmra.mxu1 %v6562_v61  ;;  %v3968_v48 = vsel %vm8471_vm2, %v3963_v39, %v3967_v47  ;;  %v3996_v25 = vrot.slane %v3994_v54, 4  ;;  %v3999_v12 = vrot.slane %v3997_v60, 5  ;;  %v4007_v15 = vshrl.u32 %v6634_v41, 16  ;;  %v9609_v41 = vld [vmem:[%s10743_s1 + $0x228] sm:$0xff]   ;;  %v7999_v60 = vld [vmem:[%s8426_s8 + $0x3c] sm:$0xff]  }
 0x126   : > { %v6675_v16 = vcombine.low %v3958_v42, %v3968_v48  ;;  %v3977_v2 = vrot.slane %v3976_v35, 4  ;;  %v3986_v20 = vor.u32 %v3985_v49, %v3981_v63  ;;  %v4013_v6 = vshll.u32 %v6635_v59, 16  ;;  %v6641_v59 = vld [vmem:[%s8426_s8 + $0x50] sm:$0x1] }
 0x127   : > { %7589 = vmatmul.mubr.bf16.gmra.mxu0 %v6506_v23  ;;  %v4005_v29 = vrot.slane %v4003_v3, 5  ;;  %v4018_v26 = vshrl.u32 %v6636_v5, 16  ;;  %v4000_v53 = vor.u32 %v3999_v12, %v3996_v25  ;;  %v4009_v46 = vrot.slane %v4007_v15, 4  ;;  %v6639_v23 = vld [vmem:[%s8426_s8 + $0x48] sm:$0xf] }
 0x128   : > { %7656 = vmatprep.mubr.bf16.mxu0 %v7994_v56  ;;  %7704 = vmatprep.mubr.bf16.mxu1 %v6675_v16  ;;  %v3982_v50 = vsel %vm8471_vm2, %v3977_v2, %v3981_v63  ;;  %v3987_v19 = vrot.slane %v3986_v20, 4  ;;  %v4015_v38 = vrot.slane %v4013_v6, 5  ;;  %v4021_v13 = vshll.u32 %v6636_v5, 16  ;;  %v6642_v2 = vld [vmem:[%s8426_s8 + $0x54] sm:$0xf] }
 0x129   : > { %v4020_v30 = vrot.slane %v4018_v26, 4  ;;  %v4027_v37 = vshll.u32 %v6637_v24, 16  ;;  %v4001_v51 = vrot.slane %v4000_v53, 4  ;;  %v4010_v61 = vor.u32 %v4009_v46, %v4005_v29  ;;  %v9626_v20 = vld [vmem:[%s8426_s8 + $0x58] sm:$0xf] }
 0x12a   : > { %v3992_v18 = vsel %vm8471_vm2, %v3987_v19, %v3991_v1  ;;  %v4023_v43 = vrot.slane %v4021_v13, 5  ;;  %v4031_v11 = vshrl.u32 %v6637_v24, 16  ;;  %v4037_v7 = vshll.u32 %v9578_v31, 16  ;;  %v9617_v1 = vld [vmem:[%s10715_s3 + $0x28] sm:$0xff]  }
 0x12b   : > { %v6676_v22 = vcombine.low %v3982_v50, %v3992_v18  ;;  %v9597_v47 = vrot.slane %v4027_v37, 5  ;;  %v4006_v39 = vsel %vm8471_vm2, %v4001_v51, %v4005_v29  ;;  %v4011_v32 = vrot.slane %v4010_v61, 4  ;;  %v9635_v29 = vld [vmem:[%s8426_s8 + $0x5c] sm:$0x1]  ;;  %v8008_v18 = vld [vmem:[%s10743_s1 + $0x220] sm:$0xff]  }
 0x12c   : > { %v7370_v10 = vpop.f32.mrf.mxu0  ;;  %v4024_v35 = vor.u32 %v4023_v43, %v4020_v30  ;;  %v4033_v63 = vrot.slane %v4031_v11, 4  ;;  %v4039_v49 = vrot.slane %v4037_v7, 5  ;;  %v4042_v48 = vshrl.u32 %v6639_v23, 16  ;;  %v6645_v7 = vld [vmem:[%s8426_s8 + $0x60] sm:$0xf] }
 0x12d   : > { %v7418_v62 = vpop.f32.mrf.mxu1  ;;  %7705 = vmatmul.mubr.bf16.vlgmr.msra.gmra.mxu1 %v6676_v22  ;;  %v4045_v5 = vshll.u32 %v6639_v23, 16  ;;  %v4051_v16 = vshll.u32 %v6640_v58, 16  ;;  %v4055_v19 = vshrl.u32 %v6640_v58, 16  ;;  %v4061_v46 = vshll.u32 %v6641_v59, 16  ;;  %v9658_v58 = vld [vmem:[%s8426_s8 + $0x64] sm:$0xf] }
 0x12e   : > { %v9583_v52 = vadd.f32 %v7418_v62, %v7370_v10  ;;  %v959_v28 = vpop.f32.mrf.mxu0  ;;  %7785 = vmatpush3.bf16.msra.mxu1 %v9476_v21  ;;  %v4025_v10 = vrot.slane %v4024_v35, 4  ;;  %v4034_v25 = vor.u32 %v4033_v63, %v9597_v47  ;;  %v4044_v12 = vrot.slane %v4042_v48, 4  ;;  %v8002_v62 = vld [vmem:[%s8426_s8 + $0x48] sm:$0xff]  }
 0x12f   : > { %v1264_v45 = vpop.f32.mrf.mxu1  ;;  %7657 = vmatmul.mubr.bf16.vlgmr.msra.gmra.mxu0 %v7995_v55  ;;  %7786 = vmatprep.subr.bf16.mxu1 %v8001_v57  ;;  %v4047_v55 = vrot.slane %v4045_v5, 5  ;;  %v9632_v50 = vrot.slane %v4051_v16, 5  ;;  %v4057_v13 = vrot.slane %v4055_v19, 4  ;;  %v4069_v37 = vshll.u32 %v6642_v2, 16  ;;  %v9678_v5 = vld [vmem:[%s8426_s8 + $0x68] sm:$0x1] }
 0x130   : > { %v9588_v14 = vadd.f32 %v1264_v45, %v959_v28  ;;  %v7371_v44 = vpop.f32.mrf.mxu0  ;;  %7737 = vmatpush3.bf16.msra.mxu0 %v9499_v0  ;;  %7660 = vmatprep.mubr.bf16.mxu0 %v7998_v9  ;;  %v4016_v0 = vsel %vm8471_vm2, %v4011_v32, %v4015_v38  ;;  %v4030_v26 = vsel %vm8471_vm2, %v4025_v10, %v9597_v47  ;;  %v4035_v28 = vrot.slane %v4034_v25, 4  ;;  %v6648_v10 = vld [vmem:[%s8426_s8 + $0x6c] sm:$0xf]  ;;  %v8013_v25 = vld [vmem:[%s10715_s3 + $0x18] sm:$0xff]   ;;  %v9692_v19 = vld [vmem:[%s8426_s8 + $0x70] sm:$0xf] }
 0x131   : > { %v7419_v56 = vpop.f32.mrf.mxu1  ;;  %7738 = vmatprep.subr.bf16.mxu0 %v8000_v8  ;;  %v6677_v3 = vcombine.low %v4006_v39, %v4016_v0  ;;  %v4066_v38 = vshrl.u32 %v6642_v2, 16  ;;  %v4048_v30 = vor.u32 %v4047_v55, %v4044_v12  ;;  %v4063_v51 = vrot.slane %v4061_v46, 5 }
 0x132   : > { %v9602_v27 = vadd.f32 %v7419_v56, %v7371_v44  ;;  %v962_v33 = vpop.f32.mrf.mxu0  ;;  %7787 = vmatpush3.bf16.msra.mxu1 %v8001_v57  ;;  %v4040_v22 = vsel %vm8471_vm2, %v4035_v28, %v4039_v49  ;;  %v8009_v57 = vld [vmem:[%s10715_s3 + $0x20] sm:$0xff]   ;;  %v4058_v11 = vor.u32 %v4057_v13, %v9632_v50  ;;  %v4071_v32 = vrot.slane %v4069_v37, 5 }
 0x133   : > { %v1267_v42 = vpop.f32.mrf.mxu1  ;;  %7708 = vmatprep.mubr.bf16.mxu1 %v6677_v3  ;;  %v4068_v61 = vrot.slane %v4066_v38, 4  ;;  %7788 = vmatprep.subr.bf16.mxu1 %v9617_v1  ;;  %v6678_v23 = vcombine.low %v4030_v26, %v4040_v22  ;;  %v4049_v47 = vrot.slane %v4048_v30, 4  ;;  %v4079_v35 = vshrl.u32 %v9626_v20, 16  ;;  %v8006_v3 = vld [vmem:[%s8426_s8 + $0x60] sm:$0xff]   ;;  %v8016_v22 = vld [vmem:[%s10743_s1 + $0x210] sm:$0xff]  }
 0x134   : > { %v9619_v54 = vadd.f32 %v1267_v42, %v962_v33  ;;  %v7374_v21 = vpop.f32.mrf.mxu0  ;;  %7739 = vmatpush3.bf16.msra.mxu0 %v8000_v8  ;;  %v4075_v8 = vshll.u32 %v9626_v20, 16  ;;  %v9663_v33 = vld [vmem:[%s10743_s1 + $0x218] sm:$0xff]   ;;  %v4085_v63 = vshll.u32 %v9635_v29, 16  ;;  %v4059_v0 = vrot.slane %v4058_v11, 4 }
 0x135   : > { %v7422_v24 = vpop.f32.mrf.mxu1  ;;  %7740 = vmatprep.subr.bf16.mxu0 %v9609_v41  ;;  %7709 = vmatmul.mubr.bf16.gmra.mxu1 %v6678_v23  ;;  %v4054_v48 = vsel %vm8471_vm2, %v4049_v47, %v9632_v50  ;;  %v4072_v2 = vor.u32 %v4071_v32, %v4068_v61  ;;  %v4093_v55 = vshll.u32 %v6645_v7, 16  ;;  %v4099_v50 = vshll.u32 %v9658_v58, 16  ;;  %v8017_v23 = vld [vmem:[%s10715_s3 + $0x10] sm:$0xff]  }
 0x136   : > { %v9629_v15 = vadd.f32 %v7422_v24, %v7374_v21  ;;  %v975_v6 = vpop.f32.mrf.mxu0  ;;  %v9665_v42 = vrot.slane %v4075_v8, 5  ;;  %v4087_v20 = vrot.slane %v4085_v63, 5  ;;  %7789 = vmatpush3.bf16.msra.mxu1 %v9617_v1  ;;  %v4090_v24 = vshrl.u32 %v6645_v7, 16 }
 0x137   : > { %v1280_v53 = vpop.f32.mrf.mxu1  ;;  %7661 = vmatmul.mubr.bf16.gmra.mxu0 %v7999_v60  ;;  %v8003_v60 = vld [vmem:[%s8426_s8 + $0x54] sm:$0xff]   ;;  %v4064_v12 = vsel %vm8471_vm2, %v4059_v0, %v4063_v51  ;;  %7790 = vmatprep.subr.bf16.mxu1 %v8009_v57  ;;  %v4073_v26 = vrot.slane %v4072_v2, 4  ;;  %v4095_v30 = vrot.slane %v4093_v55, 5  ;;  %v9697_v13 = vrot.slane %v4099_v50, 5 }
 0x138   : > { %v9643_v45 = vadd.f32 %v1280_v53, %v975_v6  ;;  %v7375_v9 = vpop.f32.mrf.mxu0  ;;  %7664 = vmatprep.mubr.bf16.mxu0 %v8002_v62  ;;  %7741 = vmatpush3.bf16.msra.mxu0 %v9609_v41  ;;  %v4081_v41 = vrot.slane %v4079_v35, 4  ;;  %v6679_v1 = vcombine.low %v4054_v48, %v4064_v12  ;;  %v4092_v46 = vrot.slane %v4090_v24, 4  ;;  %v6651_v0 = vld [vmem:[%s8426_s8 + $0x78] sm:$0xf] }
 0x139   : > { %v7423_v44 = vpop.f32.mrf.mxu1  ;;  %7742 = vmatprep.subr.bf16.mxu0 %v8008_v18  ;;  %v4103_v37 = vshrl.u32 %v9658_v58, 16  ;;  %v4109_v61 = vshll.u32 %v9678_v5, 16  ;;  %v4114_v8 = vshrl.u32 %v6648_v10, 16  ;;  %v4117_v32 = vshll.u32 %v6648_v10, 16 }
 0x13a   : > { %v9653_v56 = vadd.f32 %v7423_v44, %v7375_v9  ;;  %v978_v43 = vpop.f32.mrf.mxu0  ;;  %v4082_v28 = vor.u32 %v4081_v41, %v9665_v42  ;;  %7712 = vmatprep.mubr.bf16.mxu1 %v6679_v1  ;;  %7791 = vmatpush3.bf16.msra.mxu1 %v8009_v57  ;;  %v4096_v11 = vor.u32 %v4095_v30, %v4092_v46  ;;  %v4123_v48 = vshll.u32 %v9692_v19, 16  ;;  %v9725_v41 = vld [vmem:[%s8426_s8 + $0x7c] sm:$0xf] }
 0x13b   : > { %v1283_v39 = vpop.f32.mrf.mxu1  ;;  %v4105_v7 = vrot.slane %v4103_v37, 4  ;;  %7792 = vmatprep.subr.bf16.mxu1 %v8013_v25  ;;  %v4111_v35 = vrot.slane %v4109_v61, 5  ;;  %v4116_v63 = vrot.slane %v4114_v8, 4  ;;  %v4119_v24 = vrot.slane %v4117_v32, 5  ;;  %v8024_v32 = vld [vmem:[%s10743_s1 + $0x200] sm:$0xff]  }
 0x13c   : > { %v9671_v59 = vadd.f32 %v1283_v39, %v978_v43  ;;  %v7378_v21 = vpop.f32.mrf.mxu0  ;;  %7743 = vmatpush3.bf16.msra.mxu0 %v8008_v18  ;;  %v4078_v18 = vsel %vm8471_vm2, %v4073_v26, %v9665_v42  ;;  %v4083_v44 = vrot.slane %v4082_v28, 4  ;;  %v9714_v39 = vld [vmem:[%s8426_s8 + $0x74] sm:$0x1]  ;;  %v9730_v10 = vrot.slane %v4123_v48, 5  ;;  %v8007_v26 = vld [vmem:[%s8426_s8 + $0x6c] sm:$0xff]   ;;  %v8010_v28 = vld [vmem:[%s8426_s8 + $0x78] sm:$0xff]  }
 0x13d   : > { %v7426_v16 = vpop.f32.mrf.mxu1  ;;  %7744 = vmatprep.subr.bf16.mxu0 %v9663_v33  ;;  %v4106_v2 = vor.u32 %v4105_v7, %v9697_v13  ;;  %v4133_v12 = vshll.u32 %v9714_v39, 16  ;;  %v9753_v7 = vld [vmem:[%s8426_s8 + $0x88] sm:$0xf]  ;;  %v10771_v40 = vrot.slane %v9558_v17, 5 }
 0x13e   : > { %v9688_v6 = vadd.f32 %v7426_v16, %v7378_v21  ;;  %v991_v62 = vpop.f32.mrf.mxu0  ;;  %v4088_v42 = vsel %vm8471_vm2, %v4083_v44, %v4087_v20  ;;  %v4097_v16 = vrot.slane %v4096_v11, 4  ;;  %v8020_v20 = vld [vmem:[%s10743_s1 + $0x208] sm:$0xff]   ;;  %7793 = vmatpush3.bf16.msra.mxu1 %v8013_v25  ;;  %v9746_v44 = vld [vmem:[%s8426_s8 + $0x80] sm:$0x1]  ;;  %v4147_v11 = vshll.u32 %v9725_v41, 16 }
 0x13f   : > { %v1296_v53 = vpop.f32.mrf.mxu1  ;;  %7665 = vmatmul.mubr.bf16.gmra.mxu0 %v8003_v60  ;;  %v6680_v21 = vcombine.low %v4078_v18, %v4088_v42  ;;  %v4107_v50 = vrot.slane %v4106_v2, 4  ;;  %7794 = vmatprep.subr.bf16.mxu1 %v8017_v23  ;;  %v8021_v25 = vld [vmem:[%s10715_s3 + $0x8] sm:$0xff]   ;;  %v4135_v37 = vrot.slane %v4133_v12, 5  ;;  %v4151_v2 = vshrl.u32 %v9725_v41, 16 }
 0x140   : > { %v9695_v38 = vadd.f32 %v1296_v53, %v991_v62  ;;  %v7379_v9 = vpop.f32.mrf.mxu0  ;;  %7668 = vmatprep.mubr.bf16.mxu0 %v8006_v3  ;;  %7745 = vmatpush3.bf16.msra.mxu0 %v9663_v33  ;;  %v4127_v33 = vshrl.u32 %v9692_v19, 16  ;;  %v4102_v55 = vsel %vm8471_vm2, %v4097_v16, %v9697_v13  ;;  %v4138_v53 = vshrl.u32 %v6651_v0, 16  ;;  %v6654_v13 = vld [vmem:[%s8426_s8 + $0x84] sm:$0xf] }
 0x141   : > { %v7427_v51 = vpop.f32.mrf.mxu1  ;;  %7746 = vmatprep.subr.bf16.mxu0 %v8016_v22  ;;  %7713 = vmatmul.mubr.bf16.gmra.mxu1 %v6680_v21  ;;  %v9764_v16 = vrot.slane %v4147_v11, 5  ;;  %v6657_v11 = vld [vmem:[%s8426_s8 + $0x90] sm:$0xf] }
 0x142   : > { %v9711_v43 = vadd.f32 %v7427_v51, %v7379_v9  ;;  %v994_v47 = vpop.f32.mrf.mxu0  ;;  %v4120_v9 = vor.u32 %v4119_v24, %v4116_v63  ;;  %v4129_v30 = vrot.slane %v4127_v33, 4  ;;  %v4112_v51 = vsel %vm8471_vm2, %v4107_v50, %v4111_v35  ;;  %7795 = vmatpush3.bf16.msra.mxu1 %v8017_v23  ;;  %v8025_v35 = vld [vmem:[%s10715_s3] sm:$0xff]  }
 0x143   : > { %v1299_v57 = vpop.f32.mrf.mxu1  ;;  %v4140_v8 = vrot.slane %v4138_v53, 4  ;;  %v6681_v42 = vcombine.low %v4102_v55, %v4112_v51  ;;  %7796 = vmatprep.subr.bf16.mxu1 %v8021_v25  ;;  %v4162_v55 = vshrl.u32 %v6654_v13, 16 }
 0x144   : > { %v9721_v60 = vadd.f32 %v1299_v57, %v994_v47  ;;  %v7382_v1 = vpop.f32.mrf.mxu0  ;;  %7747 = vmatpush3.bf16.msra.mxu0 %v8016_v22  ;;  %v4141_v47 = vshll.u32 %v6651_v0, 16  ;;  %v4121_v57 = vrot.slane %v4120_v9, 4  ;;  %v4130_v63 = vor.u32 %v4129_v30, %v9730_v10  ;;  %v9774_v9 = vld [vmem:[%s8426_s8 + $0x8c] sm:$0x1] }
 0x145   : > { %v7430_v3 = vpop.f32.mrf.mxu1  ;;  %7748 = vmatprep.subr.bf16.mxu0 %v8020_v20  ;;  %7716 = vmatprep.mubr.bf16.mxu1 %v6681_v42  ;;  %v4165_v30 = vshll.u32 %v6654_v13, 16 }
 0x146   : > { %v9743_v46 = vadd.f32 %v7430_v3, %v7382_v1  ;;  %v1007_v61 = vpop.f32.mrf.mxu0  ;;  %v4143_v21 = vrot.slane %v4141_v47, 5  ;;  %v4157_v3 = vshll.u32 %v9746_v44, 16  ;;  %v4126_v23 = vsel %vm8471_vm2, %v4121_v57, %v9730_v10  ;;  %7797 = vmatpush3.bf16.msra.mxu1 %v8021_v25  ;;  %v9790_v25 = vld [vmem:[%s8426_s8 + $0x94] sm:$0xf] }
 0x147   : > { %v1312_v18 = vpop.f32.mrf.mxu1  ;;  %7669 = vmatmul.mubr.bf16.gmra.mxu0 %v8007_v26  ;;  %v4131_v24 = vrot.slane %v4130_v63, 4  ;;  %v4153_v26 = vrot.slane %v4151_v2, 4  ;;  %v4164_v47 = vrot.slane %v4162_v55, 4  ;;  %v4167_v57 = vrot.slane %v4165_v30, 5  ;;  %7798 = vmatprep.subr.bf16.mxu1 %v8025_v35  ;;  %v8014_v2 = vld [vmem:[%s8426_s8 + $0x90] sm:$0xff]  }
 0x148   : > { %v9759_v22 = vadd.f32 %v1312_v18, %v1007_v61  ;;  %v7383_v0 = vpop.f32.mrf.mxu0  ;;  %7672 = vmatprep.mubr.bf16.mxu0 %v8010_v28  ;;  %v4144_v1 = vor.u32 %v4143_v21, %v4140_v8  ;;  %v4159_v53 = vrot.slane %v4157_v3, 5  ;;  %7749 = vmatpush3.bf16.msra.mxu0 %v8020_v20  ;;  %v8011_v61 = vld [vmem:[%s8426_s8 + $0x84] sm:$0xff]   ;;  %v4171_v28 = vshll.u32 %v9753_v7, 16  ;;  %v9796_v55 = vld [vmem:[%s8426_s8 + $0x98] sm:$0x1] }
 0x149   : > { %v7431_v48 = vpop.f32.mrf.mxu1  ;;  %v4136_v18 = vsel %vm8471_vm2, %v4131_v24, %v4135_v37  ;;  %7750 = vmatprep.subr.bf16.mxu0 %v8024_v32  ;;  %v4154_v13 = vor.u32 %v4153_v26, %v9764_v16  ;;  %v4168_v24 = vor.u32 %v4167_v57, %v4164_v47 }
 0x14a   : > { %v9771_v33 = vadd.f32 %v7431_v48, %v7383_v0  ;;  %v1010_v50 = vpop.f32.mrf.mxu0  ;;  %v6682_v8 = vcombine.low %v4126_v23, %v4136_v18  ;;  %v4145_v42 = vrot.slane %v4144_v1, 4  ;;  %v4173_v63 = vrot.slane %v4171_v28, 5  ;;  %v6660_v1 = vld [vmem:[%s8426_s8 + $0x9c] sm:$0xf]  ;;  %7799 = vmatpush3.bf16.msra.mxu1 %v8025_v35 }
 0x14b   : > { %v1315_v12 = vpop.f32.mrf.mxu1  ;;  %v4175_v48 = vshrl.u32 %v9753_v7, 16  ;;  %v4181_v0 = vshll.u32 %v9774_v9, 16  ;;  %v4155_v23 = vrot.slane %v4154_v13, 4  ;;  %v4189_v28 = vshll.u32 %v6657_v11, 16 }
 0x14c   : > { %v9778_v10 = vadd.f32 %v1315_v12, %v1010_v50  ;;  %v7386_v20 = vpop.f32.mrf.mxu0  ;;  %7717 = vmatmul.mubr.bf16.gmra.mxu1 %v6682_v8  ;;  %v4150_v3 = vsel %vm8471_vm2, %v4145_v42, %v9764_v16  ;;  %v4186_v50 = vshrl.u32 %v6657_v11, 16  ;;  %7751 = vmatpush3.bf16.msra.mxu0 %v8024_v32  ;;  %v4169_v47 = vrot.slane %v4168_v24, 4  ;;  %v8015_v24 = vld [vmem:[%s8426_s8 + $0x9c] sm:$0xff]  }
 0x14d   : > { %v7434_v51 = vpop.f32.mrf.mxu1  ;;  %v4177_v26 = vrot.slane %v4175_v48, 4  ;;  %v4183_v30 = vrot.slane %v4181_v0, 5  ;;  %v4160_v16 = vsel %vm8471_vm2, %v4155_v23, %v4159_v53  ;;  %v4195_v32 = vshll.u32 %v9790_v25, 16 }
 0x14e   : > { %v9784_v37 = vadd.f32 %v7434_v51, %v7386_v20  ;;  %v1023_v12 = vpop.f32.mrf.mxu0  ;;  %v9802_v20 = vld [vmem:[%s8426_s8 + $0xa0] sm:$0xf]  ;;  %v4188_v42 = vrot.slane %v4186_v50, 4  ;;  %v6683_v13 = vcombine.low %v4150_v3, %v4160_v16  ;;  %v4191_v11 = vrot.slane %v4189_v28, 5 }
 0x14f   : > { %v1328_v21 = vpop.f32.mrf.mxu1  ;;  %7673 = vmatmul.mubr.bf16.gmra.mxu0 %v8011_v61  ;;  %v4178_v57 = vor.u32 %v4177_v26, %v4173_v63  ;;  %v4174_v35 = vsel %vm8471_vm2, %v4169_v47, %v4173_v63  ;;  %v4197_v53 = vrot.slane %v4195_v32, 5  ;;  %v4199_v61 = vshrl.u32 %v9790_v25, 16 }
 0x150   : > { %10749 = vst [vmem:[#allocation15_spill] sm:$0xff] %v9784_v37  ;;  %v9799_v18 = vadd.f32 %v1328_v21, %v1023_v12  ;;  %v7387_v8 = vpop.f32.mrf.mxu0  ;;  %7676 = vmatprep.mubr.bf16.mxu0 %v8014_v2  ;;  %v4205_v23 = vshll.u32 %v9796_v55, 16  ;;  %v9815_v12 = vld [vmem:[%s8426_s8 + $0xa4] sm:$0x1]  ;;  %7720 = vmatprep.mubr.bf16.mxu1 %v6683_v13  ;;  %v4192_v2 = vor.u32 %v4191_v11, %v4188_v42  ;;  %v4213_v16 = vshll.u32 %v6660_v1, 16 }
 0x151   : > { %v7435_v51 = vpop.f32.mrf.mxu1  ;;  %10752 = vst [vmem:[#allocation18_spill] sm:$0xff] %v9815_v12  ;;  %v4179_v3 = vrot.slane %v4178_v57, 4  ;;  %v4201_v28 = vrot.slane %v4199_v61, 4  ;;  %v4219_v47 = vshll.u32 %v9802_v20, 16  ;;  %v4223_v57 = vshrl.u32 %v9802_v20, 16 }
 0x152   : > { %10750 = vst [vmem:[#allocation16_spill] sm:$0xff] %v9799_v18  ;;  %v9807_v48 = vadd.f32 %v7435_v51, %v7387_v8  ;;  %v1026_v21 = vpop.f32.mrf.mxu0  ;;  %v4210_v51 = vshrl.u32 %v6660_v1, 16  ;;  %v4207_v63 = vrot.slane %v4205_v23, 5  ;;  %v6663_v8 = vld [vmem:[%s8426_s8 + $0xa8] sm:$0xf]  ;;  %v4193_v62 = vrot.slane %v4192_v2, 4 }
 0x153   : > { %v1331_v0 = vpop.f32.mrf.mxu1  ;;  %v4184_v32 = vsel %vm8471_vm2, %v4179_v3, %v4183_v30  ;;  %v4202_v11 = vor.u32 %v4201_v28, %v4197_v53  ;;  %v4215_v61 = vrot.slane %v4213_v16, 5  ;;  %v4221_v23 = vrot.slane %v4219_v47, 5  ;;  %v9826_v1 = vld [vmem:[%s8426_s8 + $0xac] sm:$0xf] }
 0x154   : > { %10751 = vst [vmem:[#allocation17_spill] sm:$0xff] %v9807_v48  ;;  %v9817_v50 = vadd.f32 %v1331_v0, %v1026_v21  ;;  %v4212_v13 = vrot.slane %v4210_v51, 4  ;;  %v8018_v21 = vld [vmem:[%s8426_s8 + $0xa8] sm:$0xff]   ;;  %v6684_v42 = vcombine.low %v4174_v35, %v4184_v32  ;;  %v7390_v49 = vpop.f32.mrf.mxu0  ;;  %v4198_v36 = vsel %vm8471_vm2, %v4193_v62, %v4197_v53  ;;  %v9834_v51 = vld [vmem:[%s8426_s8 + $0xb0] sm:$0x1] }
 0x155   : > { %v7438_v26 = vpop.f32.mrf.mxu1  ;;  %v4225_v30 = vrot.slane %v4223_v57, 4  ;;  %v4229_v3 = vshll.u32 %v9815_v12, 16  ;;  %10755 = vst [vmem:[#allocation21_spill] sm:$0xff] %v9834_v51  ;;  %v4203_v35 = vrot.slane %v4202_v11, 4  ;;  %v4234_v47 = vshrl.u32 %v6663_v8, 16 }
 0x156   : > { %10753 = vst [vmem:[#allocation19_spill] sm:$0xff] %v9817_v50  ;;  %v9830_v50 = vadd.f32 %v7438_v26, %v7390_v49  ;;  %7721 = vmatmul.mubr.bf16.gmra.mxu1 %v6684_v42  ;;  %v4216_v28 = vor.u32 %v4215_v61, %v4212_v13  ;;  %v1039_v16 = vpop.f32.mrf.mxu0  ;;  %v4237_v32 = vshll.u32 %v6663_v8, 16  ;;  %v6666_v48 = vld [vmem:[%s8426_s8 + $0xb4] sm:$0xf]  ;;  %v4243_v26 = vshll.u32 %v9826_v1, 16 }
 0x157   : > { %v1344_v0 = vpop.f32.mrf.mxu1  ;;  %7677 = vmatmul.mubr.bf16.gmra.mxu0 %v8015_v24  ;;  %v4226_v18 = vor.u32 %v4225_v30, %v4221_v23  ;;  %v4231_v62 = vrot.slane %v4229_v3, 5  ;;  %v4208_v57 = vsel %vm8471_vm2, %v4203_v35, %v4207_v63  ;;  %v4236_v42 = vrot.slane %v4234_v47, 4  ;;  %v8019_v61 = vld [vmem:[%s8426_s8 + $0xb4] sm:$0xff]  }
 0x158   : > { %10754 = vst [vmem:[#allocation20_spill] sm:$0xff] %v9830_v50  ;;  %v9837_v49 = vadd.f32 %v1344_v0, %v1039_v16  ;;  %7680 = vmatprep.mubr.bf16.mxu0 %v8018_v21  ;;  %v4217_v24 = vrot.slane %v4216_v28, 4  ;;  %v7391_v13 = vpop.f32.mrf.mxu0  ;;  %v4239_v11 = vrot.slane %v4237_v32, 5  ;;  %v9844_v8 = vld [vmem:[%s8426_s8 + $0xb8] sm:$0xf]  ;;  %v6685_v30 = vcombine.low %v4198_v36, %v4208_v57 }
 0x159   : > { %v7439_v2 = vpop.f32.mrf.mxu1  ;;  %10757 = vst [vmem:[#allocation23_spill] sm:$0xff] %v9844_v8  ;;  %v4227_v3 = vrot.slane %v4226_v18, 4  ;;  %v4245_v16 = vrot.slane %v4243_v26, 5  ;;  %v4247_v28 = vshrl.u32 %v9826_v1, 16  ;;  %v4253_v47 = vshll.u32 %v9834_v51, 16 }
 0x15a   : > { %10756 = vst [vmem:[#allocation22_spill] sm:$0xff] %v9837_v49  ;;  %v9846_v0 = vadd.f32 %v7439_v2, %v7391_v13  ;;  %v8022_v49 = vld [vmem:[%s8426_s8 + $0xc0] sm:$0xff]   ;;  %v4222_v50 = vsel %vm8471_vm2, %v4217_v24, %v4221_v23  ;;  %v1042_v63 = vpop.f32.mrf.mxu0  ;;  %v4240_v35 = vor.u32 %v4239_v11, %v4236_v42  ;;  %v9854_v32 = vld [vmem:[%s8426_s8 + $0xbc] sm:$0x1]  ;;  %7724 = vmatprep.mubr.bf16.mxu1 %v6685_v30  ;;  %v4258_v2 = vshrl.u32 %v6666_v48, 16 }
 0x15b   : > { %v1347_v53 = vpop.f32.mrf.mxu1  ;;  %10759 = vst [vmem:[#allocation25_spill] sm:$0xff] %v9854_v32  ;;  %v4232_v36 = vsel %vm8471_vm2, %v4227_v3, %v4231_v62  ;;  %v4261_v26 = vshll.u32 %v6666_v48, 16  ;;  %v6669_v13 = vld [vmem:[%s8426_s8 + $0xc0] sm:$0xf]  ;;  %v4249_v24 = vrot.slane %v4247_v28, 4  ;;  %v4255_v42 = vrot.slane %v4253_v47, 5 }
 0x15c   : > { %10758 = vst [vmem:[#allocation24_spill] sm:$0xff] %v9846_v0  ;;  %v9858_v18 = vadd.f32 %v1347_v53, %v1042_v63  ;;  %v6686_v0 = vcombine.low %v4222_v50, %v4232_v36  ;;  %v4241_v23 = vrot.slane %v4240_v35, 4  ;;  %v4260_v51 = vrot.slane %v4258_v2, 4 }
 0x15d   : > { %v7442_v21 = vpop.f32.mrf.mxu1  ;;  %v4263_v12 = vrot.slane %v4261_v26, 5  ;;  %v4267_v30 = vshll.u32 %v9844_v8, 16  ;;  %v4250_v53 = vor.u32 %v4249_v24, %v4245_v16  ;;  %v4271_v50 = vshrl.u32 %v9844_v8, 16 }
 0x15e   : > { %10760 = vst [vmem:[#allocation26_spill] sm:$0xff] %v9858_v18  ;;  %v7394_v11 = vpop.f32.mrf.mxu0  ;;  %7725 = vmatmul.mubr.bf16.gmra.mxu1 %v6686_v0  ;;  %v4246_v48 = vsel %vm8471_vm2, %v4241_v23, %v4245_v16  ;;  %v4277_v3 = vshll.u32 %v9854_v32, 16  ;;  %v9874_v0 = vld [vmem:[%s8426_s8 + $0xc8] sm:$0x1]  ;;  %v4282_v2 = vshrl.u32 %v6669_v13, 16  ;;  %v4285_v24 = vshll.u32 %v6669_v13, 16 }
 0x15f   : > { %v1360_v57 = vpop.f32.mrf.mxu1  ;;  %v9861_v37 = vadd.f32 %v7442_v21, %v7394_v11  ;;  %7681 = vmatmul.mubr.bf16.gmra.mxu0 %v8019_v61  ;;  %v9869_v21 = vld [vmem:[%s8426_s8 + $0xc4] sm:$0xf]  ;;  %v4264_v35 = vor.u32 %v4263_v12, %v4260_v51  ;;  %v4269_v28 = vrot.slane %v4267_v30, 5  ;;  %10764 = vst [vmem:[#allocation30_spill] sm:$0xff] %v9874_v0  ;;  %v4251_v16 = vrot.slane %v4250_v53, 4  ;;  %v8023_v30 = vld [vmem:[%s8426_s8 + $0xcc] sm:$0xff]  }
 0x160   : > { %v1055_v63 = vpop.f32.mrf.mxu0  ;;  %10762 = vst [vmem:[#allocation28_spill] sm:$0xff] %v9869_v21  ;;  %7684 = vmatprep.mubr.bf16.mxu0 %v8022_v49  ;;  %v4273_v61 = vrot.slane %v4271_v50, 4  ;;  %v4279_v26 = vrot.slane %v4277_v3, 5  ;;  %v6672_v11 = vld [vmem:[%s8426_s8 + $0xcc] sm:$0xf]  ;;  %v4284_v12 = vrot.slane %v4282_v2, 4 }
 0x161   : > { %10761 = vst [vmem:[#allocation27_spill] sm:$0xff] %v9861_v37  ;;  %v7443_v62 = vpop.f32.mrf.mxu1  ;;  %v9871_v47 = vadd.f32 %v1360_v57, %v1055_v63  ;;  %v4265_v37 = vrot.slane %v4264_v35, 4  ;;  %v4291_v51 = vshll.u32 %v9869_v21, 16  ;;  %v4256_v49 = vsel %vm8471_vm2, %v4251_v16, %v4255_v42  ;;  %v9893_v16 = vld [vmem:[%s8426_s8 + $0xd4] sm:$0x1] }
 0x162   : > { %v7395_v23 = vpop.f32.mrf.mxu0  ;;  %v4274_v63 = vor.u32 %v4273_v61, %v4269_v28  ;;  %v4287_v50 = vrot.slane %v4285_v24, 5  ;;  %v4295_v3 = vshrl.u32 %v9869_v21, 16  ;;  %v6687_v13 = vcombine.low %v4246_v48, %v4256_v49 }
 0x163   : > { %10763 = vst [vmem:[#allocation29_spill] sm:$0xff] %v9871_v47  ;;  %v1363_v36 = vpop.f32.mrf.mxu1  ;;  %v9877_v18 = vadd.f32 %v7443_v62, %v7395_v23  ;;  %v9885_v47 = vld [vmem:[%s8426_s8 + $0xd0] sm:$0xf]  ;;  %v4270_v62 = vsel %vm8471_vm2, %v4265_v37, %v4269_v28  ;;  %v4293_v2 = vrot.slane %v4291_v51, 5  ;;  %v4301_v42 = vshll.u32 %v9874_v0, 16 }
 0x164   : > { %v1058_v53 = vpop.f32.mrf.mxu0  ;;  %10766 = vst [vmem:[#allocation32_spill] sm:$0xff] %v9885_v47  ;;  %v4288_v32 = vor.u32 %v4287_v50, %v4284_v12  ;;  %v4297_v8 = vrot.slane %v4295_v3, 4  ;;  %7728 = vmatprep.mubr.bf16.mxu1 %v6687_v13  ;;  %v4306_v61 = vshrl.u32 %v6672_v11, 16  ;;  %v4309_v24 = vshll.u32 %v6672_v11, 16  ;;  %v6700_v0 = vld [vmem:[%s8426_s8 + $0x24] sm:$0xe] }
 0x165   : > { %10765 = vst [vmem:[#allocation31_spill] sm:$0xff] %v9877_v18  ;;  %v7446_v57 = vpop.f32.mrf.mxu1  ;;  %v9889_v35 = vadd.f32 %v1363_v36, %v1058_v53  ;;  %v4275_v18 = vrot.slane %v4274_v63, 4  ;;  %v4315_v48 = vshll.u32 %v9885_v47, 16  ;;  %v4319_v37 = vshrl.u32 %v9885_v47, 16  ;;  %v6699_v53 = vld [vmem:[%s8426_s8 + $0x18] sm:$0xe] }
 0x166   : > { %v4289_v51 = vrot.slane %v4288_v32, 4  ;;  %v4298_v12 = vor.u32 %v4297_v8, %v4293_v2  ;;  %v4303_v49 = vrot.slane %v4301_v42, 5  ;;  %v4308_v11 = vrot.slane %v4306_v61, 4  ;;  %v6701_v61 = vld [vmem:[%s8426_s8 + $0x30] sm:$0xe] }
 0x167   : > { %10767 = vst [vmem:[#allocation33_spill] sm:$0xff] %v9889_v35  ;;  %v1376_v23 = vpop.f32.mrf.mxu1  ;;  %v4280_v36 = vsel %vm8471_vm2, %v4275_v18, %v4279_v26  ;;  %v7398_v63 = vpop.f32.mrf.mxu0  ;;  %7685 = vmatmul.mubr.bf16.gmra.mxu0 %v8023_v30  ;;  %v4311_v13 = vrot.slane %v4309_v24, 5  ;;  %v4317_v32 = vrot.slane %v4315_v48, 5  ;;  %v4321_v8 = vrot.slane %v4319_v37, 4 }
 0x168   : > { %v6688_v50 = vcombine.low %v4270_v62, %v4280_v36  ;;  %v9900_v3 = vadd.f32 %v7446_v57, %v7398_v63  ;;  %v4294_v47 = vsel %vm8471_vm2, %v4289_v51, %v4293_v2  ;;  %v4299_v21 = vrot.slane %v4298_v12, 4  ;;  %v8042_v2 = vld [vmem:[%s8426_s8 + $0x1c] sm:$0xf]  ;;  %v8043_v12 = vld [vmem:[%s8426_s8 + $0x20] sm:$0x1] }
 0x169   : > { %v7447_v28 = vpop.f32.mrf.mxu1  ;;  %v1071_v18 = vpop.f32.mrf.mxu0  ;;  %v4312_v26 = vor.u32 %v4311_v13, %v4308_v11  ;;  %v4325_v30 = vshll.u32 %v9893_v16, 16  ;;  %v6715_v62 = vrot.slane %v6699_v53, 9  ;;  %v4322_v36 = vor.u32 %v4321_v8, %v4317_v32 }
 0x16a   : > { %10768 = vst [vmem:[#allocation34_spill] sm:$0xff] %v9900_v3  ;;  %7729 = vmatmul.mubr.bf16.gmra.mxu1 %v6688_v50  ;;  %v9906_v57 = vadd.f32 %v1376_v23, %v1071_v18  ;;  %v4304_v24 = vsel %vm8471_vm2, %v4299_v21, %v4303_v49  ;;  %v4716_v51 = vrot.slane %v8042_v2, 5  ;;  %v4719_v48 = vrot.slane %v8043_v12, 5 }
 0x16b   : > { %v1379_v35 = vpop.f32.mrf.mxu1  ;;  %v7399_v63 = vpop.f32.mrf.mxu0  ;;  %v6689_v37 = vcombine.low %v4294_v47, %v4304_v24  ;;  %v4313_v3 = vrot.slane %v4312_v26, 4  ;;  %v4327_v50 = vrot.slane %v4325_v30, 5  ;;  %v4323_v13 = vrot.slane %v4322_v36, 4 }
 0x16c   : > { %v9913_v11 = vadd.f32 %v7447_v28, %v7399_v63  ;;  %v4717_v18 = vsel %vm8829_vm5, %v6715_v62, %v4716_v51  ;;  %v4718_v21 = vrot.slane %v4716_v51, 4  ;;  %v6716_v49 = vrot.slane %v6700_v0, 9  ;;  %v8026_v63 = vld [vmem:[%s8385_s19] sm:$0xff]   ;;  %v6702_v51 = vld [vmem:[%s8426_s8 + $0x3c] sm:$0xe] }
 0x16d   : > { %v7514_v42 = vpop.f32.mrf.mxu1  ;;  %v1074_v53 = vpop.f32.mrf.mxu0  ;;  %7732 = vmatprep.mubr.bf16.mxu1 %v6689_v37  ;;  %v4318_v8 = vsel %vm8471_vm2, %v4313_v3, %v4317_v32  ;;  %v10769_v26 = vrot.slane %v9553_v34, 5  ;;  %v6717_v24 = vrot.slane %v6701_v61, 9  ;;  %v4328_v36 = vsel %vm8471_vm2, %v4323_v13, %v4327_v50  ;;  %v8044_v3 = vld [vmem:[%s8426_s8 + $0x34] sm:$0xf]  ;;  %v6703_v13 = vld [vmem:[%s8426_s8 + $0x48] sm:$0xe] }
 0x16e   : > { %v9919_v47 = vadd.f32 %v1379_v35, %v1074_v53  ;;  %v4720_v62 = vsel %vm8829_vm5, %v4718_v21, %v4719_v48  ;;  %v4730_v32 = vrot.slane %v8044_v3, 5  ;;  %v6690_v12 = vcombine.low %v4318_v8, %v4328_v36  ;;  %v8046_v36 = vld [vmem:[%s8426_s8 + $0x40] sm:$0xf]  ;;  %v8047_v3 = vld [vmem:[%s8426_s8 + $0x4c] sm:$0xf] }
 0x16f   : > { %v2102_v23 = vpop.f32.mrf.mxu1  ;;  %v4725_v28 = vrot.slane %v10769_v26, 4  ;;  %v7466_v0 = vpop.f32.mrf.mxu0  ;;  %v10770_v2 = vmov %v10769_v26  ;;  %v6731_v37 = vcombine.low %v4717_v18, %v4720_v62  ;;  %v8045_v26 = vld [vmem:[%s8426_s8 + $0x38] sm:$0x1]  ;;  %v4737_v62 = vrot.slane %v8046_v36, 5  ;;  %v8028_v36 = vld [vmem:[%s8385_s19 + $0x10] sm:$0xff]  }
 0x170   : > { %v4724_v35 = vsel %vm8829_vm5, %v6716_v49, %v10770_v2  ;;  %v1845_v61 = vadd.f32 %v7466_v0, %v9583_v52  ;;  %v4731_v21 = vsel %vm8829_vm5, %v6717_v24, %v4730_v32  ;;  %v4732_v49 = vrot.slane %v4730_v32, 4  ;;  %v6704_v0 = vld [vmem:[%s8426_s8 + $0x54] sm:$0xe] }
 0x171   : > { %v7515_v30 = vpop.f32.mrf.mxu1  ;;  %v4727_v48 = vsel %vm8829_vm5, %v4725_v28, %v10771_v40  ;;  %v1716_v53 = vpop.f32.mrf.mxu0  ;;  %v4733_v18 = vrot.slane %v8045_v26, 5  ;;  %7752 = vmatprep.mubr.bf16.mxu0 %v6731_v37  ;;  %v6718_v28 = vrot.slane %v6702_v51, 9  ;;  %v4744_v32 = vrot.slane %v8047_v3, 5  ;;  %v6705_v40 = vld [vmem:[%s8426_s8 + $0x60] sm:$0xe]  ;;  %v8027_v26 = vld [vmem:[%s8385_s19 + $0x8] sm:$0xff]  }
 0x172   : > { %v6732_v34 = vcombine.low %v4724_v35, %v4727_v48  ;;  %7733 = vmatmul.mubr.bf16.gmra.mxu1 %v6690_v12  ;;  %v9943_v17 = vadd.f32 %v7514_v42, %v1845_v61  ;;  %v1843_v52 = vadd.f32 %v1716_v53, %v9588_v14  ;;  %v6719_v35 = vrot.slane %v6703_v13, 9  ;;  %v8048_v42 = vld [vmem:[%s8426_s8 + $0x50] sm:$0x1] }
 0x173   : > { %v2105_v50 = vpop.f32.mrf.mxu1  ;;  %7800 = vmatprep.mubr.bf16.mxu1 %v8026_v63  ;;  %v7467_v24 = vpop.f32.mrf.mxu0  ;;  %v4734_v2 = vsel %vm8829_vm5, %v4732_v49, %v4733_v18  ;;  %v4747_v12 = vrot.slane %v8048_v42, 5  ;;  %v4738_v63 = vsel %vm8829_vm5, %v6718_v28, %v4737_v62  ;;  %v4746_v53 = vrot.slane %v4744_v32, 4 }
 0x174   : > { %7753 = vmatmul.mubr.bf16.vlgmr.msra.gmra.mxu0 %v6732_v34  ;;  %v9952_v37 = vadd.f32 %v2102_v23, %v1843_v52  ;;  %v1846_v14 = vadd.f32 %v7467_v24, %v9602_v27  ;;  %v6733_v51 = vcombine.low %v4731_v21, %v4734_v2  ;;  %v4739_v34 = vrot.slane %v4737_v62, 4  ;;  %v8049_v52 = vld [vmem:[%s8426_s8 + $0x58] sm:$0xf] }
 0x175   : > { %v7518_v8 = vpop.f32.mrf.mxu1  ;;  %v1719_v48 = vpop.f32.mrf.mxu0  ;;  %v4745_v13 = vsel %vm8829_vm5, %v6719_v35, %v4744_v32  ;;  %v6720_v49 = vrot.slane %v6704_v0, 9  ;;  %v4754_v23 = vrot.slane %v9635_v29, 5  ;;  %v4751_v28 = vrot.slane %v8049_v52, 5  ;;  %v6706_v35 = vld [vmem:[%s8426_s8 + $0x6c] sm:$0xe] }
 0x176   : > { %v9962_v27 = vadd.f32 %v7515_v30, %v1846_v14  ;;  %v1844_v21 = vadd.f32 %v1719_v48, %v9619_v54  ;;  %7756 = vmatprep.mubr.bf16.mxu0 %v6733_v51  ;;  %v10772_v62 = vrot.slane %v9578_v31, 5  ;;  %v4748_v0 = vsel %vm8829_vm5, %v4746_v53, %v4747_v12 }
 0x177   : > { %v2118_v61 = vpop.f32.mrf.mxu1  ;;  %v7470_v24 = vpop.f32.mrf.mxu0  ;;  %v6721_v29 = vrot.slane %v6705_v40, 9  ;;  %v4758_v30 = vrot.slane %v9658_v58, 5  ;;  %v6735_v14 = vcombine.low %v4745_v13, %v4748_v0  ;;  %v4752_v31 = vsel %vm8829_vm5, %v6720_v49, %v4751_v28 }
 0x178   : > { %v4741_v2 = vsel %vm8829_vm5, %v4739_v34, %v10772_v62  ;;  %v9975_v3 = vadd.f32 %v2105_v50, %v1844_v21  ;;  %v1849_v54 = vadd.f32 %v7470_v24, %v9629_v15  ;;  %v4753_v48 = vrot.slane %v4751_v28, 4  ;;  %v8029_v28 = vld [vmem:[%s8385_s19 + $0x18] sm:$0xff]  }
 0x179   : > { %v7519_v18 = vpop.f32.mrf.mxu1  ;;  %v6734_v32 = vcombine.low %v4738_v63, %v4741_v2  ;;  %v1732_v51 = vpop.f32.mrf.mxu0  ;;  %v4760_v34 = vrot.slane %v4758_v30, 4  ;;  %v4761_v52 = vrot.slane %v9678_v5, 5  ;;  %v6722_v40 = vrot.slane %v6706_v35, 9  ;;  %v6707_v62 = vld [vmem:[%s8426_s8 + $0x78] sm:$0xe]  ;;  %v8030_v2 = vld [vmem:[%s8385_s19 + $0x20] sm:$0xff]  }
 0x17a   : > { %7801 = vmatmul.mubr.bf16.vlgmr.msra.gmra.mxu1 %v8027_v26  ;;  %v9981_v12 = vadd.f32 %v7518_v8, %v1849_v54  ;;  %v1847_v58 = vadd.f32 %v1732_v51, %v9643_v45  ;;  %v4765_v15 = vrot.slane %v9692_v19, 5  ;;  %v4768_v63 = vrot.slane %v9714_v39, 5 }
 0x17b   : > { %v2121_v42 = vpop.f32.mrf.mxu1  ;;  %7804 = vmatprep.mubr.bf16.mxu1 %v8028_v36  ;;  %v7471_v13 = vpop.f32.mrf.mxu0  ;;  %v4755_v53 = vsel %vm8829_vm5, %v4753_v48, %v4754_v23  ;;  %v4759_v19 = vsel %vm8829_vm5, %v6721_v29, %v4758_v30  ;;  %v4762_v26 = vsel %vm8829_vm5, %v4760_v34, %v4761_v52 }
 0x17c   : > { %7757 = vmatmul.mubr.bf16.gmra.mxu0 %v6734_v32  ;;  %v9988_v5 = vadd.f32 %v2118_v61, %v1847_v58  ;;  %v1850_v8 = vadd.f32 %v7471_v13, %v9653_v56  ;;  %v6736_v45 = vcombine.low %v4752_v31, %v4755_v53  ;;  %v4766_v21 = vsel %vm8829_vm5, %v6722_v40, %v4765_v15  ;;  %v6708_v40 = vld [vmem:[%s8426_s8 + $0x84] sm:$0xe]  ;;  %v8031_v13 = vld [vmem:[%s8385_s19 + $0x28] sm:$0xff]  }
 0x17d   : > { %v7522_v50 = vpop.f32.mrf.mxu1  ;;  %7760 = vmatprep.mubr.bf16.mxu0 %v6735_v14  ;;  %v1735_v39 = vpop.f32.mrf.mxu0  ;;  %v4767_v23 = vrot.slane %v4765_v15, 4  ;;  %v4772_v61 = vrot.slane %v9725_v41, 5  ;;  %v6737_v32 = vcombine.low %v4759_v19, %v4762_v26 }
 0x17e   : > { %v9999_v36 = vadd.f32 %v7519_v18, %v1850_v8  ;;  %v1848_v56 = vadd.f32 %v1735_v39, %v9671_v59  ;;  %v6723_v18 = vrot.slane %v6707_v62, 9  ;;  %v4775_v59 = vrot.slane %v9746_v44, 5 }
 0x17f   : > { %v2134_v49 = vpop.f32.mrf.mxu1  ;;  %v7474_v0 = vpop.f32.mrf.mxu0  ;;  %v4769_v29 = vsel %vm8829_vm5, %v4767_v23, %v4768_v63  ;;  %v4774_v51 = vrot.slane %v4772_v61, 4  ;;  %v4779_v44 = vrot.slane %v9753_v7, 5  ;;  %v4786_v63 = vrot.slane %v9790_v25, 5 }
 0x180   : > { %v10006_v30 = vadd.f32 %v2121_v42, %v1848_v56  ;;  %v1853_v35 = vadd.f32 %v7474_v0, %v9688_v6  ;;  %v6738_v14 = vcombine.low %v4766_v21, %v4769_v29  ;;  %v4773_v15 = vsel %vm8829_vm5, %v6723_v18, %v4772_v61 }
 0x181   : > { %v7523_v24 = vpop.f32.mrf.mxu1  ;;  %v1748_v41 = vpop.f32.mrf.mxu0  ;;  %v6724_v39 = vrot.slane %v6708_v40, 9  ;;  %v4782_v7 = vrot.slane %v9774_v9, 5 }
 0x182   : > { %7805 = vmatmul.mubr.bf16.gmra.mxu1 %v8029_v28  ;;  %v10010_v31 = vadd.f32 %v7522_v50, %v1853_v35  ;;  %v1851_v48 = vadd.f32 %v1748_v41, %v9695_v38  ;;  %v4776_v38 = vsel %vm8829_vm5, %v4774_v51, %v4775_v59  ;;  %v4781_v28 = vrot.slane %v4779_v44, 4  ;;  %v8033_v59 = vld [vmem:[%s8385_s19 + $0x38] sm:$0xff]  }
 0x183   : > { %v2137_v54 = vpop.f32.mrf.mxu1  ;;  %7808 = vmatprep.mubr.bf16.mxu1 %v8030_v2  ;;  %v7475_v6 = vpop.f32.mrf.mxu0  ;;  %v6739_v61 = vcombine.low %v4773_v15, %v4776_v38  ;;  %v4800_v51 = vrot.slane %v9826_v1, 5  ;;  %v10774_v38 = vld [vmem:[#allocation15_spill] sm:$0xff] }
 0x184   : > { %7761 = vmatmul.mubr.bf16.gmra.mxu0 %v6736_v45  ;;  %v10013_v42 = vadd.f32 %v2134_v49, %v1851_v48  ;;  %v1854_v52 = vadd.f32 %v7475_v6, %v9711_v43  ;;  %v6709_v45 = vld [vmem:[%s8426_s8 + $0x90] sm:$0xe]  ;;  %v6711_v6 = vld [vmem:[%s8426_s8 + $0xa8] sm:$0xe] }
 0x185   : > { %v7526_v34 = vpop.f32.mrf.mxu1  ;;  %7764 = vmatprep.mubr.bf16.mxu0 %v6737_v32  ;;  %v1751_v50 = vpop.f32.mrf.mxu0  ;;  %v8032_v49 = vld [vmem:[%s8385_s19 + $0x30] sm:$0xff]   ;;  %v6725_v56 = vrot.slane %v6709_v45, 9  ;;  %v4793_v32 = vrot.slane %v9802_v20, 5 }
 0x186   : > { %v10024_v53 = vadd.f32 %v7523_v24, %v1854_v52  ;;  %v1852_v8 = vadd.f32 %v1751_v50, %v9721_v60  ;;  %v4788_v24 = vrot.slane %v4786_v63, 4  ;;  %v4789_v60 = vrot.slane %v9796_v55, 5  ;;  %v8034_v52 = vld [vmem:[%s8385_s19 + $0x40] sm:$0xff]  }
 0x187   : > { %v2150_v58 = vpop.f32.mrf.mxu1  ;;  %v7478_v19 = vpop.f32.mrf.mxu0  ;;  %v4783_v55 = vsel %vm8829_vm5, %v4781_v28, %v4782_v7  ;;  %v4795_v1 = vrot.slane %v4793_v32, 4  ;;  %v10776_v7 = vld [vmem:[#allocation16_spill] sm:$0xff]  ;;  %v10777_v28 = vld [vmem:[#allocation23_spill] sm:$0xff] }
 0x188   : > { %v10030_v26 = vadd.f32 %v2137_v54, %v1852_v8  ;;  %v1857_v21 = vadd.f32 %v7478_v19, %v9743_v46  ;;  %v4780_v46 = vsel %vm8829_vm5, %v6724_v39, %v4779_v44  ;;  %v4790_v18 = vsel %vm8829_vm5, %v4788_v24, %v4789_v60  ;;  %v10773_v44 = vld [vmem:[#allocation18_spill] sm:$0xff]  ;;  %v10775_v19 = vld [vmem:[#allocation21_spill] sm:$0xff] }
 0x189   : > { %v7527_v43 = vpop.f32.mrf.mxu1  ;;  %v1764_v25 = vpop.f32.mrf.mxu0  ;;  %v6740_v40 = vcombine.low %v4780_v46, %v4783_v55  ;;  %v4796_v50 = vrot.slane %v10773_v44, 5  ;;  %v10778_v24 = vld [vmem:[#allocation17_spill] sm:$0xff]  ;;  %v6712_v46 = vld [vmem:[%s8426_s8 + $0xb4] sm:$0xe] }
 0x18a   : > { %7809 = vmatmul.mubr.bf16.gmra.mxu1 %v8031_v13  ;;  %v10034_v62 = vadd.f32 %v7526_v34, %v1857_v21  ;;  %v1855_v2 = vadd.f32 %v1764_v25, %v9759_v22  ;;  %v6710_v22 = vld [vmem:[%s8426_s8 + $0x9c] sm:$0xe]  ;;  %v4807_v25 = vrot.slane %v10777_v28, 5 }
 0x18b   : > { %v2153_v23 = vpop.f32.mrf.mxu1  ;;  %7812 = vmatprep.mubr.bf16.mxu1 %v8032_v49  ;;  %v7479_v9 = vpop.f32.mrf.mxu0  ;;  %v6726_v20 = vrot.slane %v6710_v22, 9  ;;  %v4802_v49 = vrot.slane %v4800_v51, 4  ;;  %v10779_v22 = vld [vmem:[#allocation28_spill] sm:$0xff] }
 0x18c   : > { %7765 = vmatmul.mubr.bf16.gmra.mxu0 %v6738_v14  ;;  %v10039_v29 = vadd.f32 %v2150_v58, %v1855_v2  ;;  %v1858_v35 = vadd.f32 %v7479_v9, %v9771_v33  ;;  %v4787_v14 = vsel %vm8829_vm5, %v6725_v56, %v4786_v63  ;;  %v4809_v44 = vrot.slane %v4807_v25, 4 }
 0x18d   : > { %v7530_v0 = vpop.f32.mrf.mxu1  ;;  %7768 = vmatprep.mubr.bf16.mxu0 %v6739_v61  ;;  %v1767_v41 = vpop.f32.mrf.mxu0  ;;  %v6741_v8 = vcombine.low %v4787_v14, %v4790_v18  ;;  %v4794_v2 = vsel %vm8829_vm5, %v6726_v20, %v4793_v32  ;;  %v8035_v14 = vld [vmem:[%s8385_s19 + $0x48] sm:$0xff]   ;;  %v6728_v20 = vrot.slane %v6712_v46, 9 }
 0x18e   : > { %v10052_v48 = vadd.f32 %v7527_v43, %v1858_v35  ;;  %v1856_v33 = vadd.f32 %v1767_v41, %v9778_v10  ;;  %v6727_v43 = vrot.slane %v6711_v6, 9  ;;  %v4803_v10 = vrot.slane %v10775_v19, 5  ;;  %v6713_v6 = vld [vmem:[%s8426_s8 + $0xc0] sm:$0xe] }
 0x18f   : > { %v2166_v54 = vpop.f32.mrf.mxu1  ;;  %v7482_v58 = vpop.f32.mrf.mxu0  ;;  %v4814_v41 = vrot.slane %v10779_v22, 5  ;;  %v10783_v19 = vld [vmem:[#allocation30_spill] sm:$0xff] }
 0x190   : > { %v10058_v15 = vadd.f32 %v2153_v23, %v1856_v33  ;;  %v1861_v63 = vadd.f32 %v7482_v58, %v10774_v38  ;;  %v4801_v55 = vsel %vm8829_vm5, %v6727_v43, %v4800_v51  ;;  %v10781_v51 = vld [vmem:[#allocation20_spill] sm:$0xff] }
 0x191   : > { %v7531_v34 = vpop.f32.mrf.mxu1  ;;  %v1780_v45 = vpop.f32.mrf.mxu0 }
 0x192   : > { %7813 = vmatmul.mubr.bf16.gmra.mxu1 %v8033_v59  ;;  %v10062_v39 = vadd.f32 %v7530_v0, %v1861_v63  ;;  %v1859_v21 = vadd.f32 %v1780_v45, %v10776_v7  ;;  %v4797_v0 = vsel %vm8829_vm5, %v4795_v1, %v4796_v50  ;;  %v10780_v59 = vld [vmem:[#allocation19_spill] sm:$0xff]  ;;  %v10782_v1 = vld [vmem:[#allocation25_spill] sm:$0xff] }
 0x193   : > { %v2169_v13 = vpop.f32.mrf.mxu1  ;;  %7816 = vmatprep.mubr.bf16.mxu1 %v8034_v52  ;;  %v7483_v23 = vpop.f32.mrf.mxu0  ;;  %v8036_v52 = vld [vmem:[%s8385_s19 + $0x50] sm:$0xff]   ;;  %v4810_v45 = vrot.slane %v10782_v1, 5 }
 0x194   : > { %7769 = vmatmul.mubr.bf16.gmra.mxu0 %v6740_v40  ;;  %v10066_v56 = vadd.f32 %v2166_v54, %v1859_v21  ;;  %v1862_v60 = vadd.f32 %v7483_v23, %v10778_v24  ;;  %v4804_v54 = vsel %vm8829_vm5, %v4802_v49, %v4803_v10  ;;  %v6742_v40 = vcombine.low %v4794_v2, %v4797_v0  ;;  %v10784_v21 = vld [vmem:[#allocation22_spill] sm:$0xff]  ;;  %v10785_v2 = vld [vmem:[#allocation24_spill] sm:$0xff] }
 0x195   : > { %v7534_v61 = vpop.f32.mrf.mxu1  ;;  %7772 = vmatprep.mubr.bf16.mxu0 %v6741_v8  ;;  %v1783_v35 = vpop.f32.mrf.mxu0  ;;  %v6743_v8 = vcombine.low %v4801_v55, %v4804_v54  ;;  %v4816_v49 = vrot.slane %v4814_v41, 4  ;;  %v4817_v10 = vrot.slane %v10783_v19, 5  ;;  %v4808_v24 = vsel %vm8829_vm5, %v6728_v20, %v4807_v25  ;;  %v10786_v55 = vld [vmem:[#allocation32_spill] sm:$0xff]  ;;  %v8037_v25 = vld [vmem:[%s8385_s19 + $0x58] sm:$0xff]  }
 0x196   : > { %v10080_v18 = vadd.f32 %v7531_v34, %v1862_v60  ;;  %v1860_v33 = vadd.f32 %v1783_v35, %v10780_v59  ;;  %v6729_v34 = vrot.slane %v6713_v6, 9  ;;  %v6714_v35 = vld [vmem:[%s8426_s8 + $0xcc] sm:$0xe]  ;;  %v4821_v54 = vrot.slane %v10786_v55, 5  ;;  %s10475_s8 = scalar_lea.vmem [#allocation8], %s8381_s17 }
 0x197   : > { %v2182_v9 = vpop.f32.mrf.mxu1  ;;  %v7486_v58 = vpop.f32.mrf.mxu0  ;;  %v4818_v59 = vsel %vm8829_vm5, %v4816_v49, %v4817_v10  ;;  %v10789_v49 = vld [vmem:[#allocation29_spill] sm:$0xff] }
 0x198   : > { %v10085_v50 = vadd.f32 %v2169_v13, %v1860_v33  ;;  %v1865_v38 = vadd.f32 %v7486_v58, %v10781_v51  ;;  %v10787_v33 = vld [vmem:[#allocation26_spill] sm:$0xff]  ;;  %v4824_v51 = vrot.slane %v9893_v16, 5 }
 0x199   : > { %v7535_v32 = vpop.f32.mrf.mxu1  ;;  %v1796_v43 = vpop.f32.mrf.mxu0  ;;  %v8038_v58 = vld [vmem:[%s8385_s19 + $0x60] sm:$0xff]  }
 0x19a   : > { %7817 = vmatmul.mubr.bf16.gmra.mxu1 %v8035_v14  ;;  %v10090_v7 = vadd.f32 %v7534_v61, %v1865_v38  ;;  %v1863_v23 = vadd.f32 %v1796_v43, %v10784_v21  ;;  %v4811_v61 = vsel %vm8829_vm5, %v4809_v44, %v4810_v45  ;;  %v4815_v14 = vsel %vm8829_vm5, %v6729_v34, %v4814_v41 }
 0x19b   : > { %v2185_v63 = vpop.f32.mrf.mxu1  ;;  %7820 = vmatprep.mubr.bf16.mxu1 %v8036_v52  ;;  %v7487_v28 = vpop.f32.mrf.mxu0  ;;  %v6744_v20 = vcombine.low %v4808_v24, %v4811_v61  ;;  %v6730_v44 = vrot.slane %v6714_v35, 9  ;;  %v6745_v45 = vcombine.low %v4815_v14, %v4818_v59  ;;  %v4823_v43 = vrot.slane %v4821_v54, 4  ;;  %v10791_v35 = vld [vmem:[#allocation33_spill] sm:$0xff]  ;;  %v8040_v14 = vld [vmem:[%s8385_s19 + $0x70] sm:$0xff]  }
 0x19c   : > { %7773 = vmatmul.mubr.bf16.gmra.mxu0 %v6742_v40  ;;  %v10095_v60 = vadd.f32 %v2182_v9, %v1863_v23  ;;  %v1866_v0 = vadd.f32 %v7487_v28, %v10785_v2 }
 0x19d   : > { %v7538_v13 = vpop.f32.mrf.mxu1  ;;  %7776 = vmatprep.mubr.bf16.mxu0 %v6743_v8  ;;  %v1799_v22 = vpop.f32.mrf.mxu0  ;;  %v10788_v8 = vld [vmem:[#allocation27_spill] sm:$0xff]  ;;  %v4822_v28 = vsel %vm8829_vm5, %v6730_v44, %v4821_v54  ;;  %v4825_v24 = vsel %vm8829_vm5, %v4823_v43, %v4824_v51 }
 0x19e   : > { %v10107_v9 = vadd.f32 %v7535_v32, %v1866_v0  ;;  %v1864_v6 = vadd.f32 %v1799_v22, %v10787_v33  ;;  %v8039_v0 = vld [vmem:[%s8385_s19 + $0x68] sm:$0xff]   ;;  %v6746_v59 = vcombine.low %v4822_v28, %v4825_v24  ;;  %v10792_v33 = vld [vmem:[#allocation34_spill] sm:$0xff] }
 0x19f   : > { %v2198_v46 = vpop.f32.mrf.mxu1  ;;  %v7490_v40 = vpop.f32.mrf.mxu0 }
 0x1a0   : > { %v10112_v38 = vadd.f32 %v2185_v63, %v1864_v6  ;;  %v1869_v1 = vadd.f32 %v7490_v40, %v10788_v8  ;;  %v10790_v63 = vld [vmem:[#allocation31_spill] sm:$0xff] }
 0x1a1   : > { %v7539_v52 = vpop.f32.mrf.mxu1  ;;  %v1812_v34 = vpop.f32.mrf.mxu0 }
 0x1a2   : > { %7821 = vmatmul.mubr.bf16.gmra.mxu1 %v8037_v25  ;;  %v10115_v32 = vadd.f32 %v7538_v13, %v1869_v1  ;;  %v1867_v19 = vadd.f32 %v1812_v34, %v10789_v49 }
 0x1a3   : > { %v2201_v41 = vpop.f32.mrf.mxu1  ;;  %7824 = vmatprep.mubr.bf16.mxu1 %v8038_v58  ;;  %v7491_v21 = vpop.f32.mrf.mxu0 }
 0x1a4   : > { %7777 = vmatmul.mubr.bf16.gmra.mxu0 %v6744_v20  ;;  %v10118_v16 = vadd.f32 %v2198_v46, %v1867_v19  ;;  %v1870_v23 = vadd.f32 %v7491_v21, %v10790_v63 }
 0x1a5   : > { %v7542_v10 = vpop.f32.mrf.mxu1  ;;  %7780 = vmatprep.mubr.bf16.mxu0 %v6745_v45  ;;  %v1815_v2 = vpop.f32.mrf.mxu0 }
 0x1a6   : > { %v10126_v61 = vadd.f32 %v7539_v52, %v1870_v23  ;;  %v1868_v55 = vadd.f32 %v1815_v2, %v10791_v35 }
 0x1a7   : > { %v2214_v13 = vpop.f32.mrf.mxu1  ;;  %v7494_v46 = vpop.f32.mrf.mxu0 }
 0x1a8   : > { %v10130_v25 = vadd.f32 %v2201_v41, %v1868_v55  ;;  %v1873_v6 = vadd.f32 %v7494_v46, %v10792_v33  ;;  %v8041_v41 = vld [vmem:[%s8385_s19 + $0x78] sm:$0xff]   ;;  %s10450_s19 = scalar_lea.vmem [#allocation5], %s8381_s17  ;;  %s10730_s17 = sshll.u32 %s8300_s28, 11 }
 0x1a9   : > { %v7543_v22 = vpop.f32.mrf.mxu1  ;;  %v1828_v58 = vpop.f32.mrf.mxu0  ;;  %s6066_s22 = sshll.u32 %s10450_s19, 4  ;;  %s10550_s16 = scalar_lea.hbm %s10716_s4, %s10730_s17  ;;  %s10552_s22 = int_to_ptr.vmem [resolvable:$true] %s6066_s22 }
 0x1aa   : > { %7825 = vmatmul.mubr.bf16.gmra.mxu1 %v8039_v0  ;;  %v10133_v4 = vadd.f32 %v7542_v10, %v1873_v6  ;;  %v1871_v40 = vadd.f32 %v1828_v58, %v9906_v57  ;;  %s8078_s9 = scalar_lea.vmem %s10552_s22, 2048  ;;  %p8085_p7 = scmp.lt.s32.totalorder %s10552_s22, %s8083_s11 }
 0x1ab   : > { %v2217_v54 = vpop.f32.mrf.mxu1  ;;  %7828 = vmatprep.mubr.bf16.mxu1 %v8040_v14  ;;  %v7495_v20 = vpop.f32.mrf.mxu0  ;;  %p8079_p12 = scmp.ne.s32.totalorder %s10552_s22, %s8078_s9  ;;  %p8086_p8 = scmp.lt.s32.totalorder %s8084_s20, %s8078_s9 }
 0x1ac   : > { %7781 = vmatmul.mubr.bf16.gmra.mxu0 %v6746_v59  ;;  %v10136_v44 = vadd.f32 %v2214_v13, %v1871_v40  ;;  %v1874_v51 = vadd.f32 %v7495_v20, %v9913_v11 }
 0x1ad   : > { %v7610_v52 = vpop.f32.mrf.mxu1  ;;  %v1831_v1 = vpop.f32.mrf.mxu0  ;;  %p8080_p4 = pnand %p8079_p12, %p10831_p13  ;;  %p8087_p10 = por %p8086_p8, %p8085_p7 }
 0x1ae   : > { %v10140_v45 = vadd.f32 %v7543_v22, %v1874_v51  ;;  %v1872_v43 = vadd.f32 %v1831_v1, %v9919_v47 }
 0x1af   : > { %v3352_v8 = vpop.f32.mrf.mxu1  ;;  %v7562_v49 = vpop.f32.mrf.mxu0  ;;  %p8081_p5 = pneg %p8080_p4 }
 0x1b0   : > { %v10143_v19 = vadd.f32 %v2217_v54, %v1872_v43  ;;  %v2984_v57 = vadd.f32 %v7562_v49, %v9943_v17 }
 0x1b1   : > { %v7611_v34 = vpop.f32.mrf.mxu1  ;;  %v2855_v21 = vpop.f32.mrf.mxu0  ;;  %p8088_p0 = pnand %p8087_p10, %p8081_p5 }
 0x1b2   : > { %7829 = vmatmul.mubr.bf16.gmra.mxu1 %v8041_v41  ;;  %v10146_v63 = vadd.f32 %v7610_v52, %v2984_v57  ;;  %v2982_v11 = vadd.f32 %v2855_v21, %v9952_v37 }
 0x1b3   : > { %v3355_v10 = vpop.f32.mrf.mxu1  ;;  %v7563_v28 = vpop.f32.mrf.mxu0 }
 0x1b4   : > { %v10149_v24 = vadd.f32 %v3352_v8, %v2982_v11  ;;  %v2985_v13 = vadd.f32 %v7563_v28, %v9962_v27 }
 0x1b5   : > { %v7614_v23 = vpop.f32.mrf.mxu1  ;;  %v2858_v2 = vpop.f32.mrf.mxu0 }
 0x1b6   : > { %v10152_v0 = vadd.f32 %v7611_v34, %v2985_v13  ;;  %v2983_v35 = vadd.f32 %v2858_v2, %v9975_v3 }
 0x1b7   : > { %v3368_v47 = vpop.f32.mrf.mxu1  ;;  %v7566_v55 = vpop.f32.mrf.mxu0 }
 0x1b8   : > { %v10155_v22 = vadd.f32 %v3355_v10, %v2983_v35  ;;  %v2988_v14 = vadd.f32 %v7566_v55, %v9981_v12 }
 0x1b9   : > { %v7615_v17 = vpop.f32.mrf.mxu1  ;;  %v2871_v37 = vpop.f32.mrf.mxu0 }
 0x1ba   : > { %v10158_v59 = vadd.f32 %v7614_v23, %v2988_v14  ;;  %v2986_v33 = vadd.f32 %v2871_v37, %v9988_v5 }
 0x1bb   : > { %v3371_v46 = vpop.f32.mrf.mxu1  ;;  %v7567_v27 = vpop.f32.mrf.mxu0 }
 0x1bc   : > { %v10161_v54 = vadd.f32 %v3368_v47, %v2986_v33  ;;  %v2989_v58 = vadd.f32 %v7567_v27, %v9999_v36 }
 0x1bd   : > { %v7618_v6 = vpop.f32.mrf.mxu1  ;;  %v2874_v3 = vpop.f32.mrf.mxu0 }
 0x1be   : > { %v10164_v52 = vadd.f32 %v7615_v17, %v2989_v58  ;;  %v2987_v20 = vadd.f32 %v2874_v3, %v10006_v30 }
 0x1bf   : > { %v3384_v40 = vpop.f32.mrf.mxu1  ;;  %v7570_v12 = vpop.f32.mrf.mxu0 }
 0x1c0   : > { %v10167_v8 = vadd.f32 %v3371_v46, %v2987_v20  ;;  %v2992_v1 = vadd.f32 %v7570_v12, %v10010_v31 }
 0x1c1   : > { %v7619_v51 = vpop.f32.mrf.mxu1  ;;  %v2887_v5 = vpop.f32.mrf.mxu0 }
 0x1c2   : > { %v10170_v43 = vadd.f32 %v7618_v6, %v2992_v1  ;;  %v2990_v34 = vadd.f32 %v2887_v5, %v10013_v42 }
 0x1c3   : > { %v3387_v41 = vpop.f32.mrf.mxu1  ;;  %v7571_v36 = vpop.f32.mrf.mxu0 }
 0x1c4   : > { %v10173_v57 = vadd.f32 %v3384_v40, %v2990_v34  ;;  %v2993_v10 = vadd.f32 %v7571_v36, %v10024_v53 }
 0x1c5   : > { %v7622_v49 = vpop.f32.mrf.mxu1  ;;  %v2890_v30 = vpop.f32.mrf.mxu0 }
 0x1c6   : > { %v10176_v11 = vadd.f32 %v7619_v51, %v2993_v10  ;;  %v2991_v23 = vadd.f32 %v2890_v30, %v10030_v26 }
 0x1c7   : > { %v3400_v21 = vpop.f32.mrf.mxu1  ;;  %v7574_v31 = vpop.f32.mrf.mxu0 }
 0x1c8   : > { %v10179_v13 = vadd.f32 %v3387_v41, %v2991_v23  ;;  %v2996_v47 = vadd.f32 %v7574_v31, %v10034_v62 }
 0x1c9   : > { %v7623_v28 = vpop.f32.mrf.mxu1  ;;  %v2903_v42 = vpop.f32.mrf.mxu0 }
 0x1ca   : > { %v10182_v35 = vadd.f32 %v7622_v49, %v2996_v47  ;;  %v2994_v17 = vadd.f32 %v2903_v42, %v10039_v29 }
 0x1cb   : > { %v3403_v2 = vpop.f32.mrf.mxu1  ;;  %v7575_v53 = vpop.f32.mrf.mxu0 }
 0x1cc   : > { %v10185_v14 = vadd.f32 %v3400_v21, %v2994_v17  ;;  %v2997_v46 = vadd.f32 %v7575_v53, %v10052_v48 }
 0x1cd   : > { %v7626_v55 = vpop.f32.mrf.mxu1  ;;  %v2906_v26 = vpop.f32.mrf.mxu0 }
 0x1ce   : > { %v10188_v33 = vadd.f32 %v7623_v28, %v2997_v46  ;;  %v2995_v6 = vadd.f32 %v2906_v26, %v10058_v15 }
 0x1cf   : > { %v3416_v37 = vpop.f32.mrf.mxu1  ;;  %v7578_v62 = vpop.f32.mrf.mxu0 }
 0x1d0   : > { %v10191_v58 = vadd.f32 %v3403_v2, %v2995_v6  ;;  %v3000_v40 = vadd.f32 %v7578_v62, %v10062_v39 }
 0x1d1   : > { %v7627_v27 = vpop.f32.mrf.mxu1  ;;  %v2919_v29 = vpop.f32.mrf.mxu0 }
 0x1d2   : > { %v10194_v20 = vadd.f32 %v7626_v55, %v3000_v40  ;;  %v2998_v51 = vadd.f32 %v2919_v29, %v10066_v56 }
 0x1d3   : > { %v3419_v3 = vpop.f32.mrf.mxu1  ;;  %v7579_v48 = vpop.f32.mrf.mxu0 }
 0x1d4   : > { %v10197_v1 = vadd.f32 %v3416_v37, %v2998_v51  ;;  %v3001_v41 = vadd.f32 %v7579_v48, %v10080_v18 }
 0x1d5   : > { %v7630_v12 = vpop.f32.mrf.mxu1  ;;  %v2922_v15 = vpop.f32.mrf.mxu0 }
 0x1d6   : > { %v10200_v34 = vadd.f32 %v7627_v27, %v3001_v41  ;;  %v2999_v49 = vadd.f32 %v2922_v15, %v10085_v50 }
 0x1d7   : > { %v3432_v5 = vpop.f32.mrf.mxu1  ;;  %v7582_v39 = vpop.f32.mrf.mxu0 }
 0x1d8   : > { %v10203_v10 = vadd.f32 %v3419_v3, %v2999_v49  ;;  %v3004_v21 = vadd.f32 %v7582_v39, %v10090_v7 }
 0x1d9   : > { %v7631_v36 = vpop.f32.mrf.mxu1  ;;  %v2935_v56 = vpop.f32.mrf.mxu0 }
 0x1da   : > { %v10206_v23 = vadd.f32 %v7630_v12, %v3004_v21  ;;  %v3002_v28 = vadd.f32 %v2935_v56, %v10095_v60 }
 0x1db   : > { %v3435_v30 = vpop.f32.mrf.mxu1  ;;  %v7583_v18 = vpop.f32.mrf.mxu0 }
 0x1dc   : > { %v10209_v47 = vadd.f32 %v3432_v5, %v3002_v28  ;;  %v3005_v2 = vadd.f32 %v7583_v18, %v10107_v9 }
 0x1dd   : > { %v7634_v31 = vpop.f32.mrf.mxu1  ;;  %v2938_v50 = vpop.f32.mrf.mxu0 }
 0x1de   : > { %v10212_v17 = vadd.f32 %v7631_v36, %v3005_v2  ;;  %v3003_v55 = vadd.f32 %v2938_v50, %v10112_v38 }
 0x1df   : > { %v3448_v42 = vpop.f32.mrf.mxu1  ;;  %v7586_v7 = vpop.f32.mrf.mxu0 }
 0x1e0   : > { %v10215_v46 = vadd.f32 %v3435_v30, %v3003_v55  ;;  %v3008_v37 = vadd.f32 %v7586_v7, %v10115_v32 }
 0x1e1   : > { %v7635_v53 = vpop.f32.mrf.mxu1  ;;  %v2951_v60 = vpop.f32.mrf.mxu0 }
 0x1e2   : > { %10793 = vst [vmem:[#allocation18_spill] sm:$0xff] %v10215_v46  ;;  %v10218_v6 = vadd.f32 %v7634_v31, %v3008_v37  ;;  %v3006_v27 = vadd.f32 %v2951_v60, %v10118_v16 }
 0x1e3   : > { %v3451_v26 = vpop.f32.mrf.mxu1  ;;  %v7587_v62 = vpop.f32.mrf.mxu0 }
 0x1e4   : > { %v10221_v9 = vadd.f32 %v3448_v42, %v3006_v27  ;;  %v3009_v40 = vadd.f32 %v7587_v62, %v10126_v61 }
 0x1e5   : > { %v7638_v3 = vpop.f32.mrf.mxu1  ;;  %v2954_v29 = vpop.f32.mrf.mxu0 }
 0x1e6   : > { %v10224_v38 = vadd.f32 %v7635_v53, %v3009_v40  ;;  %v3007_v51 = vadd.f32 %v2954_v29, %v10130_v25 }
 0x1e7   : > { %v3464_v12 = vpop.f32.mrf.mxu1  ;;  %v7590_v48 = vpop.f32.mrf.mxu0 }
 0x1e8   : > { %10794 = vst [vmem:[#allocation15_spill] sm:$0xff] %v10224_v38  ;;  %v10227_v32 = vadd.f32 %v3451_v26, %v3007_v51  ;;  %v3012_v41 = vadd.f32 %v7590_v48, %v10133_v4 }
 0x1e9   : > { %v7639_v5 = vpop.f32.mrf.mxu1  ;;  %v2967_v15 = vpop.f32.mrf.mxu0 }
 0x1ea   : > { %10795 = vst [vmem:[#allocation21_spill] sm:$0xff] %v10227_v32  ;;  %v10230_v16 = vadd.f32 %v7638_v3, %v3012_v41  ;;  %v3010_v49 = vadd.f32 %v2967_v15, %v10136_v44 }
 0x1eb   : > { %v7591_v36 = vpop.f32.mrf.mxu0  ;;  %v3467_v61 = vpop.f32.mrf.mxu1 }
 0x1ec   : > { %v10233_v39 = vadd.f32 %v3464_v12, %v3010_v49  ;;  %v3013_v21 = vadd.f32 %v7591_v36, %v10140_v45 }
 0x1ed   : > { %v2970_v30 = vpop.f32.mrf.mxu0  ;;  %v10239_v31 = vpop.f32.mrf.mxu1 }
 0x1ee   : > { %v10236_v25 = vadd.f32 %v7639_v5, %v3013_v21  ;;  %v3011_v56 = vadd.f32 %v2970_v30, %v10143_v19 }
 0x1ef   : > { %v7658_v28 = vpop.f32.mrf.mxu0  ;;  %v10246_v2 = vpop.f32.mrf.mxu1 }
 0x1f0   : > { %10796 = vst [vmem:[#allocation16_spill] sm:$0xff] %v10236_v25  ;;  %v10241_v4 = vadd.f32 %v3467_v61, %v3011_v56  ;;  %v10244_v18 = vadd.f32 %v7658_v28, %v10146_v63 }
 0x1f1   : > { %v3738_v44 = vpop.f32.mrf.mxu0  ;;  %v10253_v50 = vpop.f32.mrf.mxu1 }
 0x1f2   : > { %10797 = vst [vmem:[#allocation23_spill] sm:$0xff] %v10241_v4  ;;  %v10249_v42 = vadd.f32 %v3738_v44, %v10149_v24 }
 0x1f3   : > { %v10251_v45 = vpop.f32.mrf.mxu0  ;;  %v10257_v19 = vpop.f32.mrf.mxu1 }
 0x1f5   : > { %v10255_v55 = vpop.f32.mrf.mxu0  ;;  %v10262_v63 = vpop.f32.mrf.mxu1 }
 0x1f7   : > { %v7662_v53 = vpop.f32.mrf.mxu0  ;;  %v10267_v24 = vpop.f32.mrf.mxu1 }
 0x1f8   : > { %v10260_v7 = vadd.f32 %v7662_v53, %v10158_v59 }
 0x1f9   : > { %v3754_v37 = vpop.f32.mrf.mxu0  ;;  %v10269_v27 = vpop.f32.mrf.mxu1 }
 0x1fa   : > { %v10265_v26 = vadd.f32 %v3754_v37, %v10161_v54 }
 0x1fb   : > { %v7663_v60 = vpop.f32.mrf.mxu0  ;;  %v10271_v40 = vpop.f32.mrf.mxu1 }
 0x1fd   : > { %v3757_v62 = vpop.f32.mrf.mxu0 }
 0x1ff   : > { %v7666_v3 = vpop.f32.mrf.mxu0 }
 0x200   : > { %v10274_v29 = vadd.f32 %v7666_v3, %v10170_v43 }
 0x201   : > { %v3770_v59 = vpop.f32.mrf.mxu0  ;;  %v10279_v12 = vpop.f32.mrf.mxu1 }
 0x202   : > { %v10277_v51 = vadd.f32 %v3770_v59, %v10173_v57 }
 0x203   : > { %v7667_v54 = vpop.f32.mrf.mxu0  ;;  %v10281_v48 = vpop.f32.mrf.mxu1 }
 0x205   : > { %v3773_v41 = vpop.f32.mrf.mxu0  ;;  %v10283_v5 = vpop.f32.mrf.mxu1 }
 0x207   : > { %v7670_v15 = vpop.f32.mrf.mxu0  ;;  %v10288_v36 = vpop.f32.mrf.mxu1 }
 0x208   : > { %v10286_v49 = vadd.f32 %v7670_v15, %v10182_v35 }
 0x209   : > { %v3786_v43 = vpop.f32.mrf.mxu0 }
 0x20a   : > { %v10291_v61 = vadd.f32 %v3786_v43, %v10185_v14 }
 0x20b   : > { %v7671_v57 = vpop.f32.mrf.mxu0 }
 0x20c   : > { %v10293_v21 = vpop.f32.mrf.mxu1 }
 0x20d   : > { %v3789_v30 = vpop.f32.mrf.mxu0 }
 0x20e   : > { %v10295_v56 = vpop.f32.mrf.mxu1 }
 0x20f   : > { %v7674_v28 = vpop.f32.mrf.mxu0 }
 0x210   : > { %v10298_v44 = vadd.f32 %v7674_v28, %v10194_v20  ;;  %v10300_v53 = vpop.f32.mrf.mxu1 }
 0x211   : > { %v3802_v35 = vpop.f32.mrf.mxu0 }
 0x212   : > { %10798 = vst [vmem:[#allocation17_spill] sm:$0xff] %v10298_v44  ;;  %v10303_v37 = vadd.f32 %v3802_v35, %v10197_v1  ;;  %v10305_v3 = vpop.f32.mrf.mxu1 }
 0x213   : > { %v7675_v14 = vpop.f32.mrf.mxu0 }
 0x214   : > { %10799 = vst [vmem:[#allocation28_spill] sm:$0xff] %v10303_v37 }
 0x215   : > { %v3805_v59 = vpop.f32.mrf.mxu0 }
 0x216   : > { %v10307_v15 = vpop.f32.mrf.mxu1 }
 0x217   : > { %10800 = vst [vmem:[#allocation19_spill] sm:$0xff] %v10307_v15  ;;  %v7678_v43 = vpop.f32.mrf.mxu0 }
 0x218   : > { %v10310_v4 = vadd.f32 %v7678_v43, %v10206_v23  ;;  %v10312_v25 = vpop.f32.mrf.mxu1 }
 0x219   : > { %10802 = vst [vmem:[#allocation25_spill] sm:$0xff] %v10312_v25  ;;  %v3818_v20 = vpop.f32.mrf.mxu0 }
 0x21a   : > { %10801 = vst [vmem:[#allocation20_spill] sm:$0xff] %v10310_v4  ;;  %v10315_v28 = vadd.f32 %v3818_v20, %v10209_v47  ;;  %v10317_v32 = vpop.f32.mrf.mxu1 }
 0x21b   : > { %10804 = vst [vmem:[#allocation22_spill] sm:$0xff] %v10317_v32  ;;  %v7679_v1 = vpop.f32.mrf.mxu0 }
 0x21c   : > { %10803 = vst [vmem:[#allocation30_spill] sm:$0xff] %v10315_v28  ;;  %v10319_v35 = vpop.f32.mrf.mxu1 }
 0x21d   : > { %10805 = vst [vmem:[#allocation24_spill] sm:$0xff] %v10319_v35  ;;  %v3821_v38 = vpop.f32.mrf.mxu0 }
 0x21e   : > { %v10321_v37 = vpop.f32.mrf.mxu1 }
 0x21f   : > { %10806 = vst [vmem:[#allocation32_spill] sm:$0xff] %v10321_v37  ;;  %v7682_v44 = vpop.f32.mrf.mxu0 }
 0x220   : > { %v10324_v15 = vadd.f32 %v7682_v44, %v10218_v6  ;;  %v4571_v23 = vpop.f32.mrf.mxu1 }
 0x221   : > { %v3834_v43 = vpop.f32.mrf.mxu0 }
 0x222   : > { %10807 = vst [vmem:[#allocation26_spill] sm:$0xff] %v10324_v15  ;;  %v10327_v4 = vadd.f32 %v3834_v43, %v10221_v9  ;;  %v10329_v25 = vpop.f32.mrf.mxu1  ;;  %v3868_v43 = vadd.f32 %v10251_v45, %v10152_v0  ;;  %v3874_v0 = vadd.f32 %v3773_v41, %v10179_v13 }
 0x223   : > { %v7683_v47 = vpop.f32.mrf.mxu0 }
 0x224   : > { %10808 = vst [vmem:[#allocation27_spill] sm:$0xff] %v10327_v4  ;;  %v4574_v28 = vpop.f32.mrf.mxu1  ;;  %v3866_v4 = vadd.f32 %v10255_v55, %v10155_v22  ;;  %v4621_v22 = vadd.f32 %v10253_v50, %v3868_v43  ;;  %v3878_v55 = vadd.f32 %v3789_v30, %v10191_v58  ;;  %v10387_v58 = vadd.f32 %v10281_v48, %v10277_v51  ;;  %v10813_v51 = vld [vmem:[#allocation17_spill] sm:$0xff] }
 0x225   : > { %v10331_v20 = vpop.f32.mrf.mxu0 }
 0x226   : > { %10809 = vst [vmem:[#allocation29_spill] sm:$0xff] %v10331_v20 }
 0x227   : > { %v7686_v32 = vpop.f32.mrf.mxu0 }
 0x228   : > { %v10334_v35 = vadd.f32 %v7686_v32, %v10230_v16  ;;  %v3872_v32 = vadd.f32 %v7663_v60, %v10164_v52  ;;  %v3870_v16 = vadd.f32 %v3757_v62, %v10167_v8  ;;  %v4619_v52 = vadd.f32 %v10257_v19, %v3866_v4  ;;  %v10812_v62 = vld [vmem:[#allocation18_spill] sm:$0xff] }
 0x229   : > { %v3850_v37 = vpop.f32.mrf.mxu0  ;;  %v3880_v8 = vadd.f32 %v7671_v57, %v10188_v33  ;;  %v10383_v33 = vadd.f32 %v10279_v12, %v10274_v29  ;;  %v3884_v4 = vadd.f32 %v7675_v14, %v10200_v34  ;;  %v10814_v12 = vld [vmem:[#allocation19_spill] sm:$0xff]  ;;  %v10820_v14 = vld [vmem:[#allocation20_spill] sm:$0xff] }
 0x22a   : > { %10810 = vst [vmem:[#allocation31_spill] sm:$0xff] %v10334_v35  ;;  %v7730_v46 = vpop.f32.mrf.mxu1  ;;  %v10337_v6 = vadd.f32 %v3850_v37, %v10233_v39  ;;  %v4620_v37 = vadd.f32 %v10239_v31, %v10244_v18  ;;  %v3876_v35 = vadd.f32 %v7667_v54, %v10176_v11  ;;  %v10369_v31 = vadd.f32 %v10262_v63, %v10260_v7 }
 0x22b   : > { %v10339_v44 = vpop.f32.mrf.mxu0  ;;  %v4622_v11 = vadd.f32 %v10267_v24, %v10265_v26  ;;  %v10374_v13 = vadd.f32 %v10269_v27, %v3872_v32  ;;  %v10377_v18 = vadd.f32 %v10271_v40, %v3870_v16  ;;  %v10395_v7 = vadd.f32 %v10288_v36, %v3874_v0  ;;  %v10815_v36 = vld [vmem:[#allocation28_spill] sm:$0xff] }
 0x22c   : > { %10811 = vst [vmem:[#allocation33_spill] sm:$0xff] %v10337_v6  ;;  %v10341_v15 = vpop.f32.mrf.mxu1  ;;  %v4618_v6 = vadd.f32 %v10246_v2, %v10249_v42  ;;  %v3882_v42 = vadd.f32 %v3805_v59, %v10203_v10  ;;  %v10392_v19 = vadd.f32 %v10283_v5, %v3876_v35  ;;  %v10399_v63 = vadd.f32 %v10293_v21, %v10286_v49  ;;  %v10817_v21 = vld [vmem:[#allocation22_spill] sm:$0xff]  ;;  %v10821_v59 = vld [vmem:[#allocation32_spill] sm:$0xff] }
 0x22d   : > { %v10349_v20 = vpop.f32.mrf.mxu0  ;;  %v10403_v26 = vadd.f32 %v10295_v56, %v10291_v61  ;;  %v10408_v34 = vadd.f32 %v10300_v53, %v3880_v8  ;;  %v10411_v10 = vadd.f32 %v10305_v3, %v3878_v55  ;;  %v3888_v27 = vadd.f32 %v7679_v1, %v10212_v17  ;;  %v10816_v61 = vld [vmem:[#allocation25_spill] sm:$0xff]  ;;  %v10818_v17 = vld [vmem:[#allocation24_spill] sm:$0xff]  ;;  %v10819_v56 = vld [vmem:[#allocation15_spill] sm:$0xff] }
 0x22e   : > { %v10343_v9 = vpop.f32.mrf.mxu1  ;;  %v3886_v40 = vadd.f32 %v3821_v38, %v10812_v62  ;;  %v10417_v54 = vadd.f32 %v10814_v12, %v10813_v51  ;;  %v10423_v57 = vadd.f32 %v10816_v61, %v10815_v36  ;;  %v10426_v30 = vadd.f32 %v10817_v21, %v3884_v4  ;;  %v10822_v35 = vld [vmem:[#allocation30_spill] sm:$0xff]  ;;  %v10825_v55 = vld [vmem:[#allocation29_spill] sm:$0xff]  ;;  %v10827_v62 = vld [vmem:[#allocation16_spill] sm:$0xff] }
 0x22f   : > { %v10429_v38 = vadd.f32 %v10818_v17, %v3882_v42  ;;  %v3892_v53 = vadd.f32 %v7683_v47, %v10819_v56  ;;  %v10434_v1 = vadd.f32 %v10821_v59, %v10820_v14  ;;  %v10824_v47 = vld [vmem:[#allocation21_spill] sm:$0xff] }
 0x230   : > { %v10353_v39 = vpop.f32.mrf.mxu1  ;;  %v10442_v0 = vadd.f32 %v4574_v28, %v3886_v40  ;;  %v3896_v40 = vadd.f32 %v10339_v44, %v10827_v62 }
 0x231   : > { %v10829_v56 = vld [vmem:[#allocation31_spill] sm:$0xff] }
 0x232   : > { %v10361_v45 = vpop.f32.mrf.mxu1 }
 0x234   : > { %v7754_v60 = vpop.f32.mrf.mxu0  ;;  %v10379_v2 = vpop.f32.mrf.mxu1 }
 0x235   : > { %v5117_v41 = vadd.f32 %v7754_v60, %v4620_v37  ;;  %v10440_v37 = vadd.f32 %v10329_v25, %v3888_v27  ;;  %v3890_v60 = vadd.f32 %v10825_v55, %v10824_v47  ;;  %v10826_v27 = vld [vmem:[#allocation27_spill] sm:$0xff] }
 0x236   : > { %v4988_v50 = vpop.f32.mrf.mxu0  ;;  %v10405_v24 = vpop.f32.mrf.mxu1  ;;  %v10455_v28 = vadd.f32 %v10341_v15, %v10826_v27 }
 0x237   : > { %v5115_v5 = vadd.f32 %v4988_v50, %v4618_v6  ;;  %v10437_v6 = vadd.f32 %v4571_v23, %v10822_v35  ;;  %v5346_v36 = vmul.f32 %v5117_v41, %v5117_v41  ;;  %v10466_v15 = vadd.f32 %v10353_v39, %v3890_v60 }
 0x238   : > { %v7755_v29 = vpop.f32.mrf.mxu0  ;;  %v10419_v48 = vpop.f32.mrf.mxu1 }
 0x239   : > { %v5118_v49 = vadd.f32 %v7755_v29, %v4621_v22  ;;  %v10823_v22 = vld [vmem:[#allocation26_spill] sm:$0xff]  ;;  %v5344_v42 = vmul.f32 %v5115_v5, %v5115_v5  ;;  %v10828_v29 = vld [vmem:[#allocation23_spill] sm:$0xff] }
 0x23a   : > { %v4991_v3 = vpop.f32.mrf.mxu0  ;;  %v7802_v43 = vpop.f32.mrf.mxu1  ;;  %v10445_v8 = vadd.f32 %v7730_v46, %v10823_v22  ;;  %v10458_v46 = vadd.f32 %v10343_v9, %v3892_v53  ;;  %v3894_v51 = vadd.f32 %v10349_v20, %v10828_v29  ;;  %v10470_v9 = vadd.f32 %v10361_v45, %v10829_v56 }
 0x23b   : > { %v6930_v32 = vpack.c.bf16 %v5118_v49, %v5117_v41  ;;  %v5116_v16 = vadd.f32 %v4991_v3, %v4619_v52  ;;  %v5347_v53 = vmul.f32 %v5118_v49, %v5118_v49 }
 0x23c   : > { %v7758_v4 = vpop.f32.mrf.mxu0  ;;  %v5642_v50 = vpop.f32.mrf.mxu1 }
 0x23d   : > { %7082 = vst [vmem:[%s10450_s19 + $0x8] sm:$0xff] %v6930_v32   ;;  %v6925_v23 = vpack.c.bf16 %v5116_v16, %v5115_v5  ;;  %v5307_v52 = vadd.f32 %v5116_v16, %v5115_v5  ;;  %v5345_v25 = vmul.f32 %v5116_v16, %v5116_v16  ;;  %v5121_v59 = vadd.f32 %v7758_v4, %v10369_v31 }
 0x23e   : > { %v5004_v12 = vpop.f32.mrf.mxu0  ;;  %v7803_v61 = vpop.f32.mrf.mxu1  ;;  %v5968_v31 = vmul.f32 %v7802_v43, %v7802_v43 }
 0x23f   : > { %6926 = vst [vmem:[%s10450_s19] sm:$0xff] %v6925_v23   ;;  %v5308_v5 = vadd.f32 %v5307_v52, %v5117_v41  ;;  %v5376_v21 = vadd.f32 %v5345_v25, %v5344_v42  ;;  %v5119_v17 = vadd.f32 %v5004_v12, %v4622_v11  ;;  %v7010_v44 = vpack.c.bf16 %v7803_v61, %v7802_v43  ;;  %v10830_v52 = vld [vmem:[#allocation33_spill] sm:$0xff] }
 0x240   : > { %v7759_v3 = vpop.f32.mrf.mxu0  ;;  %v5645_v20 = vpop.f32.mrf.mxu1  ;;  %v5966_v41 = vmul.f32 %v5642_v50, %v5642_v50  ;;  %v10482_v25 = vadd.f32 %v10379_v2, %v10830_v52  ;;  %v5969_v27 = vmul.f32 %v7803_v61, %v7803_v61  ;;  %v5350_v56 = vmul.f32 %v5121_v59, %v5121_v59 }
 0x241   : > { %v5377_v14 = vadd.f32 %v5376_v21, %v5346_v36  ;;  %v5309_v35 = vadd.f32 %v5308_v5, %v5118_v49  ;;  %v5122_v32 = vadd.f32 %v7759_v3, %v10374_v13  ;;  %7097 = vst [vmem:[%s10475_s8 + $0x8] sm:$0xff] %v7010_v44   ;;  %v7005_v39 = vpack.c.bf16 %v5645_v20, %v5642_v50 }
 0x242   : > { %v5929_v11 = vadd.f32 %v5645_v20, %v5642_v50  ;;  %v5967_v45 = vmul.f32 %v5645_v20, %v5645_v20  ;;  %v5007_v16 = vpop.f32.mrf.mxu0  ;;  %v7806_v22 = vpop.f32.mrf.mxu1  ;;  %v5348_v55 = vmul.f32 %v5119_v17, %v5119_v17  ;;  %v10485_v50 = vadd.f32 %v10405_v24, %v3896_v40 }
 0x243   : > { %v5310_v47 = vadd.f32 %v5309_v35, %v5119_v17  ;;  %v5378_v60 = vadd.f32 %v5377_v14, %v5347_v53  ;;  %v6940_v42 = vpack.c.bf16 %v5122_v32, %v5121_v59  ;;  %7006 = vst [vmem:[%s10475_s8] sm:$0xff] %v7005_v39   ;;  %v5120_v4 = vadd.f32 %v5007_v16, %v10377_v18 }
 0x244   : > { %v5930_v49 = vadd.f32 %v7802_v43, %v5929_v11  ;;  %v5998_v13 = vadd.f32 %v5967_v45, %v5966_v41  ;;  %v7762_v23 = vpop.f32.mrf.mxu0  ;;  %v5658_v29 = vpop.f32.mrf.mxu1  ;;  %v10489_v18 = vadd.f32 %v10419_v48, %v3894_v51 }
 0x245   : > { %v5379_v62 = vadd.f32 %v5378_v60, %v5348_v55  ;;  %7084 = vst [vmem:[%s10450_s19 + $0x18] sm:$0xff] %v6940_v42   ;;  %v5970_v5 = vmul.f32 %v5658_v29, %v5658_v29  ;;  %v6935_v43 = vpack.c.bf16 %v5120_v4, %v5119_v17  ;;  %v5311_v53 = vadd.f32 %v5310_v47, %v5120_v4 }
 0x246   : > { %v5999_v12 = vadd.f32 %v5998_v13, %v5968_v31  ;;  %v5931_v36 = vadd.f32 %v7803_v61, %v5930_v49  ;;  %v5020_v21 = vpop.f32.mrf.mxu0  ;;  %v7807_v2 = vpop.f32.mrf.mxu1  ;;  %v5349_v44 = vmul.f32 %v5120_v4, %v5120_v4  ;;  %v5125_v14 = vadd.f32 %v7762_v23, %v10383_v33 }
 0x247   : > { %v7020_v3 = vpack.c.bf16 %v7807_v2, %v7806_v22  ;;  %7083 = vst [vmem:[%s10450_s19 + $0x10] sm:$0xff] %v6935_v43   ;;  %v5312_v35 = vadd.f32 %v5311_v53, %v5121_v59  ;;  %v5123_v41 = vadd.f32 %v5020_v21, %v10387_v58  ;;  %v5351_v47 = vmul.f32 %v5122_v32, %v5122_v32 }
 0x248   : > { %v5932_v24 = vadd.f32 %v5931_v36, %v5658_v29  ;;  %v6000_v40 = vadd.f32 %v5999_v12, %v5969_v27  ;;  %v7763_v20 = vpop.f32.mrf.mxu0  ;;  %v5380_v61 = vadd.f32 %v5379_v62, %v5349_v44  ;;  %v5661_v17 = vpop.f32.mrf.mxu1  ;;  %v5972_v59 = vmul.f32 %v7806_v22, %v7806_v22 }
 0x249   : > { %v5126_v48 = vadd.f32 %v7763_v20, %v10392_v19  ;;  %7099 = vst [vmem:[%s10475_s8 + $0x18] sm:$0xff] %v7020_v3   ;;  %v7015_v39 = vpack.c.bf16 %v5661_v17, %v5658_v29  ;;  %v5971_v45 = vmul.f32 %v5661_v17, %v5661_v17  ;;  %v5313_v33 = vadd.f32 %v5312_v35, %v5122_v32 }
 0x24a   : > { %v6001_v51 = vadd.f32 %v6000_v40, %v5970_v5  ;;  %v5933_v11 = vadd.f32 %v5932_v24, %v5661_v17  ;;  %v5023_v16 = vpop.f32.mrf.mxu0  ;;  %v5381_v55 = vadd.f32 %v5380_v61, %v5350_v56  ;;  %v7810_v60 = vpop.f32.mrf.mxu1  ;;  %v5973_v19 = vmul.f32 %v7807_v2, %v7807_v2 }
 0x24b   : > { %v6950_v42 = vpack.c.bf16 %v5126_v48, %v5125_v14  ;;  %7098 = vst [vmem:[%s10475_s8 + $0x10] sm:$0xff] %v7015_v39   ;;  %v5124_v58 = vadd.f32 %v5023_v16, %v10395_v7  ;;  %v5314_v4 = vadd.f32 %v5313_v33, %v5123_v41  ;;  %v5352_v23 = vmul.f32 %v5123_v41, %v5123_v41 }
 0x24c   : > { %v5934_v31 = vadd.f32 %v7806_v22, %v5933_v11  ;;  %v6002_v49 = vadd.f32 %v6001_v51, %v5971_v45  ;;  %v7766_v13 = vpop.f32.mrf.mxu0  ;;  %v5382_v52 = vadd.f32 %v5381_v55, %v5351_v47  ;;  %v5674_v27 = vpop.f32.mrf.mxu1  ;;  %v5354_v5 = vmul.f32 %v5125_v14, %v5125_v14 }
 0x24d   : > { %7086 = vst [vmem:[%s10450_s19 + $0x28] sm:$0xff] %v6950_v42   ;;  %v5974_v12 = vmul.f32 %v5674_v27, %v5674_v27  ;;  %v6945_v36 = vpack.c.bf16 %v5124_v58, %v5123_v41  ;;  %v5315_v21 = vadd.f32 %v5314_v4, %v5124_v58  ;;  %v5353_v56 = vmul.f32 %v5124_v58, %v5124_v58 }
 0x24e   : > { %v6003_v62 = vadd.f32 %v6002_v49, %v5972_v59  ;;  %v5935_v29 = vadd.f32 %v7807_v2, %v5934_v31  ;;  %v5036_v32 = vpop.f32.mrf.mxu0  ;;  %v5383_v43 = vadd.f32 %v5382_v52, %v5352_v23  ;;  %v7811_v22 = vpop.f32.mrf.mxu1  ;;  %v5129_v24 = vadd.f32 %v7766_v13, %v10399_v63 }
 0x24f   : > { %v7030_v44 = vpack.c.bf16 %v7811_v22, %v7810_v60  ;;  %7085 = vst [vmem:[%s10450_s19 + $0x20] sm:$0xff] %v6945_v36   ;;  %v5316_v3 = vadd.f32 %v5315_v21, %v5125_v14  ;;  %v5127_v35 = vadd.f32 %v5036_v32, %v10403_v26  ;;  %v5355_v45 = vmul.f32 %v5126_v48, %v5126_v48 }
 0x250   : > { %v5936_v7 = vadd.f32 %v5935_v29, %v5674_v27  ;;  %v6004_v53 = vadd.f32 %v6003_v62, %v5973_v19  ;;  %v7767_v40 = vpop.f32.mrf.mxu0  ;;  %v5384_v20 = vadd.f32 %v5383_v43, %v5353_v56  ;;  %v5677_v2 = vpop.f32.mrf.mxu1  ;;  %v5976_v14 = vmul.f32 %v7810_v60, %v7810_v60 }
 0x251   : > { %v5130_v61 = vadd.f32 %v7767_v40, %v10408_v34  ;;  %7101 = vst [vmem:[%s10475_s8 + $0x28] sm:$0xff] %v7030_v44   ;;  %v7025_v41 = vpack.c.bf16 %v5677_v2, %v5674_v27  ;;  %v5975_v39 = vmul.f32 %v5677_v2, %v5677_v2  ;;  %v5317_v63 = vadd.f32 %v5316_v3, %v5126_v48 }
 0x252   : > { %v6005_v17 = vadd.f32 %v6004_v53, %v5974_v12  ;;  %v5937_v51 = vadd.f32 %v5936_v7, %v5677_v2  ;;  %v5039_v11 = vpop.f32.mrf.mxu0  ;;  %v5385_v16 = vadd.f32 %v5384_v20, %v5354_v5  ;;  %v7814_v47 = vpop.f32.mrf.mxu1  ;;  %v5358_v59 = vmul.f32 %v5129_v24, %v5129_v24 }
 0x253   : > { %v6960_v55 = vpack.c.bf16 %v5130_v61, %v5129_v24  ;;  %7100 = vst [vmem:[%s10475_s8 + $0x20] sm:$0xff] %v7025_v41   ;;  %v5318_v31 = vadd.f32 %v5317_v63, %v5127_v35  ;;  %v5356_v34 = vmul.f32 %v5127_v35, %v5127_v35  ;;  %v5128_v13 = vadd.f32 %v5039_v11, %v10411_v10 }
 0x254   : > { %v5938_v33 = vadd.f32 %v7810_v60, %v5937_v51  ;;  %v6006_v42 = vadd.f32 %v6005_v17, %v5975_v39  ;;  %v7770_v26 = vpop.f32.mrf.mxu0  ;;  %v5386_v49 = vadd.f32 %v5385_v16, %v5355_v45  ;;  %v5690_v58 = vpop.f32.mrf.mxu1  ;;  %v5977_v19 = vmul.f32 %v7811_v22, %v7811_v22 }
 0x255   : > { %7088 = vst [vmem:[%s10450_s19 + $0x38] sm:$0xff] %v6960_v55   ;;  %v5978_v52 = vmul.f32 %v5690_v58, %v5690_v58  ;;  %v6955_v60 = vpack.c.bf16 %v5128_v13, %v5127_v35  ;;  %v5319_v29 = vadd.f32 %v5318_v31, %v5128_v13  ;;  %v5357_v12 = vmul.f32 %v5128_v13, %v5128_v13 }
 0x256   : > { %v6007_v4 = vadd.f32 %v6006_v42, %v5976_v14  ;;  %v5939_v23 = vadd.f32 %v7811_v22, %v5938_v33  ;;  %v5052_v48 = vpop.f32.mrf.mxu0  ;;  %v5387_v27 = vadd.f32 %v5386_v49, %v5356_v34  ;;  %v7815_v62 = vpop.f32.mrf.mxu1  ;;  %v5980_v36 = vmul.f32 %v7814_v47, %v7814_v47 }
 0x257   : > { %v7040_v43 = vpack.c.bf16 %v7815_v62, %v7814_v47  ;;  %v5359_v56 = vmul.f32 %v5130_v61, %v5130_v61  ;;  %7087 = vst [vmem:[%s10450_s19 + $0x30] sm:$0xff] %v6955_v60   ;;  %v5320_v10 = vadd.f32 %v5319_v29, %v5129_v24  ;;  %v5131_v22 = vadd.f32 %v5052_v48, %v10423_v57 }
 0x258   : > { %v5940_v32 = vadd.f32 %v5939_v23, %v5690_v58  ;;  %v6008_v5 = vadd.f32 %v6007_v4, %v5977_v19  ;;  %v7771_v21 = vpop.f32.mrf.mxu0  ;;  %v5388_v7 = vadd.f32 %v5387_v27, %v5357_v12  ;;  %v5693_v53 = vpop.f32.mrf.mxu1  ;;  %v5133_v17 = vadd.f32 %v7770_v26, %v10417_v54 }
 0x259   : > { %7103 = vst [vmem:[%s10475_s8 + $0x38] sm:$0xff] %v7040_v43   ;;  %v7035_v40 = vpack.c.bf16 %v5693_v53, %v5690_v58  ;;  %v5979_v20 = vmul.f32 %v5693_v53, %v5693_v53  ;;  %v5321_v51 = vadd.f32 %v5320_v10, %v5130_v61  ;;  %v5134_v39 = vadd.f32 %v7771_v21, %v10426_v30 }
 0x25a   : > { %v6009_v44 = vadd.f32 %v6008_v5, %v5978_v52  ;;  %v5941_v3 = vadd.f32 %v5940_v32, %v5693_v53  ;;  %v5055_v2 = vpop.f32.mrf.mxu0  ;;  %v5389_v35 = vadd.f32 %v5388_v7, %v5358_v59  ;;  %v7818_v41 = vpop.f32.mrf.mxu1  ;;  %v5981_v11 = vmul.f32 %v7815_v62, %v7815_v62 }
 0x25b   : > { %7102 = vst [vmem:[%s10475_s8 + $0x30] sm:$0xff] %v7035_v40   ;;  %v5132_v57 = vadd.f32 %v5055_v2, %v10429_v38  ;;  %v5322_v63 = vadd.f32 %v5321_v51, %v5131_v22  ;;  %v5360_v55 = vmul.f32 %v5131_v22, %v5131_v22  ;;  %v6970_v42 = vpack.c.bf16 %v5134_v39, %v5133_v17 }
 0x25c   : > { %v5942_v24 = vadd.f32 %v7814_v47, %v5941_v3  ;;  %v6010_v45 = vadd.f32 %v6009_v44, %v5979_v20  ;;  %v7774_v16 = vpop.f32.mrf.mxu0  ;;  %v5390_v14 = vadd.f32 %v5389_v35, %v5359_v56  ;;  %v5706_v33 = vpop.f32.mrf.mxu1  ;;  %v5362_v30 = vmul.f32 %v5133_v17, %v5133_v17 }
 0x25d   : > { %v5982_v26 = vmul.f32 %v5706_v33, %v5706_v33  ;;  %v6965_v61 = vpack.c.bf16 %v5132_v57, %v5131_v22  ;;  %7090 = vst [vmem:[%s10450_s19 + $0x48] sm:$0xff] %v6970_v42   ;;  %v5323_v49 = vadd.f32 %v5322_v63, %v5132_v57  ;;  %v5361_v58 = vmul.f32 %v5132_v57, %v5132_v57 }
 0x25e   : > { %v6011_v59 = vadd.f32 %v6010_v45, %v5980_v36  ;;  %v5943_v54 = vadd.f32 %v7815_v62, %v5942_v24  ;;  %v5068_v31 = vpop.f32.mrf.mxu0  ;;  %v5391_v34 = vadd.f32 %v5390_v14, %v5360_v55  ;;  %v7819_v47 = vpop.f32.mrf.mxu1  ;;  %v5984_v38 = vmul.f32 %v7818_v41, %v7818_v41 }
 0x25f   : > { %v7050_v4 = vpack.c.bf16 %v7819_v47, %v7818_v41  ;;  %7089 = vst [vmem:[%s10450_s19 + $0x40] sm:$0xff] %v6965_v61   ;;  %v5363_v52 = vmul.f32 %v5134_v39, %v5134_v39  ;;  %v5324_v48 = vadd.f32 %v5323_v49, %v5133_v17  ;;  %v5135_v60 = vadd.f32 %v5068_v31, %v10437_v6 }
 0x260   : > { %v5944_v13 = vadd.f32 %v5943_v54, %v5706_v33  ;;  %v6012_v19 = vadd.f32 %v6011_v59, %v5981_v11  ;;  %v7775_v23 = vpop.f32.mrf.mxu0  ;;  %v5392_v27 = vadd.f32 %v5391_v34, %v5361_v58  ;;  %v5709_v62 = vpop.f32.mrf.mxu1  ;;  %v5137_v21 = vadd.f32 %v7774_v16, %v10434_v1 }
 0x261   : > { %7105 = vst [vmem:[%s10475_s8 + $0x48] sm:$0xff] %v7050_v4   ;;  %v7045_v12 = vpack.c.bf16 %v5709_v62, %v5706_v33  ;;  %v5983_v32 = vmul.f32 %v5709_v62, %v5709_v62  ;;  %v5325_v10 = vadd.f32 %v5324_v48, %v5134_v39  ;;  %v5138_v7 = vadd.f32 %v7775_v23, %v10440_v37 }
 0x262   : > { %v6013_v29 = vadd.f32 %v6012_v19, %v5982_v26  ;;  %v5945_v36 = vadd.f32 %v5944_v13, %v5709_v62  ;;  %v5071_v5 = vpop.f32.mrf.mxu0  ;;  %v5393_v43 = vadd.f32 %v5392_v27, %v5362_v30  ;;  %v7822_v56 = vpop.f32.mrf.mxu1  ;;  %v5985_v53 = vmul.f32 %v7819_v47, %v7819_v47 }
 0x263   : > { %7104 = vst [vmem:[%s10475_s8 + $0x40] sm:$0xff] %v7045_v12   ;;  %v5136_v6 = vadd.f32 %v5071_v5, %v10442_v0  ;;  %v5326_v3 = vadd.f32 %v5325_v10, %v5135_v60  ;;  %v5364_v20 = vmul.f32 %v5135_v60, %v5135_v60  ;;  %v6980_v17 = vpack.c.bf16 %v5138_v7, %v5137_v21 }
 0x264   : > { %v5946_v22 = vadd.f32 %v7818_v41, %v5945_v36  ;;  %v6014_v44 = vadd.f32 %v6013_v29, %v5983_v32  ;;  %v7778_v40 = vpop.f32.mrf.mxu0  ;;  %v5394_v2 = vadd.f32 %v5393_v43, %v5363_v52  ;;  %v5722_v35 = vpop.f32.mrf.mxu1  ;;  %v5366_v37 = vmul.f32 %v5137_v21, %v5137_v21 }
 0x265   : > { %v5986_v11 = vmul.f32 %v5722_v35, %v5722_v35  ;;  %v6975_v39 = vpack.c.bf16 %v5136_v6, %v5135_v60  ;;  %7092 = vst [vmem:[%s10450_s19 + $0x58] sm:$0xff] %v6980_v17   ;;  %v5327_v57 = vadd.f32 %v5326_v3, %v5136_v6  ;;  %v5365_v16 = vmul.f32 %v5136_v6, %v5136_v6 }
 0x266   : > { %v6015_v51 = vadd.f32 %v6014_v44, %v5984_v38  ;;  %v5947_v1 = vadd.f32 %v7819_v47, %v5946_v22  ;;  %v5084_v24 = vpop.f32.mrf.mxu0  ;;  %v5395_v45 = vadd.f32 %v5394_v2, %v5364_v20  ;;  %v7823_v41 = vpop.f32.mrf.mxu1  ;;  %v5988_v0 = vmul.f32 %v7822_v56, %v7822_v56 }
 0x267   : > { %v7060_v14 = vpack.c.bf16 %v7823_v41, %v7822_v56  ;;  %7091 = vst [vmem:[%s10450_s19 + $0x50] sm:$0xff] %v6975_v39   ;;  %v5367_v42 = vmul.f32 %v5138_v7, %v5138_v7  ;;  %v5328_v59 = vadd.f32 %v5327_v57, %v5137_v21  ;;  %v5139_v61 = vadd.f32 %v5084_v24, %v10455_v28 }
 0x268   : > { %v5948_v63 = vadd.f32 %v5947_v1, %v5722_v35  ;;  %v6016_v55 = vadd.f32 %v6015_v51, %v5985_v53  ;;  %v7779_v33 = vpop.f32.mrf.mxu0  ;;  %v5396_v54 = vadd.f32 %v5395_v45, %v5365_v16  ;;  %v5725_v26 = vpop.f32.mrf.mxu1  ;;  %v5141_v38 = vadd.f32 %v7778_v40, %v10445_v8 }
 0x269   : > { %7107 = vst [vmem:[%s10475_s8 + $0x58] sm:$0xff] %v7060_v14   ;;  %v7055_v30 = vpack.c.bf16 %v5725_v26, %v5722_v35  ;;  %v5987_v47 = vmul.f32 %v5725_v26, %v5725_v26  ;;  %v5329_v19 = vadd.f32 %v5328_v59, %v5138_v7  ;;  %v5142_v4 = vadd.f32 %v7779_v33, %v10458_v46 }
 0x26a   : > { %v6017_v31 = vadd.f32 %v6016_v55, %v5986_v11  ;;  %v5949_v34 = vadd.f32 %v5948_v63, %v5725_v26  ;;  %v5087_v49 = vpop.f32.mrf.mxu0  ;;  %v5397_v58 = vadd.f32 %v5396_v54, %v5366_v37  ;;  %v7826_v13 = vpop.f32.mrf.mxu1  ;;  %v5989_v23 = vmul.f32 %v7823_v41, %v7823_v41 }
 0x26b   : > { %7106 = vst [vmem:[%s10475_s8 + $0x50] sm:$0xff] %v7055_v30   ;;  %v5140_v28 = vadd.f32 %v5087_v49, %v10466_v15  ;;  %v5330_v62 = vadd.f32 %v5329_v19, %v5139_v61  ;;  %v5368_v60 = vmul.f32 %v5139_v61, %v5139_v61  ;;  %v6990_v36 = vpack.c.bf16 %v5142_v4, %v5141_v38 }
 0x26c   : > { %v5950_v52 = vadd.f32 %v7822_v56, %v5949_v34  ;;  %v6018_v48 = vadd.f32 %v6017_v31, %v5987_v47  ;;  %v7782_v27 = vpop.f32.mrf.mxu0  ;;  %v5398_v29 = vadd.f32 %v5397_v58, %v5367_v42  ;;  %v5738_v12 = vpop.f32.mrf.mxu1  ;;  %v5370_v46 = vmul.f32 %v5141_v38, %v5141_v38 }
 0x26d   : > { %v5990_v5 = vmul.f32 %v5738_v12, %v5738_v12  ;;  %v6985_v43 = vpack.c.bf16 %v5140_v28, %v5139_v61  ;;  %7094 = vst [vmem:[%s10450_s19 + $0x68] sm:$0xff] %v6990_v36   ;;  %v5331_v7 = vadd.f32 %v5330_v62, %v5140_v28  ;;  %v5369_v53 = vmul.f32 %v5140_v28, %v5140_v28 }
 0x26e   : > { %v6019_v32 = vadd.f32 %v6018_v48, %v5988_v0  ;;  %v5951_v8 = vadd.f32 %v7823_v41, %v5950_v52  ;;  %v5100_v21 = vpop.f32.mrf.mxu0  ;;  %v5399_v10 = vadd.f32 %v5398_v29, %v5368_v60  ;;  %v7827_v56 = vpop.f32.mrf.mxu1  ;;  %v5992_v15 = vmul.f32 %v7826_v13, %v7826_v13 }
 0x26f   : > { %v7070_v6 = vpack.c.bf16 %v7827_v56, %v7826_v13  ;;  %7093 = vst [vmem:[%s10450_s19 + $0x60] sm:$0xff] %v6985_v43   ;;  %v5371_v3 = vmul.f32 %v5142_v4, %v5142_v4  ;;  %v5332_v20 = vadd.f32 %v5331_v7, %v5141_v38  ;;  %v5143_v17 = vadd.f32 %v5100_v21, %v10482_v25 }
 0x270   : > { %v5952_v22 = vadd.f32 %v5951_v8, %v5738_v12  ;;  %v6020_v44 = vadd.f32 %v6019_v32, %v5989_v23  ;;  %v7783_v40 = vpop.f32.mrf.mxu0  ;;  %v5400_v2 = vadd.f32 %v5399_v10, %v5369_v53  ;;  %v5741_v35 = vpop.f32.mrf.mxu1  ;;  %v5145_v45 = vadd.f32 %v7782_v27, %v10470_v9 }
 0x271   : > { %7109 = vst [vmem:[%s10475_s8 + $0x68] sm:$0xff] %v7070_v6   ;;  %v7065_v1 = vpack.c.bf16 %v5741_v35, %v5738_v12  ;;  %v5991_v39 = vmul.f32 %v5741_v35, %v5741_v35  ;;  %v5333_v57 = vadd.f32 %v5332_v20, %v5142_v4  ;;  %v10540_v16 = vadd.f32 %v7783_v40, %v10485_v50 }
 0x272   : > { %v6021_v51 = vadd.f32 %v6020_v44, %v5990_v5  ;;  %v5953_v11 = vadd.f32 %v5952_v22, %v5741_v35  ;;  %v5103_v24 = vpop.f32.mrf.mxu0  ;;  %v5401_v37 = vadd.f32 %v5400_v2, %v5370_v46  ;;  %v10537_v41 = vpop.f32.mrf.mxu1  ;;  %v5993_v0 = vmul.f32 %v7827_v56, %v7827_v56 }
 0x273   : > { %7108 = vst [vmem:[%s10475_s8 + $0x60] sm:$0xff] %v7065_v1   ;;  %v5144_v55 = vadd.f32 %v5103_v24, %v10489_v18  ;;  %v5334_v14 = vadd.f32 %v5333_v57, %v5143_v17  ;;  %v5372_v33 = vmul.f32 %v5143_v17, %v5143_v17  ;;  %v7000_v9 = vpack.c.bf16 %v10540_v16, %v5145_v45 }
 0x274   : > { %v5954_v25 = vadd.f32 %v7826_v13, %v5953_v11  ;;  %v6022_v63 = vadd.f32 %v6021_v51, %v5991_v39  ;;  %v5402_v42 = vadd.f32 %v5401_v37, %v5371_v3  ;;  %v5754_v59 = vpop.f32.mrf.mxu1  ;;  %v5374_v38 = vmul.f32 %v5145_v45, %v5145_v45 }
 0x275   : > { %v5994_v26 = vmul.f32 %v5754_v59, %v5754_v59  ;;  %v6995_v18 = vpack.c.bf16 %v5144_v55, %v5143_v17  ;;  %7096 = vst [vmem:[%s10450_s19 + $0x78] sm:$0xff] %v7000_v9   ;;  %v5335_v30 = vadd.f32 %v5334_v14, %v5144_v55  ;;  %v5373_v34 = vmul.f32 %v5144_v55, %v5144_v55 }
 0x276   : > { %v6023_v50 = vadd.f32 %v6022_v63, %v5992_v15  ;;  %v5955_v54 = vadd.f32 %v7827_v56, %v5954_v25  ;;  %v5403_v61 = vadd.f32 %v5402_v42, %v5372_v33  ;;  %v7831_v31 = vpop.f32.mrf.mxu1 }
 0x277   : > { %v7080_v58 = vpack.c.bf16 %v7831_v31, %v10537_v41  ;;  %7095 = vst [vmem:[%s10450_s19 + $0x70] sm:$0xff] %v6995_v18   ;;  %v5336_v13 = vadd.f32 %v5335_v30, %v5145_v45 }
 0x278   : > { %v5956_v47 = vadd.f32 %v5955_v54, %v5754_v59  ;;  %v6024_v49 = vadd.f32 %v6023_v50, %v5993_v0  ;;  %v5404_v19 = vadd.f32 %v5403_v61, %v5373_v34  ;;  %v5757_v4 = vpop.f32.mrf.mxu1 }
 0x279   : > { %8091 = shalt.err (!%p8088_p0)
}
 0x27a   : > { %s8092_s23 = scalar_lea.hbm %s10550_s16, 2048  ;;  %s8096_s21 = scalar_lea.hbm %s10716_s4, 4096 }
 0x27b   : > { %p8093_p2 = scmp.ne.s32.totalorder %s10550_s16, %s8092_s23  ;;  %p8097_p3 = scmp.lt.s32.totalorder %s10550_s16, %s10716_s4 }
 0x27c   : > { %p8098_p6 = scmp.lt.s32.totalorder %s8096_s21, %s8092_s23 }
 0x27d   : > { %p8094_p9 = pnand %p8093_p2, %p10831_p13 }
 0x27e   : > { %p8099_p11 = por %p8098_p6, %p8097_p3 }
 0x27f   : > { %p8095_p1 = pneg %p8094_p9 }
 0x281   : > { %p8100_p12 = pnand %p8099_p11, %p8095_p1 }
 0x283   : > { %8103 = shalt.err (!%p8100_p12)
}
 0x284   : > { %s10731_s9 = smov 64   ;;  %s10732_s11 = smov 4   ;;  %v6025_v23 = vadd.f32 %v6024_v49, %v5994_v26  ;;  %7111 = vst [vmem:[%s10475_s8 + $0x78] sm:$0xff] %v7080_v58   ;;  %v7075_v52 = vpack.c.bf16 %v5757_v4, %v5754_v59  ;;  %v5957_v48 = vadd.f32 %v5956_v47, %v5757_v4  ;;  %v5995_v28 = vmul.f32 %v5757_v4, %v5757_v4 }
 0x285   : > { %7835 = dma.vmem_to_hbm [thread:$0]  (%p10831_p13), %s10552_s22, 2048, %s10550_s16, %s6038_s12, %s10731_s9, %s10731_s9, %s10732_s11   ;;  %v5375_v27 = vmul.f32 %v10540_v16, %v10540_v16  ;;  %v5337_v62 = vadd.f32 %v5336_v13, %v10540_v16  ;;  %v5405_v60 = vadd.f32 %v5404_v19, %v5374_v38  ;;  %v5996_v29 = vmul.f32 %v10537_v41, %v10537_v41 }
 0x286   : > { %7110 = vst [vmem:[%s10475_s8 + $0x70] sm:$0xff] %v7075_v52   ;;  %v5958_v12 = vadd.f32 %v10537_v41, %v5957_v48  ;;  %v6026_v36 = vadd.f32 %v6025_v23, %v5995_v28  ;;  %v5997_v5 = vmul.f32 %v7831_v31, %v7831_v31  ;;  %s6295_s17 = sshll.u32 %s8378_s29, 1  ;;  %s6042_s22 = sand.u32 1, %s8300_s28   ;;  %vm5413_vm6 = vcmask 1040384  }
 0x287   : > { %v5338_v32 = vrot.slane %v5337_v62, 4  ;;  %v5406_v8 = vadd.f32 %v5405_v60, %v5375_v27  ;;  %s6849_s16 = sshll.u32 %s8300_s28, 5  ;;  %s325_s12 = scalar_lea.vmem [#allocation6], %s6295_s17 }
 0x288   : > { %v5959_v43 = vadd.f32 %v7831_v31, %v5958_v12  ;;  %v6027_v21 = vadd.f32 %v6026_v36, %v5996_v29  ;;  %s6082_s20 = sshll.u32 %s325_s12, 4  ;;  %s6095_s23 = sshll.u32 %s10475_s8, 4  ;;  %s10603_s20 = int_to_ptr.vmem [resolvable:$true] %s6082_s20  ;;  %s10613_s23 = int_to_ptr.vmem [resolvable:$true] %s6095_s23 }
 0x289   : > { %v5339_v46 = vadd.f32 %v5338_v32, %v5337_v62  ;;  %v5407_v10 = vrot.slane %v5406_v8, 4  ;;  %s10598_s21 = scalar_lea.hbm %s10717_s5, %s6849_s16  ;;  %s10600_s18 = scalar_lea.vmem [#allocation9], %s6295_s17 }
 0x28a   : > { %v5960_v56 = vrot.slane %v5959_v43, 4  ;;  %v6028_v7 = vadd.f32 %v6027_v21, %v5997_v5  ;;  %s6111_s9 = sshll.u32 %s10600_s18, 4  ;;  %s10832_s11 = sshll.u32 %s8300_s28, 11  ;;  %s10620_s9 = int_to_ptr.vmem [resolvable:$true] %s6111_s9 }
 0x28b   : > { %v5340_v53 = vrot.slane %v5339_v46, 2  ;;  %v5408_v15 = vadd.f32 %v5407_v10, %v5406_v8  ;;  %s10610_s8 = scalar_lea.hbm %s10718_s6, %s10832_s11  ;;  %s10618_s15 = scalar_lea.hbm %s10719_s7, %s6849_s16 }
 0x28c   : > { %v5961_v22 = vadd.f32 %v5960_v56, %v5959_v43  ;;  %v6029_v44 = vrot.slane %v6028_v7, 4  ;;  %s10622_s0 = scalar_lea.sflag [#allocation7], %s6042_s22  ;;  %s8104_s1 = scalar_lea.vmem %s10603_s20, 32 }
 0x28d   : > { %v5341_v6 = vadd.f32 %v5340_v53, %v5339_v46  ;;  %v5409_v40 = vrot.slane %v5408_v15, 2  ;;  %p8105_p4 = scmp.ne.s32.totalorder %s10603_s20, %s8104_s1  ;;  %s8236_s28 = smov [#allocation6]  }
 0x28e   : > { %v5962_v3 = vrot.slane %v5961_v22, 2  ;;  %v6030_v20 = vadd.f32 %v6029_v44, %v6028_v7  ;;  %s8108_s11 = sshll.u32 %s8236_s28, 4  ;;  %s8109_s11 = int_to_ptr.vmem [resolvable:$false] %s8108_s11 }
 0x28f   : > { %v5342_v2 = vrot.slane %v5341_v6, 1  ;;  %v5410_v35 = vadd.f32 %v5409_v40, %v5408_v15  ;;  %p8106_p5 = pnand %p8105_p4, %p10831_p13  ;;  %s8110_s2 = scalar_lea.vmem %s8109_s11, 64 }
 0x290   : > { %v5963_v17 = vadd.f32 %v5962_v3, %v5961_v22  ;;  %v6031_v51 = vrot.slane %v6030_v20, 2  ;;  %p8111_p8 = scmp.lt.s32.totalorder %s10603_s20, %s8109_s11  ;;  %p8112_p10 = scmp.lt.s32.totalorder %s8110_s2, %s8104_s1 }
 0x291   : > { %v5411_v1 = vrot.slane %v5410_v35, 1  ;;  %v5343_v24 = vadd.f32 %v5342_v2, %v5341_v6  ;;  %p8107_p7 = pneg %p8106_p5 }
 0x292   : > { %v5964_v11 = vrot.slane %v5963_v17, 1  ;;  %v6032_v39 = vadd.f32 %v6031_v51, %v6030_v20  ;;  %p8113_p0 = por %p8112_p10, %p8111_p8 }
 0x293   : > { %v5412_v37 = vadd.f32 %v5411_v1, %v5410_v35 }
 0x294   : > { %v6033_v45 = vrot.slane %v6032_v39, 1  ;;  %v5965_v57 = vadd.f32 %v5964_v11, %v5963_v17  ;;  %p8114_p2 = pnand %p8113_p0, %p8107_p7 }
 0x295   : > { %v5414_v41 = vsel %vm5413_vm6, %v5343_v24, %v5412_v37 }
 0x296   : > { %5415 = vst [vmem:[%s325_s12] sm:$0x3] %v5414_v41  ;;  %v6034_v16 = vadd.f32 %v6033_v45, %v6032_v39 }
 0x297   : > { %8117 = shalt.err (!%p8114_p2)
}
 0x298   : > { %s8118_s22 = scalar_lea.hbm %s10598_s21, 32  ;;  %s8122_s17 = scalar_lea.hbm %s10717_s5, 64 }
 0x299   : > { %p8119_p9 = scmp.ne.s32.totalorder %s10598_s21, %s8118_s22  ;;  %p8123_p6 = scmp.lt.s32.totalorder %s10598_s21, %s10717_s5 }
 0x29a   : > { %p8124_p11 = scmp.lt.s32.totalorder %s8122_s17, %s8118_s22 }
 0x29b   : > { %p8120_p1 = pnand %p8119_p9, %p10831_p13 }
 0x29c   : > { %p8125_p12 = por %p8124_p11, %p8123_p6 }
 0x29d   : > { %p8121_p3 = pneg %p8120_p1 }
 0x29f   : > { %p8126_p4 = pnand %p8125_p12, %p8121_p3 }
 0x2a1   : > { %8129 = shalt.err (!%p8126_p4)
}
 0x2a2   : > { %7836 = dma.vmem_to_hbm [thread:$0]  (%p10831_p13), %s10603_s20, 32, %s10598_s21, %s10622_s0  }
 0x2a3   : > { %s8130_s2 = scalar_lea.vmem %s10613_s23, 2048  ;;  %s8237_s1 = smov [#allocation8]  }
 0x2a4   : > { %p8131_p5 = scmp.ne.s32.totalorder %s10613_s23, %s8130_s2  ;;  %s8134_s11 = sshll.u32 %s8237_s1, 4  ;;  %s8135_s11 = int_to_ptr.vmem [resolvable:$false] %s8134_s11 }
 0x2a5   : > { %s8136_s22 = scalar_lea.vmem %s8135_s11, 4096  ;;  %p8137_p10 = scmp.lt.s32.totalorder %s10613_s23, %s8135_s11 }
 0x2a6   : > { %p8132_p7 = pnand %p8131_p5, %p10831_p13  ;;  %p8138_p0 = scmp.lt.s32.totalorder %s8136_s22, %s8130_s2 }
 0x2a8   : > { %p8133_p8 = pneg %p8132_p7  ;;  %p8139_p2 = por %p8138_p0, %p8137_p10 }
 0x2aa   : > { %p8140_p9 = pnand %p8139_p2, %p8133_p8 }
 0x2ac   : > { %8143 = shalt.err (!%p8140_p9)
}
 0x2ad   : > { %s8144_s16 = scalar_lea.hbm %s10610_s8, 2048  ;;  %s8148_s12 = scalar_lea.hbm %s10718_s6, 4096 }
 0x2ae   : > { %p8145_p1 = scmp.ne.s32.totalorder %s10610_s8, %s8144_s16  ;;  %p8149_p11 = scmp.lt.s32.totalorder %s10610_s8, %s10718_s6 }
 0x2af   : > { %p8150_p12 = scmp.lt.s32.totalorder %s8148_s12, %s8144_s16 }
 0x2b0   : > { %p8146_p3 = pnand %p8145_p1, %p10831_p13 }
 0x2b1   : > { %p8151_p4 = por %p8150_p12, %p8149_p11 }
 0x2b2   : > { %p8147_p6 = pneg %p8146_p3 }
 0x2b4   : > { %p8152_p5 = pnand %p8151_p4, %p8147_p6 }
 0x2b6   : > { %8155 = shalt.err (!%p8152_p5)
}
 0x2b7   : > { %s10833_s28 = smov 4   ;;  %s10834_s2 = smov 64   ;;  %v6035_v0 = vsel %vm5413_vm6, %v5965_v57, %v6034_v16 }
 0x2b8   : > { %7837 = dma.vmem_to_hbm [thread:$0]  (%p10831_p13), %s10613_s23, 2048, %s10610_s8, %s10622_s0, %s10834_s2, %s10834_s2, %s10833_s28  }
 0x2b9   : > { %6036 = vst [vmem:[%s10600_s18] sm:$0x3] %v6035_v0  ;;  %s6053_s1 = scalar_lea.sflag [#allocation10], %s8378_s29  ;;  %s8156_s11 = scalar_lea.vmem %s10620_s9, 32 }
 0x2ba   : > { %p8157_p7 = scmp.ne.s32.totalorder %s10620_s9, %s8156_s11  ;;  %s8238_s22 = smov [#allocation9]  }
 0x2bb   : > { %s8160_s16 = sshll.u32 %s8238_s22, 4  ;;  %s8161_s16 = int_to_ptr.vmem [resolvable:$false] %s8160_s16 }
 0x2bc   : > { %p8158_p8 = pnand %p8157_p7, %p10831_p13  ;;  %s8162_s20 = scalar_lea.vmem %s8161_s16, 64 }
 0x2bd   : > { %p8163_p0 = scmp.lt.s32.totalorder %s10620_s9, %s8161_s16  ;;  %p8164_p2 = scmp.lt.s32.totalorder %s8162_s20, %s8156_s11 }
 0x2be   : > { %p8159_p10 = pneg %p8158_p8 }
 0x2bf   : > { %p8165_p9 = por %p8164_p2, %p8163_p0 }
 0x2c1   : > { %p8166_p1 = pnand %p8165_p9, %p8159_p10 }
 0x2c3   : > { %8169 = shalt.err (!%p8166_p1)
}
 0x2c4   : > { %s8170_s23 = scalar_lea.hbm %s10618_s15, 32  ;;  %s8174_s8 = scalar_lea.hbm %s10719_s7, 64 }
 0x2c5   : > { %p8171_p3 = scmp.ne.s32.totalorder %s10618_s15, %s8170_s23  ;;  %p8175_p12 = scmp.lt.s32.totalorder %s10618_s15, %s10719_s7 }
 0x2c6   : > { %p8176_p4 = scmp.lt.s32.totalorder %s8174_s8, %s8170_s23 }
 0x2c7   : > { %p8172_p6 = pnand %p8171_p3, %p10831_p13 }
 0x2c8   : > { %p8177_p5 = por %p8176_p4, %p8175_p12 }
 0x2c9   : > { %p8173_p11 = pneg %p8172_p6 }
 0x2cb   : > { %p8178_p7 = pnand %p8177_p5, %p8173_p11 }
 0x2cd   : > { %8181 = shalt.err (!%p8178_p7)
}
 0x2ce   : > { %7838 = dma.vmem_to_hbm [thread:$0]  (%p10831_p13), %s10620_s9, 32, %s10618_s15, %s6053_s1  }
 0x2cf PF: > { %s6123_s12 = sand.u32 1, %s8216_s24   ;;  %p10835_p8 = scmp.ne.s32.totalorder %s10739_s14, 0 }
 0x2d0   : > { %p10836_p10 = scmp.ge.s32.totalorder %s8228_s27, 2  ;;  %s6124_s17 = scalar_lea.sflag [#allocation4], %s6123_s12 }
 0x2d2   : > { %p7848_p0 = pnand %p10836_p10, %p10835_p8 }
 0x2d4   : > { %p7849_p2 = pneg %p7848_p0 }
 0x2d6   : > { %8203 = dma.done.wait (%p7849_p2), %s6124_s17, 2048  }
 0x2d7   : > { %8205 = vsyncadd (%p7849_p2), %s6124_s17, 4294965248  ;;  %s10837_s19 = sadd.s32 4294967294, %s8228_s27  }
 0x2d8   : > { %s6132_s28 = sand.u32 1, %s10837_s19  }
 0x2d9   : > { %s6133_s2 = scalar_lea.sflag [#allocation7], %s6132_s28 }
 0x2da   : > { %8207 = dma.done.wait (%p7849_p2), %s6133_s2, 2080  }
 0x2db   : > { %8209 = vsyncadd (%p7849_p2), %s6133_s2, 4294965216  ;;  %s6151_s13 = scalar_lea.sflag [#allocation10], %s6123_s12 }
 0x2dc   : > { %8211 = dma.done.wait (%p7849_p2), %s6151_s13, 32  }
 0x2dd   : > { %8213 = vsyncadd (%p7849_p2), %s6151_s13, 4294967264  ;;  %p27_p13 = scmp.ge.s32.totalorder %s8304_s30, 4   ;;  %s10838_s24 = smov %s8220_s25 }
 0x2de   : > { %s10839_s25 = smov %s8224_s26  ;;  %s10840_s26 = smov %s8316_s10 }
 0x2df   : > { %s10841_s27 = smov %s8304_s30  ;;  %29 = sbr.rel (!%p27_p13) target bundleno = 13 (0xd), region = 135 }
 0x2e4   :  { %6156 = vsyncpa [#allocation3], 1 }
 0x2e5   :  { %6158 = vsyncpa [#allocation3 + $0x1], 1 }
 0x2e6   :  { %6159 = vsyncpa [#allocation4], 1 }
 0x2e7   :  { %6161 = vsyncpa [#allocation4 + $0x1], 1 }
 0x2e8   :  { %6162 = vsyncpa [#allocation7], 1 }
 0x2e9   :  { %6164 = vsyncpa [#allocation7 + $0x1], 1 }
 0x2ea   :  { %6165 = vsyncpa [#allocation10], 1 }
 0x2eb   :  { %6167 = vsyncpa [#allocation10 + $0x1], 1 }

</bundles_post_ra>
